<compile_context>
chip_gen: v7x
topology: tpu7x:2x2x1
jax: 0.10.0
libtpu: 0.0.40
codegen_flags: <defaults>
</compile_context>

<pallas_src>
import jax
import jax.numpy as jnp
from jax.experimental import pallas as pl
from jax.experimental.pallas import tpu as pltpu

# ----------------------------------------------------------------------------
# Small demo configuration (M/K/N shrunk for the demo, channel/MLP widths kept
# exactly as in the PyTorch module definition).
# ----------------------------------------------------------------------------
B = 2          # batch
N = 64         # input points per cloud
D = 5          # coordinate dimension (full point feature, see note above)
IN_CHANNELS = 2 * D                      # = 10, constructor arg of pointnet2

SA1 = dict(M=16, radius=0.2, K=8,  c_in=IN_CHANNELS, mlp=(64, 64, 128),   group_all=False)
SA2 = dict(M=8,  radius=0.4, K=8,  c_in=133,         mlp=(128, 128, 256), group_all=False)
SA3 = dict(M=None, radius=None, K=None, c_in=261,    mlp=(256, 512, 1024), group_all=True)

BN_EPS = 1e-5


def _round_up(x, m):
    return (x + m - 1) // m * m


# ----------------------------------------------------------------------------
# Per-chip-generation tuning (epilogue dtype, grid-step / row-cap policy, VMEM).
# ----------------------------------------------------------------------------
def _tpu_generation():
    try:
        kind = jax.devices()[0].device_kind.lower()
    except Exception:
        return 0
    if "7x" in kind or "v7" in kind:
        return 7
    for g in (6, 5, 4, 3, 2):
        if f"v{g}" in kind:
            return g
    return 0


def _chip_config():
    gen = _tpu_generation()
    if gen >= 7:
        # v7x: 2 TensorCores split the "parallel" grid axis -> keep >= 2 steps
        # per core so the grouped-tile DMA stays double-buffered; 64 MiB VMEM.
        return dict(min_steps=4, max_rows=1024, vmem_limit=40 * 1024 * 1024,
                    act_dtype=jnp.bfloat16)
    if gen == 6:
        # v6e: single TC, 256x256 MXU -> fewer / larger steps; bf16 VALU.
        return dict(min_steps=1, max_rows=2048, vmem_limit=64 * 1024 * 1024,
                    act_dtype=jnp.bfloat16)
    # v5e / older / unknown: single TC, no bf16 VALU -> f32 epilogue.
    return dict(min_steps=1, max_rows=2048, vmem_limit=64 * 1024 * 1024,
                act_dtype=jnp.float32)


def _choose_tile_g(G, K, min_steps, max_rows):
    """Largest tile_g dividing G such that (a) the grid keeps >= min_steps steps
    whenever G allows it, (b) the matmul M-dim tile_g*K stays under the per-chip
    row cap, preferring bf16-sublane-aligned row counts (multiple of 16)."""
    need = min(min_steps, G)
    best, best_aligned = 1, None
    for d in range(1, G + 1):
        if G % d:
            continue
        if G // d < need:
            continue
        if d * K > max_rows:
            continue
        best = d
        if (d * K) % 16 == 0:
            best_aligned = d
    return best_aligned if best_aligned is not None else best


# ----------------------------------------------------------------------------
# Pallas kernel: 3x (bf16 channel matmul, f32 accumulate) + folded-BN bias +
# ReLU, then max-pool over the K neighbor axis.
#  - x_ref:  (tile_g*K, Cin) bf16, Cin unpadded (zero-padded to the weight's
#            row count inside VMEM).
#  - b1/b2:  epilogue dtype (bf16 on v6e/v7x, f32 on v5e); b3 always f32.
# ----------------------------------------------------------------------------
def _sa_mlp_kernel(x_ref,
                   w1_ref, b1_ref,
                   w2_ref, b2_ref,
                   w3_ref, b3_ref,
                   out_ref):
    rows, cin = x_ref.shape
    tg = out_ref.shape[0]
    k = rows // tg
    c3 = out_ref.shape[-1]
    cin_pad = w1_ref.shape[0]

    x = x_ref[...]                                            # bf16 (rows, Cin)
    if cin_pad != cin:
        # Pad the contraction dim to a lane multiple in VMEM (nearly free; the
        # matching weight rows are pre-padded with zeros -> exact result).
        x = jnp.concatenate(
            [x, jnp.zeros((rows, cin_pad - cin), x.dtype)], axis=-1)

    h = jnp.dot(x, w1_ref[...], preferred_element_type=jnp.float32)
    h = jnp.maximum(h.astype(b1_ref.dtype) + b1_ref[...], 0)  # bias+ReLU epilogue

    h = jnp.dot(h.astype(w2_ref.dtype), w2_ref[...],
                preferred_element_type=jnp.float32)
    h = jnp.maximum(h.astype(b2_ref.dtype) + b2_ref[...], 0)

    h = jnp.dot(h.astype(w3_ref.dtype), w3_ref[...],
                preferred_element_type=jnp.float32)
    h = jnp.maximum(h + b3_ref[...], 0.0)                     # final epilogue in f32

    # TODO(synk): at production group_all sizes (K = N = 1024+) turn this into a
    # running max over K-chunks so live activations don't scale with N.
    out_ref[...] = h.reshape(tg, k, c3).max(axis=1, keepdims=True)


def sa_mlp_maxpool(grouped, layers):
    """grouped: (G, K, Cin) bf16 (unpadded channels).
    layers: 3 tuples (W_bf16 (Cin_pad,Cout), bias_f32 (1,Cout)) with the BN
    scale already folded into W."""
    G, K, Cin = grouped.shape
    (w1, b1), (w2, b2), (w3, b3) = layers
    C3 = w3.shape[1]

    chip = _chip_config()
    act_dtype = chip["act_dtype"]

    tile_g = _choose_tile_g(G, K, chip["min_steps"], chip["max_rows"])
    grid = (G // tile_g,)

    # 2D row slab: no in-kernel (tg,K,C)->(tg*K,C) relayout.
    x2d = grouped.reshape(G * K, Cin)

    b1 = b1.astype(act_dtype)
    b2 = b2.astype(act_dtype)
    b3 = b3.astype(jnp.float32)

    # Constant-index operands: index_map always returns block 0, so the
    # pipeline only fetches them once (no per-step re-DMA).
    def _const(shape):
        nd = len(shape)
        return pl.BlockSpec(shape, lambda i, _nd=nd: (0,) * _nd)

    in_specs = [
        pl.BlockSpec((tile_g * K, Cin), lambda i: (i, 0)),
        _const(w1.shape), _const(b1.shape),
        _const(w2.shape), _const(b2.shape),
        _const(w3.shape), _const(b3.shape),
    ]
    # Output laid out (G, 1, C3): last two block dims are (1, C3) = (full,
    # lane-dense), so tile_g is free of the sublane multiple-of-8 constraint.
    out_specs = pl.BlockSpec((tile_g, 1, C3), lambda i: (i, 0, 0))

    out = pl.pallas_call(
        _sa_mlp_kernel,
        out_shape=jax.ShapeDtypeStruct((G, 1, C3), jnp.float32),
        grid=grid,
        in_specs=in_specs,
        out_specs=out_specs,
        compiler_params=pltpu.CompilerParams(
            dimension_semantics=("parallel",),
            vmem_limit_bytes=chip["vmem_limit"],
        ),
    )(x2d, w1, b1, w2, b2, w3, b3)
    return out.reshape(G, C3)


# ----------------------------------------------------------------------------
# Plain-JAX glue: farthest point sampling, ball query, gathers.
# ----------------------------------------------------------------------------
def farthest_point_sampling(xyz, M):
    # TODO(synk): PyTorch FPS starts from a random index; we start at index 0
    # deterministically for reproducibility. Sequential by nature.
    Bb, Nn, _ = xyz.shape

    def body(i, state):
        inds, dists, farthest = state
        inds = inds.at[:, i].set(farthest)
        centroid = jnp.take_along_axis(xyz, farthest[:, None, None], axis=1)  # (B,1,D)
        d = jnp.sum((xyz - centroid) ** 2, axis=-1)                           # (B,N)
        dists = jnp.minimum(dists, d)
        farthest = jnp.argmax(dists, axis=-1).astype(jnp.int32)
        return inds, dists, farthest

    inds0 = jnp.zeros((Bb, M), jnp.int32)
    dists0 = jnp.full((Bb, Nn), 1e10, jnp.float32)
    far0 = jnp.zeros((Bb,), jnp.int32)
    inds, _, _ = jax.lax.fori_loop(0, M, body, (inds0, dists0, far0))
    return inds


def ball_query(xyz, new_xyz, radius, K):
    Bb, Nn, _ = xyz.shape
    Mm = new_xyz.shape[1]
    d2 = jnp.sum((new_xyz[:, :, None, :] - xyz[:, None, :, :]) ** 2, axis=-1)  # (B,M,N)
    idx = jnp.broadcast_to(jnp.arange(Nn, dtype=jnp.int32), (Bb, Mm, Nn))
    idx = jnp.where(d2 > radius * radius, jnp.int32(Nn), idx)
    # Masked partial selection of the K smallest (i.e. first-in-radius) indices
    # instead of a full sort over N.
    neg_topk, _ = jax.lax.top_k(-idx, K)
    idx = -neg_topk                                   # ascending index order
    first = idx[:, :, :1]                             # centroid is always in-radius
    idx = jnp.where(idx == Nn, first, idx)
    return idx


def gather_points(pts, inds):
    # pts: (B, N, C); inds: (B, M) or (B, M, K)
    Bb, Nn, C = pts.shape
    flat = inds.reshape(Bb, -1)
    out = jnp.take_along_axis(pts, flat[..., None], axis=1)
    return out.reshape((Bb,) + inds.shape[1:] + (C,))


def sa_module(xyz, points, cfg, layers):
    """One PointNet_SA_Module forward. xyz: (B,M_prev,D), points: (B,M_prev,C)."""
    # TODO(synk): fuse this neighbor gather into the Pallas kernel
    # (PrefetchScalarGridSpec on the ball-query indices + in-kernel row gather)
    # instead of materializing the (B,M,K,C) grouped tensor in HBM.
    if cfg["group_all"]:
        Bb, Nn, Dd = xyz.shape
        new_xyz = jnp.zeros((Bb, 1, Dd), jnp.float32)
        # sample_and_group_all: concat(xyz, points) over feature dim, no centering
        grouped = jnp.concatenate([xyz, points], axis=-1)[:, None, :, :]  # (B,1,N,D+C)
    else:
        fps_inds = farthest_point_sampling(xyz, cfg["M"])
        new_xyz = jnp.take_along_axis(xyz, fps_inds[..., None], axis=1)   # (B,M,D)
        ginds = ball_query(xyz, new_xyz, cfg["radius"], cfg["K"])         # (B,M,K)
        grouped_xyz = gather_points(xyz, ginds) - new_xyz[:, :, None, :]  # centered
        grouped_pts = gather_points(points, ginds)
        grouped = jnp.concatenate([grouped_xyz, grouped_pts], axis=-1)    # (B,M,K,D+C)

    Bb, Mg, Kg, Cin = grouped.shape
    # Single cast to bf16 (fused with the concat by XLA) -- no f32 round trip,
    # no HBM-side channel padding.
    grouped = grouped.astype(jnp.bfloat16)
    pooled = sa_mlp_maxpool(grouped.reshape(Bb * Mg, Kg, Cin), layers)
    return new_xyz, pooled.reshape(Bb, Mg, -1)


# ----------------------------------------------------------------------------
# Deterministic parameter init (Conv2d 1x1 bias=False + BatchNorm2d).
# BN is applied in eval mode with freshly-initialized running stats
# (mean=0, var=1); its per-channel scale is folded into the (bf16) weight and
# its bias kept as a per-channel bias.
# TODO(synk): a freshly-constructed PyTorch module defaults to train-mode BN
# (batch statistics); eval-mode running-stats BN is implemented here.
# ----------------------------------------------------------------------------
def init_sa_layers(key, c_in, mlp):
    layers = []
    cur_in = c_in
    cur_in_pad = _round_up(c_in, 128)   # only layer-1 weight ROWS are padded;
                                        # the matching feature pad happens in VMEM.
    for c_out in mlp:
        key, kw, kg, kb = jax.random.split(key, 4)
        w = jax.random.normal(kw, (cur_in, c_out), jnp.float32) / jnp.sqrt(cur_in)
        gamma = 1.0 + 0.1 * jax.random.normal(kg, (c_out,), jnp.float32)
        beta = 0.05 * jax.random.normal(kb, (c_out,), jnp.float32)
        run_mean = jnp.zeros((c_out,), jnp.float32)
        run_var = jnp.ones((c_out,), jnp.float32)
        scale = gamma / jnp.sqrt(run_var + BN_EPS)
        bias = beta - run_mean * scale
        # Fold BN scale into the weight; zero-pad contraction rows to cur_in_pad.
        w_folded = w * scale[None, :]
        w_padded = jnp.zeros((cur_in_pad, c_out), jnp.float32).at[:cur_in].set(w_folded)
        layers.append((w_padded.astype(jnp.bfloat16), bias[None, :].astype(jnp.float32)))
        cur_in = c_out
        cur_in_pad = c_out              # intermediate activations are not padded
    return key, layers


def init_params(key):
    key, sa1 = init_sa_layers(key, SA1["c_in"], SA1["mlp"])
    key, sa2 = init_sa_layers(key, SA2["c_in"], SA2["mlp"])
    key, sa3 = init_sa_layers(key, SA3["c_in"], SA3["mlp"])
    return {"sa1": sa1, "sa2": sa2, "sa3": sa3}


# ----------------------------------------------------------------------------
# pointnet2.forward
# ----------------------------------------------------------------------------
@jax.jit
def pointnet2_forward(points_bcn, params):
    # points_bcn: (B, D, N), same as PyTorch's (B, C, N) input; forward permutes to (B, N, D).
    pts = jnp.transpose(points_bcn, (0, 2, 1)).astype(jnp.float32)
    xyz = pts  # the module uses the full (5-D) point features as coordinates
    outputs = []
    new_xyz, new_points = sa_module(xyz, pts, SA1, params["sa1"])
    outputs.append(new_points)                                   # (B, M1, 128)
    new_xyz, new_points = sa_module(new_xyz, new_points, SA2, params["sa2"])
    outputs.append(new_points)                                   # (B, M2, 256)
    new_xyz, new_points = sa_module(new_xyz, new_points, SA3, params["sa3"])
    outputs.append(new_points)                                   # (B, 1, 1024)
    return outputs


if __name__ == "__main__":
    key = jax.random.PRNGKey(0)
    key, kp = jax.random.split(key)
    points = jax.random.uniform(kp, (B, D, N), jnp.float32)  # (batch, 5, num_points)

    params = init_params(key)

    outs = pointnet2_forward(points, params)
    outs = [jax.block_until_ready(o) for o in outs]

    assert outs[0].shape == (B, SA1["M"], 128)
    assert outs[1].shape == (B, SA2["M"], 256)
    assert outs[2].shape == (B, 1, 1024)
    assert all(bool(jnp.all(jnp.isfinite(o))) for o in outs)

    print("KERNEL_OK")
</pallas_src>

<mosaic_0001>
module attributes {stable_mosaic.version = 11 : i64} {
  func.func @_sa_mlp_kernel(%arg0: i32, %arg1: memref<256x10xbf16, #tpu.memory_space<vmem>>, %arg2: memref<128x64xbf16, #tpu.memory_space<vmem>>, %arg3: memref<1x64xf32, #tpu.memory_space<vmem>>, %arg4: memref<64x64xbf16, #tpu.memory_space<vmem>>, %arg5: memref<1x64xf32, #tpu.memory_space<vmem>>, %arg6: memref<64x128xbf16, #tpu.memory_space<vmem>>, %arg7: memref<1x128xf32, #tpu.memory_space<vmem>>, %arg8: memref<32x1x128xf32, #tpu.memory_space<vmem>>) attributes {dimension_semantics = [#tpu.dimension_semantics<parallel>], iteration_bounds = array<i64: 1>, scalar_prefetch = 0 : i64, scratch_operands = 0 : i64, tpu.core_type = #tpu.core_type<tc>, window_params = [{transform_indices = @transform_0, window_bounds = array<i64: 256, 10>}, {pipeline_mode = #tpu.pipeline_mode<synchronous>, transform_indices = @transform_1, window_bounds = array<i64: 128, 64>}, {pipeline_mode = #tpu.pipeline_mode<synchronous>, transform_indices = @transform_2, window_bounds = array<i64: 1, 64>}, {pipeline_mode = #tpu.pipeline_mode<synchronous>, transform_indices = @transform_3, window_bounds = array<i64: 64, 64>}, {pipeline_mode = #tpu.pipeline_mode<synchronous>, transform_indices = @transform_4, window_bounds = array<i64: 1, 64>}, {pipeline_mode = #tpu.pipeline_mode<synchronous>, transform_indices = @transform_5, window_bounds = array<i64: 64, 128>}, {pipeline_mode = #tpu.pipeline_mode<synchronous>, transform_indices = @transform_6, window_bounds = array<i64: 1, 128>}, {transform_indices = @transform_7, window_bounds = array<i64: 32, 1, 128>}]} {
    %c0 = arith.constant 0 : index
    %c0_0 = arith.constant 0 : index
    %0 = vector.load %arg1[%c0, %c0_0] : memref<256x10xbf16, #tpu.memory_space<vmem>>, vector<256x10xbf16>
    %cst = arith.constant 0.000000e+00 : bf16
    %1 = vector.broadcast %cst : bf16 to vector<256x118xbf16>
    %2 = tpu.concatenate %0, %1 in 1 : vector<256x10xbf16>, vector<256x118xbf16> -> vector<256x128xbf16>
    %c0_1 = arith.constant 0 : index
    %c0_2 = arith.constant 0 : index
    %3 = vector.load %arg2[%c0_1, %c0_2] : memref<128x64xbf16, #tpu.memory_space<vmem>>, vector<128x64xbf16>
    %cst_3 = arith.constant dense<0.000000e+00> : vector<256x64xf32>
    %4 = tpu.matmul %2, %3, %cst_3 {dimension_numbers = #tpu.dot_dimension_numbers<[1], [0], [0], [1], [0, 0, 1, 1], [], []>} : vector<256x128xbf16>, vector<128x64xbf16>, vector<256x64xf32> -> vector<256x64xf32>
    %c0_4 = arith.constant 0 : index
    %c0_5 = arith.constant 0 : index
    %5 = vector.load %arg3[%c0_4, %c0_5] : memref<1x64xf32, #tpu.memory_space<vmem>>, vector<1x64xf32>
    %6 = vector.broadcast %5 : vector<1x64xf32> to vector<256x64xf32>
    %7 = arith.addf %4, %6 : vector<256x64xf32>
    %cst_6 = arith.constant 0.000000e+00 : f32
    %8 = vector.broadcast %cst_6 : f32 to vector<256x64xf32>
    %9 = arith.maximumf %7, %8 : vector<256x64xf32>
    %10 = arith.truncf %9 : vector<256x64xf32> to vector<256x64xbf16>
    %c0_7 = arith.constant 0 : index
    %c0_8 = arith.constant 0 : index
    %11 = vector.load %arg4[%c0_7, %c0_8] : memref<64x64xbf16, #tpu.memory_space<vmem>>, vector<64x64xbf16>
    %cst_9 = arith.constant dense<0.000000e+00> : vector<256x64xf32>
    %12 = tpu.matmul %10, %11, %cst_9 {dimension_numbers = #tpu.dot_dimension_numbers<[1], [0], [0], [1], [0, 0, 1, 1], [], []>} : vector<256x64xbf16>, vector<64x64xbf16>, vector<256x64xf32> -> vector<256x64xf32>
    %c0_10 = arith.constant 0 : index
    %c0_11 = arith.constant 0 : index
    %13 = vector.load %arg5[%c0_10, %c0_11] : memref<1x64xf32, #tpu.memory_space<vmem>>, vector<1x64xf32>
    %14 = vector.broadcast %13 : vector<1x64xf32> to vector<256x64xf32>
    %15 = arith.addf %12, %14 : vector<256x64xf32>
    %cst_12 = arith.constant 0.000000e+00 : f32
    %16 = vector.broadcast %cst_12 : f32 to vector<256x64xf32>
    %17 = arith.maximumf %15, %16 : vector<256x64xf32>
    %18 = arith.truncf %17 : vector<256x64xf32> to vector<256x64xbf16>
    %c0_13 = arith.constant 0 : index
    %c0_14 = arith.constant 0 : index
    %19 = vector.load %arg6[%c0_13, %c0_14] : memref<64x128xbf16, #tpu.memory_space<vmem>>, vector<64x128xbf16>
    %cst_15 = arith.constant dense<0.000000e+00> : vector<256x128xf32>
    %20 = tpu.matmul %18, %19, %cst_15 {dimension_numbers = #tpu.dot_dimension_numbers<[1], [0], [0], [1], [0, 0, 1, 1], [], []>} : vector<256x64xbf16>, vector<64x128xbf16>, vector<256x128xf32> -> vector<256x128xf32>
    %c0_16 = arith.constant 0 : index
    %c0_17 = arith.constant 0 : index
    %21 = vector.load %arg7[%c0_16, %c0_17] : memref<1x128xf32, #tpu.memory_space<vmem>>, vector<1x128xf32>
    %22 = vector.broadcast %21 : vector<1x128xf32> to vector<256x128xf32>
    %23 = arith.addf %20, %22 : vector<256x128xf32>
    %cst_18 = arith.constant 0.000000e+00 : f32
    %24 = vector.broadcast %cst_18 : f32 to vector<256x128xf32>
    %25 = arith.maximumf %23, %24 : vector<256x128xf32>
    %26 = vector.shape_cast %25 : vector<256x128xf32> to vector<32x8x128xf32>
    %cst_19 = arith.constant dense<0xFF800000> : vector<32x128xf32>
    %27 = vector.multi_reduction <maximumf>, %26, %cst_19 [1] : vector<32x8x128xf32> to vector<32x128xf32>
    %28 = vector.shape_cast %27 : vector<32x128xf32> to vector<32x1x128xf32>
    %c0_20 = arith.constant 0 : index
    %c0_21 = arith.constant 0 : index
    %c0_22 = arith.constant 0 : index
    %29 = vector.load %arg8[%c0_20, %c0_21, %c0_22] : memref<32x1x128xf32, #tpu.memory_space<vmem>>, vector<32x1x128xf32>
    tpu.vector_store %arg8[%c0_20, %c0_21, %c0_22], %28 {strides = array<i32>} : memref<32x1x128xf32, #tpu.memory_space<vmem>>, vector<32x1x128xf32>,
    return
  }
  func.func @transform_0(%arg0: i32) -> (i32, i32) {
    %c0_i32 = arith.constant 0 : i32
    %c0_i32_0 = arith.constant 0 : i32
    return %arg0, %c0_i32 : i32, i32
  }
  func.func @transform_1(%arg0: i32) -> (i32, i32) {
    %c0_i32 = arith.constant 0 : i32
    %c0_i32_0 = arith.constant 0 : i32
    %c0_i32_1 = arith.constant 0 : i32
    return %c0_i32, %c0_i32_0 : i32, i32
  }
  func.func @transform_2(%arg0: i32) -> (i32, i32) {
    %c0_i32 = arith.constant 0 : i32
    %c0_i32_0 = arith.constant 0 : i32
    %c0_i32_1 = arith.constant 0 : i32
    return %c0_i32, %c0_i32_0 : i32, i32
  }
  func.func @transform_3(%arg0: i32) -> (i32, i32) {
    %c0_i32 = arith.constant 0 : i32
    %c0_i32_0 = arith.constant 0 : i32
    %c0_i32_1 = arith.constant 0 : i32
    return %c0_i32, %c0_i32_0 : i32, i32
  }
  func.func @transform_4(%arg0: i32) -> (i32, i32) {
    %c0_i32 = arith.constant 0 : i32
    %c0_i32_0 = arith.constant 0 : i32
    %c0_i32_1 = arith.constant 0 : i32
    return %c0_i32, %c0_i32_0 : i32, i32
  }
  func.func @transform_5(%arg0: i32) -> (i32, i32) {
    %c0_i32 = arith.constant 0 : i32
    %c0_i32_0 = arith.constant 0 : i32
    %c0_i32_1 = arith.constant 0 : i32
    return %c0_i32, %c0_i32_0 : i32, i32
  }
  func.func @transform_6(%arg0: i32) -> (i32, i32) {
    %c0_i32 = arith.constant 0 : i32
    %c0_i32_0 = arith.constant 0 : i32
    %c0_i32_1 = arith.constant 0 : i32
    return %c0_i32, %c0_i32_0 : i32, i32
  }
  func.func @transform_7(%arg0: i32) -> (i32, i32, i32) {
    %c0_i32 = arith.constant 0 : i32
    %c0_i32_0 = arith.constant 0 : i32
    %c0_i32_1 = arith.constant 0 : i32
    return %arg0, %c0_i32, %c0_i32_0 : i32, i32, i32
  }
}

module attributes {stable_mosaic.version = 11 : i64} {
  func.func @_sa_mlp_kernel(%arg0: i32, %arg1: memref<128x133xbf16, #tpu.memory_space<vmem>>, %arg2: memref<256x128xbf16, #tpu.memory_space<vmem>>, %arg3: memref<1x128xf32, #tpu.memory_space<vmem>>, %arg4: memref<128x128xbf16, #tpu.memory_space<vmem>>, %arg5: memref<1x128xf32, #tpu.memory_space<vmem>>, %arg6: memref<128x256xbf16, #tpu.memory_space<vmem>>, %arg7: memref<1x256xf32, #tpu.memory_space<vmem>>, %arg8: memref<16x1x256xf32, #tpu.memory_space<vmem>>) attributes {dimension_semantics = [#tpu.dimension_semantics<parallel>], iteration_bounds = array<i64: 1>, scalar_prefetch = 0 : i64, scratch_operands = 0 : i64, tpu.core_type = #tpu.core_type<tc>, window_params = [{transform_indices = @transform_0, window_bounds = array<i64: 128, 133>}, {pipeline_mode = #tpu.pipeline_mode<synchronous>, transform_indices = @transform_1, window_bounds = array<i64: 256, 128>}, {pipeline_mode = #tpu.pipeline_mode<synchronous>, transform_indices = @transform_2, window_bounds = array<i64: 1, 128>}, {pipeline_mode = #tpu.pipeline_mode<synchronous>, transform_indices = @transform_3, window_bounds = array<i64: 128, 128>}, {pipeline_mode = #tpu.pipeline_mode<synchronous>, transform_indices = @transform_4, window_bounds = array<i64: 1, 128>}, {pipeline_mode = #tpu.pipeline_mode<synchronous>, transform_indices = @transform_5, window_bounds = array<i64: 128, 256>}, {pipeline_mode = #tpu.pipeline_mode<synchronous>, transform_indices = @transform_6, window_bounds = array<i64: 1, 256>}, {transform_indices = @transform_7, window_bounds = array<i64: 16, 1, 256>}]} {
    %c0 = arith.constant 0 : index
    %c0_0 = arith.constant 0 : index
    %0 = vector.load %arg1[%c0, %c0_0] : memref<128x133xbf16, #tpu.memory_space<vmem>>, vector<128x133xbf16>
    %cst = arith.constant 0.000000e+00 : bf16
    %1 = vector.broadcast %cst : bf16 to vector<128x123xbf16>
    %2 = tpu.concatenate %0, %1 in 1 : vector<128x133xbf16>, vector<128x123xbf16> -> vector<128x256xbf16>
    %c0_1 = arith.constant 0 : index
    %c0_2 = arith.constant 0 : index
    %3 = vector.load %arg2[%c0_1, %c0_2] : memref<256x128xbf16, #tpu.memory_space<vmem>>, vector<256x128xbf16>
    %cst_3 = arith.constant dense<0.000000e+00> : vector<128x128xf32>
    %4 = tpu.matmul %2, %3, %cst_3 {dimension_numbers = #tpu.dot_dimension_numbers<[1], [0], [0], [1], [0, 0, 1, 1], [], []>} : vector<128x256xbf16>, vector<256x128xbf16>, vector<128x128xf32> -> vector<128x128xf32>
    %c0_4 = arith.constant 0 : index
    %c0_5 = arith.constant 0 : index
    %5 = vector.load %arg3[%c0_4, %c0_5] : memref<1x128xf32, #tpu.memory_space<vmem>>, vector<1x128xf32>
    %6 = vector.broadcast %5 : vector<1x128xf32> to vector<128x128xf32>
    %7 = arith.addf %4, %6 : vector<128x128xf32>
    %cst_6 = arith.constant 0.000000e+00 : f32
    %8 = vector.broadcast %cst_6 : f32 to vector<128x128xf32>
    %9 = arith.maximumf %7, %8 : vector<128x128xf32>
    %10 = arith.truncf %9 : vector<128x128xf32> to vector<128x128xbf16>
    %c0_7 = arith.constant 0 : index
    %c0_8 = arith.constant 0 : index
    %11 = vector.load %arg4[%c0_7, %c0_8] : memref<128x128xbf16, #tpu.memory_space<vmem>>, vector<128x128xbf16>
    %cst_9 = arith.constant dense<0.000000e+00> : vector<128x128xf32>
    %12 = tpu.matmul %10, %11, %cst_9 {dimension_numbers = #tpu.dot_dimension_numbers<[1], [0], [0], [1], [0, 0, 1, 1], [], []>} : vector<128x128xbf16>, vector<128x128xbf16>, vector<128x128xf32> -> vector<128x128xf32>
    %c0_10 = arith.constant 0 : index
    %c0_11 = arith.constant 0 : index
    %13 = vector.load %arg5[%c0_10, %c0_11] : memref<1x128xf32, #tpu.memory_space<vmem>>, vector<1x128xf32>
    %14 = vector.broadcast %13 : vector<1x128xf32> to vector<128x128xf32>
    %15 = arith.addf %12, %14 : vector<128x128xf32>
    %cst_12 = arith.constant 0.000000e+00 : f32
    %16 = vector.broadcast %cst_12 : f32 to vector<128x128xf32>
    %17 = arith.maximumf %15, %16 : vector<128x128xf32>
    %18 = arith.truncf %17 : vector<128x128xf32> to vector<128x128xbf16>
    %c0_13 = arith.constant 0 : index
    %c0_14 = arith.constant 0 : index
    %19 = vector.load %arg6[%c0_13, %c0_14] : memref<128x256xbf16, #tpu.memory_space<vmem>>, vector<128x256xbf16>
    %cst_15 = arith.constant dense<0.000000e+00> : vector<128x256xf32>
    %20 = tpu.matmul %18, %19, %cst_15 {dimension_numbers = #tpu.dot_dimension_numbers<[1], [0], [0], [1], [0, 0, 1, 1], [], []>} : vector<128x128xbf16>, vector<128x256xbf16>, vector<128x256xf32> -> vector<128x256xf32>
    %c0_16 = arith.constant 0 : index
    %c0_17 = arith.constant 0 : index
    %21 = vector.load %arg7[%c0_16, %c0_17] : memref<1x256xf32, #tpu.memory_space<vmem>>, vector<1x256xf32>
    %22 = vector.broadcast %21 : vector<1x256xf32> to vector<128x256xf32>
    %23 = arith.addf %20, %22 : vector<128x256xf32>
    %cst_18 = arith.constant 0.000000e+00 : f32
    %24 = vector.broadcast %cst_18 : f32 to vector<128x256xf32>
    %25 = arith.maximumf %23, %24 : vector<128x256xf32>
    %26 = vector.shape_cast %25 : vector<128x256xf32> to vector<16x8x256xf32>
    %cst_19 = arith.constant dense<0xFF800000> : vector<16x256xf32>
    %27 = vector.multi_reduction <maximumf>, %26, %cst_19 [1] : vector<16x8x256xf32> to vector<16x256xf32>
    %28 = vector.shape_cast %27 : vector<16x256xf32> to vector<16x1x256xf32>
    %c0_20 = arith.constant 0 : index
    %c0_21 = arith.constant 0 : index
    %c0_22 = arith.constant 0 : index
    %29 = vector.load %arg8[%c0_20, %c0_21, %c0_22] : memref<16x1x256xf32, #tpu.memory_space<vmem>>, vector<16x1x256xf32>
    tpu.vector_store %arg8[%c0_20, %c0_21, %c0_22], %28 {strides = array<i32>} : memref<16x1x256xf32, #tpu.memory_space<vmem>>, vector<16x1x256xf32>,
    return
  }
  func.func @transform_0(%arg0: i32) -> (i32, i32) {
    %c0_i32 = arith.constant 0 : i32
    %c0_i32_0 = arith.constant 0 : i32
    return %arg0, %c0_i32 : i32, i32
  }
  func.func @transform_1(%arg0: i32) -> (i32, i32) {
    %c0_i32 = arith.constant 0 : i32
    %c0_i32_0 = arith.constant 0 : i32
    %c0_i32_1 = arith.constant 0 : i32
    return %c0_i32, %c0_i32_0 : i32, i32
  }
  func.func @transform_2(%arg0: i32) -> (i32, i32) {
    %c0_i32 = arith.constant 0 : i32
    %c0_i32_0 = arith.constant 0 : i32
    %c0_i32_1 = arith.constant 0 : i32
    return %c0_i32, %c0_i32_0 : i32, i32
  }
  func.func @transform_3(%arg0: i32) -> (i32, i32) {
    %c0_i32 = arith.constant 0 : i32
    %c0_i32_0 = arith.constant 0 : i32
    %c0_i32_1 = arith.constant 0 : i32
    return %c0_i32, %c0_i32_0 : i32, i32
  }
  func.func @transform_4(%arg0: i32) -> (i32, i32) {
    %c0_i32 = arith.constant 0 : i32
    %c0_i32_0 = arith.constant 0 : i32
    %c0_i32_1 = arith.constant 0 : i32
    return %c0_i32, %c0_i32_0 : i32, i32
  }
  func.func @transform_5(%arg0: i32) -> (i32, i32) {
    %c0_i32 = arith.constant 0 : i32
    %c0_i32_0 = arith.constant 0 : i32
    %c0_i32_1 = arith.constant 0 : i32
    return %c0_i32, %c0_i32_0 : i32, i32
  }
  func.func @transform_6(%arg0: i32) -> (i32, i32) {
    %c0_i32 = arith.constant 0 : i32
    %c0_i32_0 = arith.constant 0 : i32
    %c0_i32_1 = arith.constant 0 : i32
    return %c0_i32, %c0_i32_0 : i32, i32
  }
  func.func @transform_7(%arg0: i32) -> (i32, i32, i32) {
    %c0_i32 = arith.constant 0 : i32
    %c0_i32_0 = arith.constant 0 : i32
    %c0_i32_1 = arith.constant 0 : i32
    return %arg0, %c0_i32, %c0_i32_0 : i32, i32, i32
  }
}

module attributes {stable_mosaic.version = 11 : i64} {
  func.func @_sa_mlp_kernel(%arg0: i32, %arg1: memref<16x261xbf16, #tpu.memory_space<vmem>>, %arg2: memref<384x256xbf16, #tpu.memory_space<vmem>>, %arg3: memref<1x256xf32, #tpu.memory_space<vmem>>, %arg4: memref<256x512xbf16, #tpu.memory_space<vmem>>, %arg5: memref<1x512xf32, #tpu.memory_space<vmem>>, %arg6: memref<512x1024xbf16, #tpu.memory_space<vmem>>, %arg7: memref<1x1024xf32, #tpu.memory_space<vmem>>, %arg8: memref<2x1x1024xf32, #tpu.memory_space<vmem>>) attributes {dimension_semantics = [#tpu.dimension_semantics<parallel>], iteration_bounds = array<i64: 1>, scalar_prefetch = 0 : i64, scratch_operands = 0 : i64, tpu.core_type = #tpu.core_type<tc>, window_params = [{transform_indices = @transform_0, window_bounds = array<i64: 16, 261>}, {pipeline_mode = #tpu.pipeline_mode<synchronous>, transform_indices = @transform_1, window_bounds = array<i64: 384, 256>}, {pipeline_mode = #tpu.pipeline_mode<synchronous>, transform_indices = @transform_2, window_bounds = array<i64: 1, 256>}, {pipeline_mode = #tpu.pipeline_mode<synchronous>, transform_indices = @transform_3, window_bounds = array<i64: 256, 512>}, {pipeline_mode = #tpu.pipeline_mode<synchronous>, transform_indices = @transform_4, window_bounds = array<i64: 1, 512>}, {pipeline_mode = #tpu.pipeline_mode<synchronous>, transform_indices = @transform_5, window_bounds = array<i64: 512, 1024>}, {pipeline_mode = #tpu.pipeline_mode<synchronous>, transform_indices = @transform_6, window_bounds = array<i64: 1, 1024>}, {transform_indices = @transform_7, window_bounds = array<i64: 2, 1, 1024>}]} {
    %c0 = arith.constant 0 : index
    %c0_0 = arith.constant 0 : index
    %0 = vector.load %arg1[%c0, %c0_0] : memref<16x261xbf16, #tpu.memory_space<vmem>>, vector<16x261xbf16>
    %cst = arith.constant 0.000000e+00 : bf16
    %1 = vector.broadcast %cst : bf16 to vector<16x123xbf16>
    %2 = tpu.concatenate %0, %1 in 1 : vector<16x261xbf16>, vector<16x123xbf16> -> vector<16x384xbf16>
    %c0_1 = arith.constant 0 : index
    %c0_2 = arith.constant 0 : index
    %3 = vector.load %arg2[%c0_1, %c0_2] : memref<384x256xbf16, #tpu.memory_space<vmem>>, vector<384x256xbf16>
    %cst_3 = arith.constant dense<0.000000e+00> : vector<16x256xf32>
    %4 = tpu.matmul %2, %3, %cst_3 {dimension_numbers = #tpu.dot_dimension_numbers<[1], [0], [0], [1], [0, 0, 1, 1], [], []>} : vector<16x384xbf16>, vector<384x256xbf16>, vector<16x256xf32> -> vector<16x256xf32>
    %c0_4 = arith.constant 0 : index
    %c0_5 = arith.constant 0 : index
    %5 = vector.load %arg3[%c0_4, %c0_5] : memref<1x256xf32, #tpu.memory_space<vmem>>, vector<1x256xf32>
    %6 = vector.broadcast %5 : vector<1x256xf32> to vector<16x256xf32>
    %7 = arith.addf %4, %6 : vector<16x256xf32>
    %cst_6 = arith.constant 0.000000e+00 : f32
    %8 = vector.broadcast %cst_6 : f32 to vector<16x256xf32>
    %9 = arith.maximumf %7, %8 : vector<16x256xf32>
    %10 = arith.truncf %9 : vector<16x256xf32> to vector<16x256xbf16>
    %c0_7 = arith.constant 0 : index
    %c0_8 = arith.constant 0 : index
    %11 = vector.load %arg4[%c0_7, %c0_8] : memref<256x512xbf16, #tpu.memory_space<vmem>>, vector<256x512xbf16>
    %cst_9 = arith.constant dense<0.000000e+00> : vector<16x512xf32>
    %12 = tpu.matmul %10, %11, %cst_9 {dimension_numbers = #tpu.dot_dimension_numbers<[1], [0], [0], [1], [0, 0, 1, 1], [], []>} : vector<16x256xbf16>, vector<256x512xbf16>, vector<16x512xf32> -> vector<16x512xf32>
    %c0_10 = arith.constant 0 : index
    %c0_11 = arith.constant 0 : index
    %13 = vector.load %arg5[%c0_10, %c0_11] : memref<1x512xf32, #tpu.memory_space<vmem>>, vector<1x512xf32>
    %14 = vector.broadcast %13 : vector<1x512xf32> to vector<16x512xf32>
    %15 = arith.addf %12, %14 : vector<16x512xf32>
    %cst_12 = arith.constant 0.000000e+00 : f32
    %16 = vector.broadcast %cst_12 : f32 to vector<16x512xf32>
    %17 = arith.maximumf %15, %16 : vector<16x512xf32>
    %18 = arith.truncf %17 : vector<16x512xf32> to vector<16x512xbf16>
    %c0_13 = arith.constant 0 : index
    %c0_14 = arith.constant 0 : index
    %19 = vector.load %arg6[%c0_13, %c0_14] : memref<512x1024xbf16, #tpu.memory_space<vmem>>, vector<512x1024xbf16>
    %cst_15 = arith.constant dense<0.000000e+00> : vector<16x1024xf32>
    %20 = tpu.matmul %18, %19, %cst_15 {dimension_numbers = #tpu.dot_dimension_numbers<[1], [0], [0], [1], [0, 0, 1, 1], [], []>} : vector<16x512xbf16>, vector<512x1024xbf16>, vector<16x1024xf32> -> vector<16x1024xf32>
    %c0_16 = arith.constant 0 : index
    %c0_17 = arith.constant 0 : index
    %21 = vector.load %arg7[%c0_16, %c0_17] : memref<1x1024xf32, #tpu.memory_space<vmem>>, vector<1x1024xf32>
    %22 = vector.broadcast %21 : vector<1x1024xf32> to vector<16x1024xf32>
    %23 = arith.addf %20, %22 : vector<16x1024xf32>
    %cst_18 = arith.constant 0.000000e+00 : f32
    %24 = vector.broadcast %cst_18 : f32 to vector<16x1024xf32>
    %25 = arith.maximumf %23, %24 : vector<16x1024xf32>
    %26 = vector.shape_cast %25 : vector<16x1024xf32> to vector<2x8x1024xf32>
    %cst_19 = arith.constant dense<0xFF800000> : vector<2x1024xf32>
    %27 = vector.multi_reduction <maximumf>, %26, %cst_19 [1] : vector<2x8x1024xf32> to vector<2x1024xf32>
    %28 = vector.shape_cast %27 : vector<2x1024xf32> to vector<2x1x1024xf32>
    %c0_20 = arith.constant 0 : index
    %c0_21 = arith.constant 0 : index
    %c0_22 = arith.constant 0 : index
    %29 = vector.load %arg8[%c0_20, %c0_21, %c0_22] : memref<2x1x1024xf32, #tpu.memory_space<vmem>>, vector<2x1x1024xf32>
    tpu.vector_store %arg8[%c0_20, %c0_21, %c0_22], %28 {strides = array<i32>} : memref<2x1x1024xf32, #tpu.memory_space<vmem>>, vector<2x1x1024xf32>,
    return
  }
  func.func @transform_0(%arg0: i32) -> (i32, i32) {
    %c0_i32 = arith.constant 0 : i32
    %c0_i32_0 = arith.constant 0 : i32
    return %arg0, %c0_i32 : i32, i32
  }
  func.func @transform_1(%arg0: i32) -> (i32, i32) {
    %c0_i32 = arith.constant 0 : i32
    %c0_i32_0 = arith.constant 0 : i32
    %c0_i32_1 = arith.constant 0 : i32
    return %c0_i32, %c0_i32_0 : i32, i32
  }
  func.func @transform_2(%arg0: i32) -> (i32, i32) {
    %c0_i32 = arith.constant 0 : i32
    %c0_i32_0 = arith.constant 0 : i32
    %c0_i32_1 = arith.constant 0 : i32
    return %c0_i32, %c0_i32_0 : i32, i32
  }
  func.func @transform_3(%arg0: i32) -> (i32, i32) {
    %c0_i32 = arith.constant 0 : i32
    %c0_i32_0 = arith.constant 0 : i32
    %c0_i32_1 = arith.constant 0 : i32
    return %c0_i32, %c0_i32_0 : i32, i32
  }
  func.func @transform_4(%arg0: i32) -> (i32, i32) {
    %c0_i32 = arith.constant 0 : i32
    %c0_i32_0 = arith.constant 0 : i32
    %c0_i32_1 = arith.constant 0 : i32
    return %c0_i32, %c0_i32_0 : i32, i32
  }
  func.func @transform_5(%arg0: i32) -> (i32, i32) {
    %c0_i32 = arith.constant 0 : i32
    %c0_i32_0 = arith.constant 0 : i32
    %c0_i32_1 = arith.constant 0 : i32
    return %c0_i32, %c0_i32_0 : i32, i32
  }
  func.func @transform_6(%arg0: i32) -> (i32, i32) {
    %c0_i32 = arith.constant 0 : i32
    %c0_i32_0 = arith.constant 0 : i32
    %c0_i32_1 = arith.constant 0 : i32
    return %c0_i32, %c0_i32_0 : i32, i32
  }
  func.func @transform_7(%arg0: i32) -> (i32, i32, i32) {
    %c0_i32 = arith.constant 0 : i32
    %c0_i32_0 = arith.constant 0 : i32
    %c0_i32_1 = arith.constant 0 : i32
    return %arg0, %c0_i32, %c0_i32_0 : i32, i32, i32
  }
}

</mosaic_0001>

<bundles_post_ra>
// kernel: custom-call.14
= control target key start
LH: loop header
LB: loop body
LE: loop exit
PB: predicated region body
PF: predicated region fallthrough
CT: control target
= control target key end

     0   :  { %s6_s0 = inlined_call_operand.vmem [shape: f32[2,64], index: 0, kind: output, shape index: {}]  }

// kernel: custom-call.15
= control target key start
LH: loop header
LB: loop body
LE: loop exit
PB: predicated region body
PF: predicated region fallthrough
CT: control target
= control target key end

     0   :  { %s6_s0 = inlined_call_operand.vmem [shape: f32[2,16], index: 0, kind: output, shape index: {}]  }

// kernel: pointnet2_forward.3
= control target key start
LH: loop header
LB: loop body
LE: loop exit
PB: predicated region body
PF: predicated region fallthrough
CT: control target
= control target key end

     0   :  { %12 = vsyncpa [#allocation3], 0  ;;  %s2221_s0 = inlined_call_operand.hbm [shape: bf16[256,10], index: 0, kind: input, shape index: {}]   ;;  %s2222_s1 = inlined_call_operand.hbm [shape: bf16[128,64], index: 1, kind: input, shape index: {}]   ;;  %s2223_s2 = inlined_call_operand.hbm [shape: f32[1,64], index: 2, kind: input, shape index: {}]   ;;  %s2224_s3 = inlined_call_operand.hbm [shape: bf16[64,64], index: 3, kind: input, shape index: {}]   ;;  %s2225_s4 = inlined_call_operand.hbm [shape: f32[1,64], index: 4, kind: input, shape index: {}]   ;;  %s2226_s5 = inlined_call_operand.hbm [shape: bf16[64,128], index: 5, kind: input, shape index: {}]   ;;  %s2227_s6 = inlined_call_operand.hbm [shape: f32[1,128], index: 6, kind: input, shape index: {}]   ;;  %s2228_s7 = inlined_call_operand.hbm [shape: f32[32,1,128], index: 7, kind: output, shape index: {}]  }
   0x1   :  { %13 = vsyncpa [#allocation6], 0 }
   0x2   :  { %14 = vsyncpa [#allocation9], 0 }
   0x3   :  { %15 = vsyncpa [#allocation12], 0 }
   0x4   :  { %16 = vsyncpa [#allocation4], 0  ;;  %s1893_s24 = smov [#allocation5]   ;;  %s1894_s26 = smov [#allocation8]  }
   0x5   :  { %s34_s25 = sshll.u32 %s1893_s24, 4  ;;  %s56_s27 = sshll.u32 %s1894_s26, 4  ;;  %s35_s25 = int_to_ptr.vmem [resolvable:$true] %s34_s25  ;;  %s1945_s27 = int_to_ptr.vmem [resolvable:$true] %s56_s27 }
   0x6   :  { %s1707_s30 = scalar_lea.hbm %s2222_s1, 1024 }
   0x7   :  { %p1708_p0 = scmp.ne.s32.totalorder %s2222_s1, %s1707_s30  ;;  %p1711_p1 = scmp.lt.u32.totalorder %s1707_s30, %s2222_s1 }
   0x9   :  { %p1713_p2 = pnand %p1711_p1, %p1708_p0 }
   0xb   :  { %1716 = shalt.err (!%p1713_p2)
}
   0xc   :  { %s1717_s12 = scalar_lea.vmem %s35_s25, 1024  ;;  %p1722_p4 = scmp.lt.s32.totalorder %s35_s25, %s35_s25 }
   0xd   :  { %p1718_p3 = scmp.ne.s32.totalorder %s35_s25, %s1717_s12  ;;  %p1723_p5 = scmp.lt.s32.totalorder %s1717_s12, %s1717_s12 }
   0xf   :  { %p1724_p6 = por %p1723_p5, %p1722_p4 }
  0x11   :  { %p1725_p7 = pnand %p1724_p6, %p1718_p3 }
  0x13   :  { %1728 = shalt.err (!%p1725_p7)
}
  0x14   :  { %s1895_s13 = smov 64   ;;  %s1896_s14 = smov 4  }
  0x15   :  { %40 = dma.hbm_to_vmem [thread:$0]  %s2222_s1, 1024, %s35_s25, [#allocation6], %s1895_s13, %s1895_s13, %s1896_s14  }
  0x16   :  { %s1729_s19 = scalar_lea.hbm %s2224_s3, 512 }
  0x17   :  { %p1730_p8 = scmp.ne.s32.totalorder %s2224_s3, %s1729_s19  ;;  %p1733_p9 = scmp.lt.u32.totalorder %s1729_s19, %s2224_s3 }
  0x19   :  { %p1735_p10 = pnand %p1733_p9, %p1730_p8 }
  0x1b   :  { %1738 = shalt.err (!%p1735_p10)
}
  0x1c   :  { %s1739_s24 = scalar_lea.vmem %s1945_s27, 512  ;;  %p1744_p12 = scmp.lt.s32.totalorder %s1945_s27, %s1945_s27 }
  0x1d   :  { %p1740_p11 = scmp.ne.s32.totalorder %s1945_s27, %s1739_s24  ;;  %p1745_p13 = scmp.lt.s32.totalorder %s1739_s24, %s1739_s24 }
  0x1f   :  { %p1746_p0 = por %p1745_p13, %p1744_p12 }
  0x21   :  { %p1747_p1 = pnand %p1746_p0, %p1740_p11 }
  0x23   :  { %1750 = shalt.err (!%p1747_p1)
}
  0x24   :  { %62 = dma.hbm_to_vmem [thread:$0]  %s2224_s3, 512, %s1945_s27, [#allocation9], %s1895_s13, %s1895_s13, %s1896_s14  }
  0x25   :  { %s1897_s26 = smov [#allocation11]   ;;  %s1898_s29 = smov [#allocation2]  }
  0x26   :  { %s78_s28 = sshll.u32 %s1897_s26, 4  ;;  %s22_s30 = sshll.u32 %s1898_s29, 4  ;;  %s79_s28 = int_to_ptr.vmem [resolvable:$true] %s78_s28  ;;  %s1982_s30 = int_to_ptr.vmem [resolvable:$true] %s22_s30 }
  0x27   :  { %s1751_s10 = scalar_lea.hbm %s2226_s5, 512 }
  0x28   :  { %p1752_p2 = scmp.ne.s32.totalorder %s2226_s5, %s1751_s10  ;;  %p1755_p3 = scmp.lt.u32.totalorder %s1751_s10, %s2226_s5 }
  0x2a   :  { %p1757_p4 = pnand %p1755_p3, %p1752_p2 }
  0x2c   :  { %1760 = shalt.err (!%p1757_p4)
}
  0x2d   :  { %s1761_s3 = scalar_lea.vmem %s79_s28, 512  ;;  %p1766_p6 = scmp.lt.s32.totalorder %s79_s28, %s79_s28 }
  0x2e   :  { %p1762_p5 = scmp.ne.s32.totalorder %s79_s28, %s1761_s3  ;;  %p1767_p7 = scmp.lt.s32.totalorder %s1761_s3, %s1761_s3 }
  0x30   :  { %p1768_p8 = por %p1767_p7, %p1766_p6 }
  0x32   :  { %p1769_p9 = pnand %p1768_p8, %p1762_p5 }
  0x34   :  { %1772 = shalt.err (!%p1769_p9)
}
  0x35   :  { %84 = dma.hbm_to_vmem [thread:$0]  %s2226_s5, 512, %s79_s28, [#allocation12], %s1895_s13, %s1895_s13, %s1896_s14  }
  0x36   :  { %s1773_s20 = scalar_lea.hbm %s2221_s0, 2048 }
  0x37   :  { %p1774_p10 = scmp.ne.s32.totalorder %s2221_s0, %s1773_s20  ;;  %p1777_p11 = scmp.lt.u32.totalorder %s1773_s20, %s2221_s0 }
  0x39   :  { %p1779_p12 = pnand %p1777_p11, %p1774_p10 }
  0x3b   :  { %1782 = shalt.err (!%p1779_p12)
}
  0x3c   :  { %s1783_s1 = scalar_lea.vmem %s1982_s30, 2048  ;;  %p1788_p0 = scmp.lt.s32.totalorder %s1982_s30, %s1982_s30 }
  0x3d   :  { %p1784_p13 = scmp.ne.s32.totalorder %s1982_s30, %s1783_s1  ;;  %p1789_p1 = scmp.lt.s32.totalorder %s1783_s1, %s1783_s1 }
  0x3f   :  { %p1790_p2 = por %p1789_p1, %p1788_p0 }
  0x41   :  { %p1791_p3 = pnand %p1790_p2, %p1784_p13 }
  0x43   :  { %1794 = shalt.err (!%p1791_p3)
}
  0x44   :  { %28 = dma.hbm_to_vmem [thread:$0]  %s2221_s0, 2048, %s1982_s30, [#allocation3], %s1895_s13, %s1895_s13, %s1896_s14  }
  0x45   :  { %s1899_s26 = smov [#allocation7]   ;;  %s1900_s29 = smov [#allocation10]  }
  0x46   :  { %s47_s28 = sshll.u32 %s1899_s26, 4  ;;  %s69_s8 = sshll.u32 %s1900_s29, 4  ;;  %s48_s28 = int_to_ptr.vmem [resolvable:$true] %s47_s28  ;;  %s70_s8 = int_to_ptr.vmem [resolvable:$true] %s69_s8 }
  0x47   :  { %s1795_s11 = scalar_lea.hbm %s2223_s2, 16 }
  0x48   :  { %p1796_p4 = scmp.ne.s32.totalorder %s2223_s2, %s1795_s11  ;;  %p1799_p5 = scmp.lt.u32.totalorder %s1795_s11, %s2223_s2 }
  0x4a   :  { %p1801_p6 = pnand %p1799_p5, %p1796_p4 }
  0x4c   :  { %1804 = shalt.err (!%p1801_p6)
}
  0x4d   :  { %s1805_s0 = scalar_lea.vmem %s48_s28, 16  ;;  %s1809_s13 = scalar_lea.vmem %s48_s28, 32 }
  0x4e   :  { %p1806_p7 = scmp.ne.s32.totalorder %s48_s28, %s1805_s0  ;;  %p1810_p8 = scmp.lt.s32.totalorder %s48_s28, %s48_s28 }
  0x4f   :  { %p1811_p9 = scmp.lt.s32.totalorder %s1809_s13, %s1805_s0 }
  0x51   :  { %p1812_p10 = por %p1811_p9, %p1810_p8 }
  0x53   :  { %p1813_p11 = pnand %p1812_p10, %p1806_p7 }
  0x55   :  { %1816 = shalt.err (!%p1813_p11)
}
  0x56   :  { %50 = dma.hbm_to_vmem [thread:$0]  %s2223_s2, 16, %s48_s28, [#allocation6]  }
  0x57   :  { %s1817_s18 = scalar_lea.hbm %s2225_s4, 16 }
  0x58   :  { %p1818_p12 = scmp.ne.s32.totalorder %s2225_s4, %s1817_s18  ;;  %p1821_p13 = scmp.lt.u32.totalorder %s1817_s18, %s2225_s4 }
  0x5a   :  { %p1823_p0 = pnand %p1821_p13, %p1818_p12 }
  0x5c   :  { %1826 = shalt.err (!%p1823_p0)
}
  0x5d   :  { %s1827_s23 = scalar_lea.vmem %s70_s8, 16  ;;  %s1831_s24 = scalar_lea.vmem %s70_s8, 32 }
  0x5e   :  { %p1828_p1 = scmp.ne.s32.totalorder %s70_s8, %s1827_s23  ;;  %p1832_p2 = scmp.lt.s32.totalorder %s70_s8, %s70_s8 }
  0x5f   :  { %p1833_p3 = scmp.lt.s32.totalorder %s1831_s24, %s1827_s23 }
  0x61   :  { %p1834_p4 = por %p1833_p3, %p1832_p2 }
  0x63   :  { %p1835_p5 = pnand %p1834_p4, %p1828_p1 }
  0x65   :  { %1838 = shalt.err (!%p1835_p5)
}
  0x66   :  { %72 = dma.hbm_to_vmem [thread:$0]  %s2225_s4, 16, %s70_s8, [#allocation9]  }
  0x67   :  { %s1901_s5 = smov [#allocation13]   ;;  %s1839_s29 = scalar_lea.hbm %s2227_s6, 16 }
  0x68   :  { %s91_s25 = sshll.u32 %s1901_s5, 4  ;;  %p1840_p6 = scmp.ne.s32.totalorder %s2227_s6, %s1839_s29  ;;  %s92_s25 = int_to_ptr.vmem [resolvable:$true] %s91_s25 }
  0x69   :  { %p1843_p7 = scmp.lt.u32.totalorder %s1839_s29, %s2227_s6 }
  0x6b   :  { %p1845_p8 = pnand %p1843_p7, %p1840_p6 }
  0x6d   :  { %1848 = shalt.err (!%p1845_p8)
}
  0x6e   :  { %s1849_s15 = scalar_lea.vmem %s92_s25, 16  ;;  %s1853_s4 = scalar_lea.vmem %s92_s25, 32 }
  0x6f   :  { %p1850_p9 = scmp.ne.s32.totalorder %s92_s25, %s1849_s15  ;;  %p1854_p10 = scmp.lt.s32.totalorder %s92_s25, %s92_s25 }
  0x70   :  { %p1855_p11 = scmp.lt.s32.totalorder %s1853_s4, %s1849_s15 }
  0x72   :  { %p1856_p12 = por %p1855_p11, %p1854_p10 }
  0x74   :  { %p1857_p13 = pnand %p1856_p12, %p1850_p9 }
  0x76   :  { %1860 = shalt.err (!%p1857_p13)
}
  0x77   :  { %94 = dma.hbm_to_vmem [thread:$0]  %s2227_s6, 16, %s92_s25, [#allocation12]  }
  0x78   :  { %1883 = dma.done.wait [#allocation3], 2048  }
  0x79   :  { %1884 = vsyncadd [#allocation3], 4294965248 }
  0x7a   :  { %1885 = dma.done.wait [#allocation6], 1040  }
  0x7b   :  { %1886 = vsyncadd [#allocation6], 4294966256 }
  0x7c   :  { %1887 = dma.done.wait [#allocation9], 528  }
  0x7d   :  { %1888 = vsyncadd [#allocation9], 4294966768 }
  0x7e   :  { %1889 = dma.done.wait [#allocation12], 528  }
  0x7f   :  { %1890 = vsyncadd [#allocation12], 4294966768  ;;  %v1675_v0 = vld [vmem:[#allocation5] sm:$0xff]   ;;  %v1676_v1 = vld [vmem:[#allocation5 + $0x8] sm:$0xff]   ;;  %vm229_vm0 = vcmask 80896   ;;  %vm598_vm1 = vcmask 523264  }
  0x80   :  { %1527 = vmatprep.subr.bf16.mxu0 %v1675_v0  ;;  %v1677_v2 = vld [vmem:[#allocation5 + $0x10] sm:$0xff]   ;;  %v1678_v3 = vld [vmem:[#allocation5 + $0x18] sm:$0xff]   ;;  %v1683_v4 = vld [vmem:[#allocation2] sm:$0xff]   ;;  %s1902_s6 = smov [#allocation14]  }
  0x81   :  { %1528 = vmatpush3.bf16.msra.mxu0 %v1675_v0  ;;  %1543 = vmatprep.mubr.msk.bf16.mxu0 %vm229_vm0, %v1683_v4  ;;  %v1679_v5 = vld [vmem:[#allocation5 + $0x20] sm:$0xff]   ;;  %v1680_v6 = vld [vmem:[#allocation5 + $0x28] sm:$0xff]   ;;  %v1681_v7 = vld [vmem:[#allocation5 + $0x30] sm:$0xff]   ;;  %s1365_s3 = sshll.u32 %s1902_s6, 4  ;;  %s1366_s3 = int_to_ptr.vmem [resolvable:$true] %s1365_s3 }
  0x82   :  { %1529 = vmatprep.subr.bf16.mxu0 %v1676_v1  ;;  %v1682_v8 = vld [vmem:[#allocation5 + $0x38] sm:$0xff]   ;;  %v1699_v9 = vld [vmem:[#allocation8] sm:$0xff]   ;;  %v1700_v10 = vld [vmem:[#allocation8 + $0x8] sm:$0xff]   ;;  %s1861_s0 = scalar_lea.vmem %s1366_s3, 512  ;;  %p1866_p1 = scmp.lt.s32.totalorder %s1366_s3, %s1366_s3 }
  0x83   :  { %1655 = vmatprep.subr.bf16.mxu1 %v1699_v9  ;;  %v1684_v11 = vld [vmem:[#allocation2 + $0x8] sm:$0xff]   ;;  %v1701_v12 = vld [vmem:[#allocation8 + $0x10] sm:$0xff]   ;;  %v1702_v14 = vld [vmem:[#allocation8 + $0x18] sm:$0xff]   ;;  %p1862_p0 = scmp.ne.s32.totalorder %s1366_s3, %s1861_s0  ;;  %p1867_p2 = scmp.lt.s32.totalorder %s1861_s0, %s1861_s0 }
  0x84   :  { %1659 = vmatpush3.bf16.msra.mxu1 %v1699_v9  ;;  %v1685_v13 = vld [vmem:[#allocation2 + $0x10] sm:$0xff]   ;;  %v1686_v15 = vld [vmem:[#allocation2 + $0x18] sm:$0xff]   ;;  %v1687_v16 = vld [vmem:[#allocation2 + $0x20] sm:$0xff]  }
  0x85   :  { %1530 = vmatpush3.bf16.msra.mxu0 %v1676_v1  ;;  %1656 = vmatprep.subr.bf16.mxu1 %v1700_v10  ;;  %v1688_v17 = vld [vmem:[#allocation2 + $0x28] sm:$0xff]   ;;  %v1689_v18 = vld [vmem:[#allocation2 + $0x30] sm:$0xff]   ;;  %v1690_v19 = vld [vmem:[#allocation2 + $0x38] sm:$0xff]   ;;  %p1868_p3 = por %p1867_p2, %p1866_p1 }
  0x86   :  { %1531 = vmatprep.subr.bf16.mxu0 %v1677_v2  ;;  %v1691_v20 = vld [vmem:[#allocation2 + $0x40] sm:$0xff]   ;;  %v1692_v21 = vld [vmem:[#allocation2 + $0x48] sm:$0xff]   ;;  %v1693_v22 = vld [vmem:[#allocation2 + $0x50] sm:$0xff]  }
  0x87   :  { %v1694_v23 = vld [vmem:[#allocation2 + $0x58] sm:$0xff]   ;;  %v1695_v24 = vld [vmem:[#allocation2 + $0x60] sm:$0xff]   ;;  %v1696_v25 = vld [vmem:[#allocation2 + $0x68] sm:$0xff]   ;;  %p1869_p4 = pnand %p1868_p3, %p1862_p0 }
  0x88   :  { %1660 = vmatpush3.bf16.msra.mxu1 %v1700_v10  ;;  %v1697_v26 = vld [vmem:[#allocation2 + $0x70] sm:$0xff]   ;;  %v1698_v27 = vld [vmem:[#allocation2 + $0x78] sm:$0xff]   ;;  %v2071_v28 = vld [vmem:[#allocation11] sm:$0xff]  }
  0x89   :  { %1532 = vmatpush3.bf16.msra.mxu0 %v1677_v2  ;;  %1657 = vmatprep.subr.bf16.mxu1 %v1701_v12  ;;  %v2074_v29 = vld [vmem:[#allocation7] ss:$0 sm:$0xff] }
  0x8a   :  { %1533 = vmatprep.subr.bf16.mxu0 %v1678_v3 }
  0x8c   :  { %1661 = vmatpush3.bf16.msra.mxu1 %v1701_v12 }
  0x8d   :  { %1534 = vmatpush3.bf16.msra.mxu0 %v1678_v3  ;;  %1658 = vmatprep.subr.bf16.mxu1 %v1702_v14 }
  0x8e   :  { %1535 = vmatprep.subr.bf16.mxu0 %v1679_v5 }
  0x90   :  { %1662 = vmatpush3.bf16.msra.mxu1 %v1702_v14 }
  0x91   :  { %1536 = vmatpush3.bf16.msra.mxu0 %v1679_v5  ;;  %1615 = vmatprep.subr.bf16.mxu1 %v2071_v28 }
  0x92   :  { %1537 = vmatprep.subr.bf16.mxu0 %v1680_v6 }
  0x95   :  { %1538 = vmatpush3.bf16.msra.mxu0 %v1680_v6 }
  0x96   :  { %1539 = vmatprep.subr.bf16.mxu0 %v1681_v7 }
  0x99   :  { %1540 = vmatpush3.bf16.msra.mxu0 %v1681_v7 }
  0x9a   :  { %1541 = vmatprep.subr.bf16.mxu0 %v1682_v8 }
  0x9d   :  { %1542 = vmatpush3.bf16.msra.mxu0 %v1682_v8 }
  0x9e   :  { %1575 = vmatprep.subr.bf16.mxu0 %v1699_v9 }
  0xa0   :  { %1544 = vmatmul.mubr.msk.bf16.vlgmr.msra.gmra.mrb[0].mxu0 %vm229_vm0, %v1684_v11 }
  0xa1   :  { %1547 = vmatprep.mubr.msk.bf16.mxu0 %vm229_vm0, %v1685_v13  ;;  %1576 = vmatpush3.bf16.msra.mxu0 %v1699_v9 }
  0xa2   :  { %1577 = vmatprep.subr.bf16.mxu0 %v1700_v10 }
  0xa5   :  { %1578 = vmatpush3.bf16.msra.mxu0 %v1700_v10 }
  0xa6   :  { %1579 = vmatprep.subr.bf16.mxu0 %v1701_v12 }
  0xa8   :  { %1548 = vmatmul.mubr.msk.bf16.gmra.mrb[4].mxu0 %vm229_vm0, %v1686_v15 }
  0xa9   :  { %1551 = vmatprep.mubr.msk.bf16.mxu0 %vm229_vm0, %v1687_v16  ;;  %1580 = vmatpush3.bf16.msra.mxu0 %v1701_v12 }
  0xaa   :  { %1581 = vmatprep.subr.bf16.mxu0 %v1702_v14 }
  0xad   :  { %1582 = vmatpush3.bf16.msra.mxu0 %v1702_v14 }
  0xb0   :  { %1552 = vmatmul.mubr.msk.bf16.gmra.mrb[8].mxu0 %vm229_vm0, %v1688_v17 }
  0xb1   :  { %1555 = vmatprep.mubr.msk.bf16.mxu0 %vm229_vm0, %v1689_v18 }
  0xb8   :  { %1556 = vmatmul.mubr.msk.bf16.gmra.mrb[12].mxu0 %vm229_vm0, %v1690_v19 }
  0xb9   :  { %1559 = vmatprep.mubr.msk.bf16.mxu0 %vm229_vm0, %v1691_v20 }
  0xc0   :  { %1560 = vmatmul.mubr.msk.bf16.gmra.mrb[16].mxu0 %vm229_vm0, %v1692_v21 }
  0xc1   :  { %1563 = vmatprep.mubr.msk.bf16.mxu0 %vm229_vm0, %v1693_v22 }
  0xc8   :  { %1564 = vmatmul.mubr.msk.bf16.gmra.mrb[20].mxu0 %vm229_vm0, %v1694_v23 }
  0xc9   :  { %1567 = vmatprep.mubr.msk.bf16.mxu0 %vm229_vm0, %v1695_v24 }
  0xd0   :  { %1568 = vmatmul.mubr.msk.bf16.gmra.mrb[24].mxu0 %vm229_vm0, %v1696_v25  ;;  %v1704_v25 = vld [vmem:[#allocation11 + $0x8] sm:$0xff]  }
  0xd1   :  { %1571 = vmatprep.mubr.msk.bf16.mxu0 %vm229_vm0, %v1697_v26 }
  0xd8   :  { %1572 = vmatmul.mubr.msk.bf16.gmra.mrb[28].mxu0 %vm229_vm0, %v1698_v27 }
 0x173   :  { %v1545_v30 = vpop.f32.mrb[0].mxu0 }
 0x174   :  { %v393_v31 = vadd.f32 %v1545_v30, %v2074_v29  ;;  %v384_v32 = vpop.f32.mrb[1].mxu0 }
 0x175   :  { %v385_v33 = vadd.f32 %v2074_v29, %v384_v32  ;;  %v1546_v34 = vpop.f32.mrb[2].mxu0 }
 0x176   :  { %v396_v35 = vadd.f32 %v1546_v34, %v2074_v29  ;;  %v387_v36 = vpop.f32.mrb[3].mxu0  ;;  %v513_v38 = vmax.f32 %v393_v31, 0.0 }
 0x177   :  { %v388_v37 = vadd.f32 %v2074_v29, %v387_v36  ;;  %v511_v40 = vmax.f32 %v385_v33, 0.0 }
 0x178   :  { %v514_v39 = vmax.f32 %v396_v35, 0.0  ;;  %v1705_v35 = vld [vmem:[#allocation11 + $0x10] sm:$0xff]  }
 0x179   :  { %v512_v41 = vmax.f32 %v388_v37, 0.0 }
 0x17a   :  { %v544_v42 = vpack.c.bf16 %v514_v39, %v513_v38 }
 0x17b   :  { %v543_v43 = vpack.c.bf16 %v512_v41, %v511_v40  ;;  %v1549_v44 = vpop.f32.mrb[4].mxu0 }
 0x17c   :  { %v409_v45 = vadd.f32 %v1549_v44, %v2074_v29  ;;  %v400_v46 = vpop.f32.mrb[5].mxu0 }
 0x17d   :  { %v401_v47 = vadd.f32 %v2074_v29, %v400_v46  ;;  %v1550_v48 = vpop.f32.mrb[6].mxu0  ;;  %1583 = vmatprep.mubr.msk.bf16.mxu0 %vm598_vm1, %v543_v43 }
 0x17e   :  { %v412_v49 = vadd.f32 %v1550_v48, %v2074_v29  ;;  %v403_v50 = vpop.f32.mrb[7].mxu0  ;;  %1584 = vmatmul.mubr.msk.bf16.vlgmr.msra.gmra.mrb[32].mxu0 %vm598_vm1, %v544_v42  ;;  %v517_v52 = vmax.f32 %v409_v45, 0.0 }
 0x17f   :  { %v404_v51 = vadd.f32 %v2074_v29, %v403_v50  ;;  %v515_v54 = vmax.f32 %v401_v47, 0.0 }
 0x180   :  { %v518_v53 = vmax.f32 %v412_v49, 0.0 }
 0x181   :  { %v516_v55 = vmax.f32 %v404_v51, 0.0 }
 0x182   :  { %v546_v56 = vpack.c.bf16 %v518_v53, %v517_v52 }
 0x183   :  { %v545_v57 = vpack.c.bf16 %v516_v55, %v515_v54  ;;  %v1553_v58 = vpop.f32.mrb[8].mxu0 }
 0x184   :  { %v425_v59 = vadd.f32 %v1553_v58, %v2074_v29  ;;  %v416_v60 = vpop.f32.mrb[9].mxu0 }
 0x185   :  { %v417_v61 = vadd.f32 %v2074_v29, %v416_v60  ;;  %v1554_v62 = vpop.f32.mrb[10].mxu0  ;;  %1587 = vmatprep.mubr.msk.bf16.mxu0 %vm598_vm1, %v545_v57 }
 0x186   :  { %v428_v63 = vadd.f32 %v1554_v62, %v2074_v29  ;;  %v419_v0 = vpop.f32.mrb[11].mxu0  ;;  %1588 = vmatmul.mubr.msk.bf16.gmra.mrb[36].mxu0 %vm598_vm1, %v546_v56  ;;  %v521_v2 = vmax.f32 %v425_v59, 0.0 }
 0x187   :  { %v420_v1 = vadd.f32 %v2074_v29, %v419_v0  ;;  %v519_v4 = vmax.f32 %v417_v61, 0.0 }
 0x188   :  { %v522_v3 = vmax.f32 %v428_v63, 0.0 }
 0x189   :  { %v520_v5 = vmax.f32 %v420_v1, 0.0 }
 0x18a   :  { %v548_v6 = vpack.c.bf16 %v522_v3, %v521_v2 }
 0x18b   :  { %v547_v7 = vpack.c.bf16 %v520_v5, %v519_v4  ;;  %v1557_v8 = vpop.f32.mrb[12].mxu0 }
 0x18c   :  { %v441_v9 = vadd.f32 %v1557_v8, %v2074_v29  ;;  %v432_v10 = vpop.f32.mrb[13].mxu0 }
 0x18d   :  { %v433_v11 = vadd.f32 %v2074_v29, %v432_v10  ;;  %v1558_v12 = vpop.f32.mrb[14].mxu0  ;;  %1591 = vmatprep.mubr.msk.bf16.mxu0 %vm598_vm1, %v547_v7 }
 0x18e   :  { %v444_v13 = vadd.f32 %v1558_v12, %v2074_v29  ;;  %v435_v14 = vpop.f32.mrb[15].mxu0  ;;  %1592 = vmatmul.mubr.msk.bf16.gmra.mrb[40].mxu0 %vm598_vm1, %v548_v6  ;;  %v525_v16 = vmax.f32 %v441_v9, 0.0 }
 0x18f   :  { %v436_v15 = vadd.f32 %v2074_v29, %v435_v14  ;;  %v523_v18 = vmax.f32 %v433_v11, 0.0 }
 0x190   :  { %v526_v17 = vmax.f32 %v444_v13, 0.0 }
 0x191   :  { %v524_v19 = vmax.f32 %v436_v15, 0.0 }
 0x192   :  { %v550_v20 = vpack.c.bf16 %v526_v17, %v525_v16  ;;  %v1706_v17 = vld [vmem:[#allocation11 + $0x18] sm:$0xff]  }
 0x193   :  { %v1561_v21 = vpop.f32.mrb[16].mxu0  ;;  %v549_v22 = vpack.c.bf16 %v524_v19, %v523_v18  ;;  %v2125_v18 = vld [vmem:[#allocation10] ss:$0 sm:$0xff] }
 0x194   :  { %v457_v23 = vadd.f32 %v1561_v21, %v2074_v29  ;;  %v448_v24 = vpop.f32.mrb[17].mxu0 }
 0x195   :  { %v449_v26 = vadd.f32 %v2074_v29, %v448_v24  ;;  %v1562_v27 = vpop.f32.mrb[18].mxu0  ;;  %1595 = vmatprep.mubr.msk.bf16.mxu1 %vm598_vm1, %v549_v22 }
 0x196   :  { %v460_v30 = vadd.f32 %v1562_v27, %v2074_v29  ;;  %v451_v31 = vpop.f32.mrb[19].mxu0  ;;  %1596 = vmatmul.mubr.msk.bf16.vlgmr.msra.gmra.mrb[0].mxu1 %vm598_vm1, %v550_v20  ;;  %v529_v33 = vmax.f32 %v457_v23, 0.0 }
 0x197   :  { %v452_v32 = vadd.f32 %v2074_v29, %v451_v31  ;;  %1616 = vmatpush3.bf16.msra.mxu1 %v2071_v28  ;;  %v527_v36 = vmax.f32 %v449_v26, 0.0 }
 0x198   :  { %v530_v34 = vmax.f32 %v460_v30, 0.0  ;;  %1617 = vmatprep.subr.bf16.mxu1 %v1704_v25 }
 0x199   :  { %v528_v37 = vmax.f32 %v452_v32, 0.0 }
 0x19a   :  { %v552_v38 = vpack.c.bf16 %v530_v34, %v529_v33 }
 0x19b   :  { %v551_v39 = vpack.c.bf16 %v528_v37, %v527_v36  ;;  %v1565_v40 = vpop.f32.mrb[20].mxu0  ;;  %1618 = vmatpush3.bf16.msra.mxu1 %v1704_v25 }
 0x19c   :  { %v473_v41 = vadd.f32 %v1565_v40, %v2074_v29  ;;  %v464_v42 = vpop.f32.mrb[21].mxu0  ;;  %1619 = vmatprep.subr.bf16.mxu1 %v1705_v35 }
 0x19d   :  { %v465_v43 = vadd.f32 %v2074_v29, %v464_v42  ;;  %v1566_v44 = vpop.f32.mrb[22].mxu0  ;;  %1599 = vmatprep.mubr.msk.bf16.mxu1 %vm598_vm1, %v551_v39 }
 0x19e   :  { %v476_v28 = vadd.f32 %v1566_v44, %v2074_v29  ;;  %v467_v45 = vpop.f32.mrb[23].mxu0  ;;  %1600 = vmatmul.mubr.msk.bf16.gmra.mrb[4].mxu1 %vm598_vm1, %v552_v38  ;;  %v533_v47 = vmax.f32 %v473_v41, 0.0 }
 0x19f   :  { %v468_v46 = vadd.f32 %v2074_v29, %v467_v45  ;;  %1620 = vmatpush3.bf16.msra.mxu1 %v1705_v35  ;;  %v531_v49 = vmax.f32 %v465_v43, 0.0 }
 0x1a0   :  { %v534_v48 = vmax.f32 %v476_v28, 0.0  ;;  %1621 = vmatprep.subr.bf16.mxu1 %v1706_v17 }
 0x1a1   :  { %v532_v50 = vmax.f32 %v468_v46, 0.0 }
 0x1a2   :  { %v554_v51 = vpack.c.bf16 %v534_v48, %v533_v47 }
 0x1a3   :  { %v553_v52 = vpack.c.bf16 %v532_v50, %v531_v49  ;;  %v1569_v53 = vpop.f32.mrb[24].mxu0  ;;  %1622 = vmatpush3.bf16.msra.mxu1 %v1706_v17 }
 0x1a4   :  { %v489_v54 = vadd.f32 %v1569_v53, %v2074_v29  ;;  %v480_v55 = vpop.f32.mrb[25].mxu0 }
 0x1a5   :  { %v481_v56 = vadd.f32 %v2074_v29, %v480_v55  ;;  %v1570_v57 = vpop.f32.mrb[26].mxu0  ;;  %1603 = vmatprep.mubr.msk.bf16.mxu1 %vm598_vm1, %v553_v52 }
 0x1a6   :  { %v492_v58 = vadd.f32 %v1570_v57, %v2074_v29  ;;  %v483_v59 = vpop.f32.mrb[27].mxu0  ;;  %1604 = vmatmul.mubr.msk.bf16.gmra.mrb[8].mxu1 %vm598_vm1, %v554_v51  ;;  %v537_v61 = vmax.f32 %v489_v54, 0.0 }
 0x1a7   :  { %v484_v60 = vadd.f32 %v2074_v29, %v483_v59  ;;  %v535_v63 = vmax.f32 %v481_v56, 0.0 }
 0x1a8   :  { %v538_v62 = vmax.f32 %v492_v58, 0.0 }
 0x1a9   :  { %v536_v0 = vmax.f32 %v484_v60, 0.0 }
 0x1aa   :  { %v556_v1 = vpack.c.bf16 %v538_v62, %v537_v61 }
 0x1ab   :  { %v555_v2 = vpack.c.bf16 %v536_v0, %v535_v63  ;;  %v1573_v3 = vpop.f32.mrb[28].mxu0 }
 0x1ac   :  { %v505_v4 = vadd.f32 %v1573_v3, %v2074_v29  ;;  %v496_v5 = vpop.f32.mrb[29].mxu0 }
 0x1ad   :  { %v497_v6 = vadd.f32 %v2074_v29, %v496_v5  ;;  %v1574_v7 = vpop.f32.mrb[30].mxu0  ;;  %1607 = vmatprep.mubr.msk.bf16.mxu1 %vm598_vm1, %v555_v2 }
 0x1ae   :  { %v508_v8 = vadd.f32 %v1574_v7, %v2074_v29  ;;  %v499_v9 = vpop.f32.mrb[31].mxu0  ;;  %1608 = vmatmul.mubr.msk.bf16.gmra.mrb[12].mxu1 %vm598_vm1, %v556_v1  ;;  %v541_v11 = vmax.f32 %v505_v4, 0.0 }
 0x1af   :  { %v500_v10 = vadd.f32 %v2074_v29, %v499_v9  ;;  %v539_v13 = vmax.f32 %v497_v6, 0.0 }
 0x1b0   :  { %v542_v12 = vmax.f32 %v508_v8, 0.0 }
 0x1b1   :  { %v540_v14 = vmax.f32 %v500_v10, 0.0 }
 0x1b2   :  { %v558_v15 = vpack.c.bf16 %v542_v12, %v541_v11 }
 0x1b3   :  { %v557_v16 = vpack.c.bf16 %v540_v14, %v539_v13 }
 0x1b5   :  { %1611 = vmatprep.mubr.msk.bf16.mxu1 %vm598_vm1, %v557_v16 }
 0x1b6   :  { %1612 = vmatmul.mubr.msk.bf16.gmra.mrb[16].mxu1 %vm598_vm1, %v558_v15 }
 0x251   :  { %v1585_v19 = vpop.f32.mrb[32].mxu0 }
 0x252   :  { %v690_v20 = vadd.f32 %v1585_v19, %v2125_v18  ;;  %v681_v21 = vpop.f32.mrb[33].mxu0 }
 0x253   :  { %v682_v29 = vadd.f32 %v2125_v18, %v681_v21  ;;  %v1586_v22 = vpop.f32.mrb[34].mxu0 }
 0x254   :  { %v693_v23 = vadd.f32 %v1586_v22, %v2125_v18  ;;  %v684_v24 = vpop.f32.mrb[35].mxu0  ;;  %v810_v26 = vmax.f32 %v690_v20, 0.0 }
 0x255   :  { %v685_v25 = vadd.f32 %v2125_v18, %v684_v24  ;;  %v808_v30 = vmax.f32 %v682_v29, 0.0 }
 0x256   :  { %v811_v27 = vmax.f32 %v693_v23, 0.0 }
 0x257   :  { %v809_v31 = vmax.f32 %v685_v25, 0.0 }
 0x258   :  { %v841_v32 = vpack.c.bf16 %v811_v27, %v810_v26 }
 0x259   :  { %v840_v33 = vpack.c.bf16 %v809_v31, %v808_v30  ;;  %v1589_v34 = vpop.f32.mrb[36].mxu0 }
 0x25a   :  { %v706_v35 = vadd.f32 %v1589_v34, %v2125_v18  ;;  %v697_v36 = vpop.f32.mrb[37].mxu0 }
 0x25b   :  { %v698_v37 = vadd.f32 %v2125_v18, %v697_v36  ;;  %v1590_v38 = vpop.f32.mrb[38].mxu0  ;;  %1623 = vmatprep.mubr.msk.bf16.mxu1 %vm598_vm1, %v840_v33 }
 0x25c   :  { %v709_v39 = vadd.f32 %v1590_v38, %v2125_v18  ;;  %v700_v40 = vpop.f32.mrb[39].mxu0  ;;  %1624 = vmatmul.mubr.msk.bf16.vlgmr.msra.gmra.mrb[20].mxu1 %vm598_vm1, %v841_v32  ;;  %v814_v42 = vmax.f32 %v706_v35, 0.0 }
 0x25d   :  { %v701_v41 = vadd.f32 %v2125_v18, %v700_v40  ;;  %v812_v44 = vmax.f32 %v698_v37, 0.0 }
 0x25e   :  { %v815_v43 = vmax.f32 %v709_v39, 0.0 }
 0x25f   :  { %v813_v28 = vmax.f32 %v701_v41, 0.0 }
 0x260   :  { %v843_v45 = vpack.c.bf16 %v815_v43, %v814_v42 }
 0x261   :  { %v842_v46 = vpack.c.bf16 %v813_v28, %v812_v44  ;;  %v1593_v47 = vpop.f32.mrb[40].mxu0 }
 0x262   :  { %v722_v48 = vadd.f32 %v1593_v47, %v2125_v18  ;;  %v713_v49 = vpop.f32.mrb[41].mxu0 }
 0x263   :  { %v714_v50 = vadd.f32 %v2125_v18, %v713_v49  ;;  %v1594_v51 = vpop.f32.mrb[42].mxu0  ;;  %1627 = vmatprep.mubr.msk.bf16.mxu1 %vm598_vm1, %v842_v46 }
 0x264   :  { %v725_v52 = vadd.f32 %v1594_v51, %v2125_v18  ;;  %v716_v53 = vpop.f32.mrb[43].mxu0  ;;  %1628 = vmatmul.mubr.msk.bf16.gmra.mrb[24].mxu1 %vm598_vm1, %v843_v45  ;;  %v818_v55 = vmax.f32 %v722_v48, 0.0 }
 0x265   :  { %v717_v54 = vadd.f32 %v2125_v18, %v716_v53  ;;  %v816_v57 = vmax.f32 %v714_v50, 0.0 }
 0x266   :  { %v819_v56 = vmax.f32 %v725_v52, 0.0 }
 0x267   :  { %v817_v58 = vmax.f32 %v717_v54, 0.0 }
 0x268   :  { %v845_v59 = vpack.c.bf16 %v819_v56, %v818_v55 }
 0x269   :  { %v844_v60 = vpack.c.bf16 %v817_v58, %v816_v57  ;;  %v1597_v61 = vpop.f32.mrb[0].mxu1 }
 0x26a   :  { %v738_v62 = vadd.f32 %v1597_v61, %v2125_v18  ;;  %v729_v63 = vpop.f32.mrb[1].mxu1 }
 0x26b   :  { %v730_v0 = vadd.f32 %v2125_v18, %v729_v63  ;;  %v1598_v1 = vpop.f32.mrb[2].mxu1  ;;  %1631 = vmatprep.mubr.msk.bf16.mxu1 %vm598_vm1, %v844_v60 }
 0x26c   :  { %v741_v2 = vadd.f32 %v1598_v1, %v2125_v18  ;;  %v732_v3 = vpop.f32.mrb[3].mxu1  ;;  %1632 = vmatmul.mubr.msk.bf16.gmra.mrb[28].mxu1 %vm598_vm1, %v845_v59  ;;  %v822_v5 = vmax.f32 %v738_v62, 0.0 }
 0x26d   :  { %v733_v4 = vadd.f32 %v2125_v18, %v732_v3  ;;  %v820_v7 = vmax.f32 %v730_v0, 0.0 }
 0x26e   :  { %v823_v6 = vmax.f32 %v741_v2, 0.0 }
 0x26f   :  { %v821_v8 = vmax.f32 %v733_v4, 0.0  ;;  %v2175_v4 = vld [vmem:[#allocation13] ss:$0 sm:$0xff] }
 0x270   :  { %v847_v9 = vpack.c.bf16 %v823_v6, %v822_v5 }
 0x271   :  { %v846_v10 = vpack.c.bf16 %v821_v8, %v820_v7  ;;  %v1601_v11 = vpop.f32.mrb[4].mxu1 }
 0x272   :  { %v754_v12 = vadd.f32 %v1601_v11, %v2125_v18  ;;  %v745_v13 = vpop.f32.mrb[5].mxu1 }
 0x273   :  { %v746_v14 = vadd.f32 %v2125_v18, %v745_v13  ;;  %v1602_v15 = vpop.f32.mrb[6].mxu1  ;;  %1635 = vmatprep.mubr.msk.bf16.mxu1 %vm598_vm1, %v846_v10 }
 0x274   :  { %v757_v16 = vadd.f32 %v1602_v15, %v2125_v18  ;;  %v748_v17 = vpop.f32.mrb[7].mxu1  ;;  %1636 = vmatmul.mubr.msk.bf16.gmra.mrb[32].mxu1 %vm598_vm1, %v847_v9  ;;  %v826_v20 = vmax.f32 %v754_v12, 0.0 }
 0x275   :  { %v749_v19 = vadd.f32 %v2125_v18, %v748_v17  ;;  %v824_v29 = vmax.f32 %v746_v14, 0.0 }
 0x276   :  { %v827_v21 = vmax.f32 %v757_v16, 0.0 }
 0x277   :  { %v825_v22 = vmax.f32 %v749_v19, 0.0 }
 0x278   :  { %v849_v23 = vpack.c.bf16 %v827_v21, %v826_v20 }
 0x279   :  { %v848_v24 = vpack.c.bf16 %v825_v22, %v824_v29  ;;  %v1605_v25 = vpop.f32.mrb[8].mxu1 }
 0x27a   :  { %v770_v26 = vadd.f32 %v1605_v25, %v2125_v18  ;;  %v761_v27 = vpop.f32.mrb[9].mxu1 }
 0x27b   :  { %v762_v30 = vadd.f32 %v2125_v18, %v761_v27  ;;  %v1606_v31 = vpop.f32.mrb[10].mxu1  ;;  %1639 = vmatprep.mubr.msk.bf16.mxu1 %vm598_vm1, %v848_v24 }
 0x27c   :  { %v773_v32 = vadd.f32 %v1606_v31, %v2125_v18  ;;  %v764_v33 = vpop.f32.mrb[11].mxu1  ;;  %1640 = vmatmul.mubr.msk.bf16.gmra.mrb[36].mxu1 %vm598_vm1, %v849_v23  ;;  %v830_v35 = vmax.f32 %v770_v26, 0.0 }
 0x27d   :  { %v765_v34 = vadd.f32 %v2125_v18, %v764_v33  ;;  %v828_v37 = vmax.f32 %v762_v30, 0.0 }
 0x27e   :  { %v831_v36 = vmax.f32 %v773_v32, 0.0 }
 0x27f   :  { %v829_v38 = vmax.f32 %v765_v34, 0.0 }
 0x280   :  { %v851_v39 = vpack.c.bf16 %v831_v36, %v830_v35 }
 0x281   :  { %v850_v40 = vpack.c.bf16 %v829_v38, %v828_v37  ;;  %v1609_v41 = vpop.f32.mrb[12].mxu1 }
 0x282   :  { %v786_v42 = vadd.f32 %v1609_v41, %v2125_v18  ;;  %v777_v43 = vpop.f32.mrb[13].mxu1 }
 0x283   :  { %v778_v44 = vadd.f32 %v2125_v18, %v777_v43  ;;  %v1610_v28 = vpop.f32.mrb[14].mxu1  ;;  %1643 = vmatprep.mubr.msk.bf16.mxu1 %vm598_vm1, %v850_v40 }
 0x284   :  { %v789_v45 = vadd.f32 %v1610_v28, %v2125_v18  ;;  %v780_v46 = vpop.f32.mrb[15].mxu1  ;;  %1644 = vmatmul.mubr.msk.bf16.gmra.mrb[40].mxu1 %vm598_vm1, %v851_v39  ;;  %v834_v48 = vmax.f32 %v786_v42, 0.0 }
 0x285   :  { %v781_v47 = vadd.f32 %v2125_v18, %v780_v46  ;;  %v832_v50 = vmax.f32 %v778_v44, 0.0 }
 0x286   :  { %v835_v49 = vmax.f32 %v789_v45, 0.0 }
 0x287   :  { %v833_v51 = vmax.f32 %v781_v47, 0.0 }
 0x288   :  { %v853_v52 = vpack.c.bf16 %v835_v49, %v834_v48 }
 0x289   :  { %v852_v53 = vpack.c.bf16 %v833_v51, %v832_v50  ;;  %v1613_v54 = vpop.f32.mrb[16].mxu1 }
 0x28a   :  { %v802_v55 = vadd.f32 %v1613_v54, %v2125_v18  ;;  %v793_v56 = vpop.f32.mrb[17].mxu1 }
 0x28b   :  { %v794_v57 = vadd.f32 %v2125_v18, %v793_v56  ;;  %v1614_v58 = vpop.f32.mrb[18].mxu1  ;;  %1647 = vmatprep.mubr.msk.bf16.mxu1 %vm598_vm1, %v852_v53 }
 0x28c   :  { %v805_v59 = vadd.f32 %v1614_v58, %v2125_v18  ;;  %v796_v60 = vpop.f32.mrb[19].mxu1  ;;  %1648 = vmatmul.mubr.msk.bf16.gmra.mrb[44].mxu1 %vm598_vm1, %v853_v52  ;;  %v838_v62 = vmax.f32 %v802_v55, 0.0 }
 0x28d   :  { %v797_v61 = vadd.f32 %v2125_v18, %v796_v60  ;;  %v836_v0 = vmax.f32 %v794_v57, 0.0 }
 0x28e   :  { %v839_v63 = vmax.f32 %v805_v59, 0.0 }
 0x28f   :  { %v837_v1 = vmax.f32 %v797_v61, 0.0 }
 0x290   :  { %v855_v2 = vpack.c.bf16 %v839_v63, %v838_v62 }
 0x291   :  { %v854_v3 = vpack.c.bf16 %v837_v1, %v836_v0 }
 0x293   :  { %1651 = vmatprep.mubr.msk.bf16.mxu1 %vm598_vm1, %v854_v3 }
 0x294   :  { %1652 = vmatmul.mubr.msk.bf16.gmra.mrb[48].mxu1 %vm598_vm1, %v855_v2 }
 0x32f   :  { %v1625_v5 = vpop.f32.mrb[20].mxu1 }
 0x330   :  { %v986_v6 = vadd.f32 %v1625_v5, %v2175_v4  ;;  %v977_v7 = vpop.f32.mrb[21].mxu1 }
 0x331   :  { %v978_v8 = vadd.f32 %v2175_v4, %v977_v7  ;;  %v1626_v9 = vpop.f32.mrb[22].mxu1 }
 0x332   :  { %v1106_v18 = vmax.f32 %v986_v6, 0.0  ;;  %v989_v10 = vadd.f32 %v1626_v9, %v2175_v4  ;;  %v980_v11 = vpop.f32.mrb[23].mxu1 }
 0x333   :  { %v1104_v12 = vmax.f32 %v978_v8, 0.0  ;;  %v981_v13 = vadd.f32 %v2175_v4, %v980_v11 }
 0x334   :  { %v1148_v14 = vrot.slane %v1106_v18, 4  ;;  %v1107_v15 = vmax.f32 %v989_v10, 0.0 }
 0x335   :  { %v1136_v16 = vrot.slane %v1104_v12, 4  ;;  %v1105_v17 = vmax.f32 %v981_v13, 0.0 }
 0x336   :  { %v1149_v19 = vmax.f32 %v1106_v18, %v1148_v14  ;;  %v1154_v20 = vrot.slane %v1107_v15, 4 }
 0x337   :  { %v1137_v21 = vmax.f32 %v1104_v12, %v1136_v16  ;;  %v1142_v29 = vrot.slane %v1105_v17, 4  ;;  %v1629_v22 = vpop.f32.mrb[24].mxu1 }
 0x338   :  { %v1150_v23 = vrot.slane %v1149_v19, 2  ;;  %v1155_v24 = vmax.f32 %v1107_v15, %v1154_v20  ;;  %v1002_v25 = vadd.f32 %v1629_v22, %v2175_v4  ;;  %v993_v26 = vpop.f32.mrb[25].mxu1 }
 0x339   :  { %v1138_v27 = vrot.slane %v1137_v21, 2  ;;  %v1143_v30 = vmax.f32 %v1105_v17, %v1142_v29  ;;  %v994_v31 = vadd.f32 %v2175_v4, %v993_v26  ;;  %v1630_v32 = vpop.f32.mrb[26].mxu1 }
 0x33a   :  { %v1151_v33 = vmax.f32 %v1149_v19, %v1150_v23  ;;  %v1156_v34 = vrot.slane %v1155_v24, 2  ;;  %v1110_v35 = vmax.f32 %v1002_v25, 0.0  ;;  %v1005_v36 = vadd.f32 %v1630_v32, %v2175_v4  ;;  %v996_v37 = vpop.f32.mrb[27].mxu1 }
 0x33b   :  { %v1139_v38 = vmax.f32 %v1137_v21, %v1138_v27  ;;  %v1144_v39 = vrot.slane %v1143_v30, 2  ;;  %v1108_v40 = vmax.f32 %v994_v31, 0.0  ;;  %v997_v41 = vadd.f32 %v2175_v4, %v996_v37 }
 0x33c   :  { %v1152_v42 = vrot.slane %v1151_v33, 1  ;;  %v1157_v43 = vmax.f32 %v1155_v24, %v1156_v34  ;;  %v1172_v44 = vrot.slane %v1110_v35, 4  ;;  %v1111_v28 = vmax.f32 %v1005_v36, 0.0 }
 0x33d   :  { %v1140_v45 = vrot.slane %v1139_v38, 1  ;;  %v1145_v46 = vmax.f32 %v1143_v30, %v1144_v39  ;;  %v1160_v47 = vrot.slane %v1108_v40, 4  ;;  %v1109_v48 = vmax.f32 %v997_v41, 0.0 }
 0x33e   :  { %v1153_v49 = vmax.f32 %v1151_v33, %v1152_v42  ;;  %v1158_v50 = vrot.slane %v1157_v43, 1  ;;  %v1173_v51 = vmax.f32 %v1110_v35, %v1172_v44  ;;  %v1178_v52 = vrot.slane %v1111_v28, 4 }
 0x33f   :  { %v1141_v53 = vmax.f32 %v1139_v38, %v1140_v45  ;;  %v1146_v54 = vrot.slane %v1145_v46, 1  ;;  %v1161_v55 = vmax.f32 %v1108_v40, %v1160_v47  ;;  %v1166_v56 = vrot.slane %v1109_v48, 4  ;;  %v1633_v57 = vpop.f32.mrb[28].mxu1 }
 0x340   :  { %1330 = vst [vmem:[#allocation14 + $0x2] sm:$0x1] %v1153_v49  ;;  %v1159_v58 = vmax.f32 %v1157_v43, %v1158_v50  ;;  %v1174_v59 = vrot.slane %v1173_v51, 2  ;;  %v1179_v60 = vmax.f32 %v1111_v28, %v1178_v52  ;;  %v1018_v61 = vadd.f32 %v1633_v57, %v2175_v4  ;;  %v1009_v62 = vpop.f32.mrb[29].mxu1 }
 0x341   :  { %1328 = vst [vmem:[#allocation14] sm:$0x1] %v1141_v53  ;;  %v1147_v63 = vmax.f32 %v1145_v46, %v1146_v54  ;;  %v1162_v0 = vrot.slane %v1161_v55, 2  ;;  %v1167_v1 = vmax.f32 %v1109_v48, %v1166_v56  ;;  %v1010_v2 = vadd.f32 %v2175_v4, %v1009_v62  ;;  %v1634_v3 = vpop.f32.mrb[30].mxu1 }
 0x342   :  { %1331 = vst [vmem:[#allocation14 + $0x3] sm:$0x1] %v1159_v58  ;;  %v1175_v5 = vmax.f32 %v1173_v51, %v1174_v59  ;;  %v1180_v6 = vrot.slane %v1179_v60, 2  ;;  %v1114_v7 = vmax.f32 %v1018_v61, 0.0  ;;  %v1021_v8 = vadd.f32 %v1634_v3, %v2175_v4  ;;  %v1012_v9 = vpop.f32.mrb[31].mxu1 }
 0x343   :  { %1329 = vst [vmem:[#allocation14 + $0x1] sm:$0x1] %v1147_v63  ;;  %v1163_v18 = vmax.f32 %v1161_v55, %v1162_v0  ;;  %v1168_v10 = vrot.slane %v1167_v1, 2  ;;  %v1112_v11 = vmax.f32 %v1010_v2, 0.0  ;;  %v1013_v12 = vadd.f32 %v2175_v4, %v1012_v9 }
 0x344   :  { %v1176_v13 = vrot.slane %v1175_v5, 1  ;;  %v1181_v14 = vmax.f32 %v1179_v60, %v1180_v6  ;;  %v1196_v15 = vrot.slane %v1114_v7, 4  ;;  %v1115_v16 = vmax.f32 %v1021_v8, 0.0 }
 0x345   :  { %v1164_v17 = vrot.slane %v1163_v18, 1  ;;  %v1169_v19 = vmax.f32 %v1167_v1, %v1168_v10  ;;  %v1184_v20 = vrot.slane %v1112_v11, 4  ;;  %v1113_v21 = vmax.f32 %v1013_v12, 0.0 }
 0x346   :  { %v1177_v29 = vmax.f32 %v1175_v5, %v1176_v13  ;;  %v1182_v22 = vrot.slane %v1181_v14, 1  ;;  %v1197_v23 = vmax.f32 %v1114_v7, %v1196_v15  ;;  %v1202_v24 = vrot.slane %v1115_v16, 4 }
 0x347   :  { %v1165_v25 = vmax.f32 %v1163_v18, %v1164_v17  ;;  %v1170_v26 = vrot.slane %v1169_v19, 1  ;;  %v1185_v27 = vmax.f32 %v1112_v11, %v1184_v20  ;;  %v1190_v30 = vrot.slane %v1113_v21, 4  ;;  %v1637_v31 = vpop.f32.mrb[32].mxu1 }
 0x348   :  { %1334 = vst [vmem:[#allocation14 + $0x6] sm:$0x1] %v1177_v29  ;;  %v1183_v32 = vmax.f32 %v1181_v14, %v1182_v22  ;;  %v1198_v33 = vrot.slane %v1197_v23, 2  ;;  %v1203_v34 = vmax.f32 %v1115_v16, %v1202_v24  ;;  %v1034_v35 = vadd.f32 %v1637_v31, %v2175_v4  ;;  %v1025_v36 = vpop.f32.mrb[33].mxu1 }
 0x349   :  { %1332 = vst [vmem:[#allocation14 + $0x4] sm:$0x1] %v1165_v25  ;;  %v1171_v37 = vmax.f32 %v1169_v19, %v1170_v26  ;;  %v1186_v38 = vrot.slane %v1185_v27, 2  ;;  %v1191_v39 = vmax.f32 %v1113_v21, %v1190_v30  ;;  %v1026_v40 = vadd.f32 %v2175_v4, %v1025_v36  ;;  %v1638_v41 = vpop.f32.mrb[34].mxu1 }
 0x34a   :  { %1335 = vst [vmem:[#allocation14 + $0x7] sm:$0x1] %v1183_v32  ;;  %v1199_v42 = vmax.f32 %v1197_v23, %v1198_v33  ;;  %v1204_v43 = vrot.slane %v1203_v34, 2  ;;  %v1118_v44 = vmax.f32 %v1034_v35, 0.0  ;;  %v1037_v28 = vadd.f32 %v1638_v41, %v2175_v4  ;;  %v1028_v45 = vpop.f32.mrb[35].mxu1 }
 0x34b   :  { %1333 = vst [vmem:[#allocation14 + $0x5] sm:$0x1] %v1171_v37  ;;  %v1187_v46 = vmax.f32 %v1185_v27, %v1186_v38  ;;  %v1192_v47 = vrot.slane %v1191_v39, 2  ;;  %v1116_v48 = vmax.f32 %v1026_v40, 0.0  ;;  %v1029_v49 = vadd.f32 %v2175_v4, %v1028_v45 }
 0x34c   :  { %v1200_v50 = vrot.slane %v1199_v42, 1  ;;  %v1205_v51 = vmax.f32 %v1203_v34, %v1204_v43  ;;  %v1220_v52 = vrot.slane %v1118_v44, 4  ;;  %v1119_v53 = vmax.f32 %v1037_v28, 0.0 }
 0x34d   :  { %v1188_v54 = vrot.slane %v1187_v46, 1  ;;  %v1193_v55 = vmax.f32 %v1191_v39, %v1192_v47  ;;  %v1208_v56 = vrot.slane %v1116_v48, 4  ;;  %v1117_v57 = vmax.f32 %v1029_v49, 0.0 }
 0x34e   :  { %v1201_v58 = vmax.f32 %v1199_v42, %v1200_v50  ;;  %v1206_v59 = vrot.slane %v1205_v51, 1  ;;  %v1221_v60 = vmax.f32 %v1118_v44, %v1220_v52  ;;  %v1226_v61 = vrot.slane %v1119_v53, 4 }
 0x34f   :  { %v1189_v62 = vmax.f32 %v1187_v46, %v1188_v54  ;;  %v1194_v63 = vrot.slane %v1193_v55, 1  ;;  %v1209_v0 = vmax.f32 %v1116_v48, %v1208_v56  ;;  %v1214_v1 = vrot.slane %v1117_v57, 4  ;;  %v1641_v2 = vpop.f32.mrb[36].mxu1 }
 0x350   :  { %1338 = vst [vmem:[#allocation14 + $0xa] sm:$0x1] %v1201_v58  ;;  %v1207_v3 = vmax.f32 %v1205_v51, %v1206_v59  ;;  %v1222_v5 = vrot.slane %v1221_v60, 2  ;;  %v1227_v6 = vmax.f32 %v1119_v53, %v1226_v61  ;;  %v1050_v7 = vadd.f32 %v1641_v2, %v2175_v4  ;;  %v1041_v8 = vpop.f32.mrb[37].mxu1 }
 0x351   :  { %1336 = vst [vmem:[#allocation14 + $0x8] sm:$0x1] %v1189_v62  ;;  %v1195_v9 = vmax.f32 %v1193_v55, %v1194_v63  ;;  %v1210_v18 = vrot.slane %v1209_v0, 2  ;;  %v1215_v10 = vmax.f32 %v1117_v57, %v1214_v1  ;;  %v1042_v11 = vadd.f32 %v2175_v4, %v1041_v8  ;;  %v1642_v12 = vpop.f32.mrb[38].mxu1 }
 0x352   :  { %1339 = vst [vmem:[#allocation14 + $0xb] sm:$0x1] %v1207_v3  ;;  %v1223_v13 = vmax.f32 %v1221_v60, %v1222_v5  ;;  %v1228_v14 = vrot.slane %v1227_v6, 2  ;;  %v1122_v15 = vmax.f32 %v1050_v7, 0.0  ;;  %v1053_v16 = vadd.f32 %v1642_v12, %v2175_v4  ;;  %v1044_v17 = vpop.f32.mrb[39].mxu1 }
 0x353   :  { %1337 = vst [vmem:[#allocation14 + $0x9] sm:$0x1] %v1195_v9  ;;  %v1211_v19 = vmax.f32 %v1209_v0, %v1210_v18  ;;  %v1216_v20 = vrot.slane %v1215_v10, 2  ;;  %v1120_v21 = vmax.f32 %v1042_v11, 0.0  ;;  %v1045_v29 = vadd.f32 %v2175_v4, %v1044_v17 }
 0x354   :  { %v1224_v22 = vrot.slane %v1223_v13, 1  ;;  %v1229_v23 = vmax.f32 %v1227_v6, %v1228_v14  ;;  %v1244_v24 = vrot.slane %v1122_v15, 4  ;;  %v1123_v25 = vmax.f32 %v1053_v16, 0.0 }
 0x355   :  { %v1212_v26 = vrot.slane %v1211_v19, 1  ;;  %v1217_v27 = vmax.f32 %v1215_v10, %v1216_v20  ;;  %v1232_v30 = vrot.slane %v1120_v21, 4  ;;  %v1121_v31 = vmax.f32 %v1045_v29, 0.0 }
 0x356   :  { %v1225_v32 = vmax.f32 %v1223_v13, %v1224_v22  ;;  %v1230_v33 = vrot.slane %v1229_v23, 1  ;;  %v1245_v34 = vmax.f32 %v1122_v15, %v1244_v24  ;;  %v1250_v35 = vrot.slane %v1123_v25, 4 }
 0x357   :  { %v1213_v36 = vmax.f32 %v1211_v19, %v1212_v26  ;;  %v1218_v37 = vrot.slane %v1217_v27, 1  ;;  %v1233_v38 = vmax.f32 %v1120_v21, %v1232_v30  ;;  %v1238_v39 = vrot.slane %v1121_v31, 4  ;;  %v1645_v40 = vpop.f32.mrb[40].mxu1 }
 0x358   :  { %1342 = vst [vmem:[#allocation14 + $0xe] sm:$0x1] %v1225_v32  ;;  %v1231_v41 = vmax.f32 %v1229_v23, %v1230_v33  ;;  %v1246_v42 = vrot.slane %v1245_v34, 2  ;;  %v1251_v43 = vmax.f32 %v1123_v25, %v1250_v35  ;;  %v1066_v44 = vadd.f32 %v1645_v40, %v2175_v4  ;;  %v1057_v28 = vpop.f32.mrb[41].mxu1 }
 0x359   :  { %1340 = vst [vmem:[#allocation14 + $0xc] sm:$0x1] %v1213_v36  ;;  %v1219_v45 = vmax.f32 %v1217_v27, %v1218_v37  ;;  %v1234_v46 = vrot.slane %v1233_v38, 2  ;;  %v1239_v47 = vmax.f32 %v1121_v31, %v1238_v39  ;;  %v1058_v48 = vadd.f32 %v2175_v4, %v1057_v28  ;;  %v1646_v49 = vpop.f32.mrb[42].mxu1 }
 0x35a   :  { %1343 = vst [vmem:[#allocation14 + $0xf] sm:$0x1] %v1231_v41  ;;  %v1247_v50 = vmax.f32 %v1245_v34, %v1246_v42  ;;  %v1252_v51 = vrot.slane %v1251_v43, 2  ;;  %v1126_v52 = vmax.f32 %v1066_v44, 0.0  ;;  %v1069_v53 = vadd.f32 %v1646_v49, %v2175_v4  ;;  %v1060_v54 = vpop.f32.mrb[43].mxu1 }
 0x35b   :  { %1341 = vst [vmem:[#allocation14 + $0xd] sm:$0x1] %v1219_v45  ;;  %v1235_v55 = vmax.f32 %v1233_v38, %v1234_v46  ;;  %v1240_v56 = vrot.slane %v1239_v47, 2  ;;  %v1124_v57 = vmax.f32 %v1058_v48, 0.0  ;;  %v1061_v58 = vadd.f32 %v2175_v4, %v1060_v54 }
 0x35c   :  { %v1248_v59 = vrot.slane %v1247_v50, 1  ;;  %v1253_v60 = vmax.f32 %v1251_v43, %v1252_v51  ;;  %v1268_v61 = vrot.slane %v1126_v52, 4  ;;  %v1127_v62 = vmax.f32 %v1069_v53, 0.0 }
 0x35d   :  { %v1236_v63 = vrot.slane %v1235_v55, 1  ;;  %v1241_v0 = vmax.f32 %v1239_v47, %v1240_v56  ;;  %v1256_v1 = vrot.slane %v1124_v57, 4  ;;  %v1125_v2 = vmax.f32 %v1061_v58, 0.0 }
 0x35e   :  { %v1249_v3 = vmax.f32 %v1247_v50, %v1248_v59  ;;  %v1254_v5 = vrot.slane %v1253_v60, 1  ;;  %v1269_v6 = vmax.f32 %v1126_v52, %v1268_v61  ;;  %v1274_v7 = vrot.slane %v1127_v62, 4 }
 0x35f   :  { %v1237_v8 = vmax.f32 %v1235_v55, %v1236_v63  ;;  %v1242_v9 = vrot.slane %v1241_v0, 1  ;;  %v1257_v18 = vmax.f32 %v1124_v57, %v1256_v1  ;;  %v1262_v10 = vrot.slane %v1125_v2, 4  ;;  %v1649_v11 = vpop.f32.mrb[44].mxu1 }
 0x360   :  { %1346 = vst [vmem:[#allocation14 + $0x12] sm:$0x1] %v1249_v3  ;;  %v1255_v12 = vmax.f32 %v1253_v60, %v1254_v5  ;;  %v1270_v13 = vrot.slane %v1269_v6, 2  ;;  %v1275_v14 = vmax.f32 %v1127_v62, %v1274_v7  ;;  %v1082_v15 = vadd.f32 %v1649_v11, %v2175_v4  ;;  %v1073_v16 = vpop.f32.mrb[45].mxu1 }
 0x361   :  { %1344 = vst [vmem:[#allocation14 + $0x10] sm:$0x1] %v1237_v8  ;;  %v1243_v17 = vmax.f32 %v1241_v0, %v1242_v9  ;;  %v1258_v19 = vrot.slane %v1257_v18, 2  ;;  %v1263_v20 = vmax.f32 %v1125_v2, %v1262_v10  ;;  %v1074_v21 = vadd.f32 %v2175_v4, %v1073_v16  ;;  %v1650_v29 = vpop.f32.mrb[46].mxu1 }
 0x362   :  { %1347 = vst [vmem:[#allocation14 + $0x13] sm:$0x1] %v1255_v12  ;;  %v1271_v22 = vmax.f32 %v1269_v6, %v1270_v13  ;;  %v1276_v23 = vrot.slane %v1275_v14, 2  ;;  %v1130_v24 = vmax.f32 %v1082_v15, 0.0  ;;  %v1085_v25 = vadd.f32 %v1650_v29, %v2175_v4  ;;  %v1076_v26 = vpop.f32.mrb[47].mxu1 }
 0x363   :  { %1345 = vst [vmem:[#allocation14 + $0x11] sm:$0x1] %v1243_v17  ;;  %v1259_v27 = vmax.f32 %v1257_v18, %v1258_v19  ;;  %v1264_v30 = vrot.slane %v1263_v20, 2  ;;  %v1128_v31 = vmax.f32 %v1074_v21, 0.0  ;;  %v1077_v32 = vadd.f32 %v2175_v4, %v1076_v26 }
 0x364   :  { %v1272_v33 = vrot.slane %v1271_v22, 1  ;;  %v1277_v34 = vmax.f32 %v1275_v14, %v1276_v23  ;;  %v1292_v35 = vrot.slane %v1130_v24, 4  ;;  %v1131_v36 = vmax.f32 %v1085_v25, 0.0 }
 0x365   :  { %v1260_v37 = vrot.slane %v1259_v27, 1  ;;  %v1265_v38 = vmax.f32 %v1263_v20, %v1264_v30  ;;  %v1280_v39 = vrot.slane %v1128_v31, 4  ;;  %v1129_v40 = vmax.f32 %v1077_v32, 0.0 }
 0x366   :  { %v1273_v41 = vmax.f32 %v1271_v22, %v1272_v33  ;;  %v1278_v42 = vrot.slane %v1277_v34, 1  ;;  %v1293_v43 = vmax.f32 %v1130_v24, %v1292_v35  ;;  %v1298_v44 = vrot.slane %v1131_v36, 4 }
 0x367   :  { %v1261_v28 = vmax.f32 %v1259_v27, %v1260_v37  ;;  %v1266_v45 = vrot.slane %v1265_v38, 1  ;;  %v1281_v46 = vmax.f32 %v1128_v31, %v1280_v39  ;;  %v1286_v47 = vrot.slane %v1129_v40, 4  ;;  %v1653_v48 = vpop.f32.mrb[48].mxu1 }
 0x368   :  { %1350 = vst [vmem:[#allocation14 + $0x16] sm:$0x1] %v1273_v41  ;;  %v1279_v49 = vmax.f32 %v1277_v34, %v1278_v42  ;;  %v1294_v50 = vrot.slane %v1293_v43, 2  ;;  %v1299_v51 = vmax.f32 %v1131_v36, %v1298_v44  ;;  %v1098_v52 = vadd.f32 %v1653_v48, %v2175_v4  ;;  %v1089_v53 = vpop.f32.mrb[49].mxu1 }
 0x369   :  { %1348 = vst [vmem:[#allocation14 + $0x14] sm:$0x1] %v1261_v28  ;;  %v1267_v54 = vmax.f32 %v1265_v38, %v1266_v45  ;;  %v1282_v55 = vrot.slane %v1281_v46, 2  ;;  %v1287_v56 = vmax.f32 %v1129_v40, %v1286_v47  ;;  %v1090_v57 = vadd.f32 %v2175_v4, %v1089_v53  ;;  %v1654_v58 = vpop.f32.mrb[50].mxu1 }
 0x36a   :  { %1351 = vst [vmem:[#allocation14 + $0x17] sm:$0x1] %v1279_v49  ;;  %v1295_v59 = vmax.f32 %v1293_v43, %v1294_v50  ;;  %v1300_v60 = vrot.slane %v1299_v51, 2  ;;  %v1134_v61 = vmax.f32 %v1098_v52, 0.0  ;;  %v1101_v62 = vadd.f32 %v1654_v58, %v2175_v4  ;;  %v1092_v63 = vpop.f32.mrb[51].mxu1 }
 0x36b   :  { %1349 = vst [vmem:[#allocation14 + $0x15] sm:$0x1] %v1267_v54  ;;  %v1283_v0 = vmax.f32 %v1281_v46, %v1282_v55  ;;  %v1288_v1 = vrot.slane %v1287_v56, 2  ;;  %v1132_v2 = vmax.f32 %v1090_v57, 0.0  ;;  %v1093_v3 = vadd.f32 %v2175_v4, %v1092_v63 }
 0x36c   :  { %v1296_v5 = vrot.slane %v1295_v59, 1  ;;  %v1301_v6 = vmax.f32 %v1299_v51, %v1300_v60  ;;  %v1316_v7 = vrot.slane %v1134_v61, 4  ;;  %v1135_v8 = vmax.f32 %v1101_v62, 0.0 }
 0x36d   :  { %v1284_v9 = vrot.slane %v1283_v0, 1  ;;  %v1289_v18 = vmax.f32 %v1287_v56, %v1288_v1  ;;  %v1304_v10 = vrot.slane %v1132_v2, 4  ;;  %v1133_v11 = vmax.f32 %v1093_v3, 0.0 }
 0x36e   :  { %v1297_v12 = vmax.f32 %v1295_v59, %v1296_v5  ;;  %v1302_v13 = vrot.slane %v1301_v6, 1  ;;  %v1317_v14 = vmax.f32 %v1134_v61, %v1316_v7  ;;  %v1322_v15 = vrot.slane %v1135_v8, 4 }
 0x36f   :  { %v1285_v16 = vmax.f32 %v1283_v0, %v1284_v9  ;;  %v1290_v17 = vrot.slane %v1289_v18, 1  ;;  %v1305_v19 = vmax.f32 %v1132_v2, %v1304_v10  ;;  %v1310_v20 = vrot.slane %v1133_v11, 4 }
 0x370   :  { %1354 = vst [vmem:[#allocation14 + $0x1a] sm:$0x1] %v1297_v12  ;;  %v1303_v21 = vmax.f32 %v1301_v6, %v1302_v13  ;;  %v1318_v29 = vrot.slane %v1317_v14, 2  ;;  %v1323_v4 = vmax.f32 %v1135_v8, %v1322_v15 }
 0x371   :  { %1352 = vst [vmem:[#allocation14 + $0x18] sm:$0x1] %v1285_v16  ;;  %v1291_v22 = vmax.f32 %v1289_v18, %v1290_v17  ;;  %v1306_v23 = vrot.slane %v1305_v19, 2  ;;  %v1311_v24 = vmax.f32 %v1133_v11, %v1310_v20 }
 0x372   :  { %1355 = vst [vmem:[#allocation14 + $0x1b] sm:$0x1] %v1303_v21  ;;  %v1319_v25 = vmax.f32 %v1317_v14, %v1318_v29  ;;  %v1324_v26 = vrot.slane %v1323_v4, 2 }
 0x373   :  { %1353 = vst [vmem:[#allocation14 + $0x19] sm:$0x1] %v1291_v22  ;;  %v1307_v27 = vmax.f32 %v1305_v19, %v1306_v23  ;;  %v1312_v30 = vrot.slane %v1311_v24, 2 }
 0x374   :  { %v1320_v31 = vrot.slane %v1319_v25, 1  ;;  %v1325_v32 = vmax.f32 %v1323_v4, %v1324_v26 }
 0x375   :  { %v1308_v33 = vrot.slane %v1307_v27, 1  ;;  %v1313_v34 = vmax.f32 %v1311_v24, %v1312_v30 }
 0x376   :  { %v1321_v35 = vmax.f32 %v1319_v25, %v1320_v31  ;;  %v1326_v36 = vrot.slane %v1325_v32, 1 }
 0x377   :  { %v1309_v37 = vmax.f32 %v1307_v27, %v1308_v33  ;;  %v1314_v38 = vrot.slane %v1313_v34, 1 }
 0x378   :  { %1358 = vst [vmem:[#allocation14 + $0x1e] sm:$0x1] %v1321_v35  ;;  %v1327_v39 = vmax.f32 %v1325_v32, %v1326_v36 }
 0x379   :  { %1356 = vst [vmem:[#allocation14 + $0x1c] sm:$0x1] %v1309_v37  ;;  %v1315_v40 = vmax.f32 %v1313_v34, %v1314_v38 }
 0x37a   :  { %1359 = vst [vmem:[#allocation14 + $0x1f] sm:$0x1] %v1327_v39 }
 0x37b   :  { %1357 = vst [vmem:[#allocation14 + $0x1d] sm:$0x1] %v1315_v40 }
 0x37c   :  { %1872 = shalt.err (!%p1869_p4)
}
 0x37d   :  { %s1873_s30 = scalar_lea.hbm %s2228_s7, 512 }
 0x37e   :  { %p1874_p5 = scmp.ne.s32.totalorder %s2228_s7, %s1873_s30  ;;  %p1877_p6 = scmp.lt.u32.totalorder %s1873_s30, %s2228_s7 }
 0x380   :  { %p1879_p7 = pnand %p1877_p6, %p1874_p5 }
 0x382   :  { %1882 = shalt.err (!%p1879_p7)
}
 0x383   :  { %s1903_s20 = smov 16   ;;  %s1904_s21 = smov 1  }
 0x384   :  { %1371 = dma.vmem_to_hbm [thread:$0]  %s1366_s3, 512, %s2228_s7, [#allocation4], %s1903_s20, %s1903_s20, %s1904_s21  }
 0x385   :  { %1891 = dma.done.wait [#allocation4], 512  }
 0x386   :  { %1892 = vsyncadd [#allocation4], 4294966784 }
 0x387   :  { %1375 = vsyncpa [#allocation3], 1 }
 0x388   :  { %1376 = vsyncpa [#allocation6], 1 }
 0x389   :  { %1377 = vsyncpa [#allocation9], 1 }
 0x38a   :  { %1378 = vsyncpa [#allocation12], 1 }
 0x38b   :  { %1379 = vsyncpa [#allocation4], 1 }

// kernel: pointnet2_forward.4
= control target key start
LH: loop header
LB: loop body
LE: loop exit
PB: predicated region body
PF: predicated region fallthrough
CT: control target
= control target key end

     0   :  { %12 = vsyncpa [#allocation3], 0  ;;  %s2243_s0 = inlined_call_operand.hbm [shape: bf16[128,133], index: 0, kind: input, shape index: {}]   ;;  %s2244_s1 = inlined_call_operand.hbm [shape: bf16[256,128], index: 1, kind: input, shape index: {}]   ;;  %s2245_s2 = inlined_call_operand.hbm [shape: f32[1,128], index: 2, kind: input, shape index: {}]   ;;  %s2246_s3 = inlined_call_operand.hbm [shape: bf16[128,128], index: 3, kind: input, shape index: {}]   ;;  %s2247_s4 = inlined_call_operand.hbm [shape: f32[1,128], index: 4, kind: input, shape index: {}]   ;;  %s2248_s5 = inlined_call_operand.hbm [shape: bf16[128,256], index: 5, kind: input, shape index: {}]   ;;  %s2249_s6 = inlined_call_operand.hbm [shape: f32[1,256], index: 6, kind: input, shape index: {}]   ;;  %s2250_s7 = inlined_call_operand.hbm [shape: f32[16,1,256], index: 7, kind: output, shape index: {}]  }
   0x1   :  { %13 = vsyncpa [#allocation6], 0 }
   0x2   :  { %14 = vsyncpa [#allocation9], 0 }
   0x3   :  { %15 = vsyncpa [#allocation12], 0 }
   0x4   :  { %16 = vsyncpa [#allocation4], 0  ;;  %s1920_s24 = smov [#allocation5]   ;;  %s1734_s28 = scalar_lea.hbm %s2244_s1, 2048 }
   0x5   :  { %s34_s25 = sshll.u32 %s1920_s24, 4  ;;  %p1735_p0 = scmp.ne.s32.totalorder %s2244_s1, %s1734_s28  ;;  %s35_s25 = int_to_ptr.vmem [resolvable:$true] %s34_s25 }
   0x6   :  { %p1738_p1 = scmp.lt.u32.totalorder %s1734_s28, %s2244_s1 }
   0x8   :  { %p1740_p2 = pnand %p1738_p1, %p1735_p0 }
   0xa   :  { %1743 = shalt.err (!%p1740_p2)
}
   0xb   :  { %s1744_s10 = scalar_lea.vmem %s35_s25, 2048  ;;  %p1749_p4 = scmp.lt.s32.totalorder %s35_s25, %s35_s25 }
   0xc   :  { %p1745_p3 = scmp.ne.s32.totalorder %s35_s25, %s1744_s10  ;;  %p1750_p5 = scmp.lt.s32.totalorder %s1744_s10, %s1744_s10 }
   0xe   :  { %p1751_p6 = por %p1750_p5, %p1749_p4 }
  0x10   :  { %p1752_p7 = pnand %p1751_p6, %p1745_p3 }
  0x12   :  { %1755 = shalt.err (!%p1752_p7)
}
  0x13   :  { %s1921_s11 = smov 64   ;;  %s1922_s12 = smov 4  }
  0x14   :  { %40 = dma.hbm_to_vmem [thread:$0]  %s2244_s1, 2048, %s35_s25, [#allocation6], %s1921_s11, %s1921_s11, %s1922_s12  }
  0x15   :  { %s1923_s15 = smov [#allocation8]   ;;  %s1756_s19 = scalar_lea.hbm %s2246_s3, 1024 }
  0x16   :  { %s56_s16 = sshll.u32 %s1923_s15, 4  ;;  %p1757_p8 = scmp.ne.s32.totalorder %s2246_s3, %s1756_s19  ;;  %s57_s16 = int_to_ptr.vmem [resolvable:$true] %s56_s16 }
  0x17   :  { %p1760_p9 = scmp.lt.u32.totalorder %s1756_s19, %s2246_s3 }
  0x19   :  { %p1762_p10 = pnand %p1760_p9, %p1757_p8 }
  0x1b   :  { %1765 = shalt.err (!%p1762_p10)
}
  0x1c   :  { %s1766_s24 = scalar_lea.vmem %s57_s16, 1024  ;;  %p1771_p12 = scmp.lt.s32.totalorder %s57_s16, %s57_s16 }
  0x1d   :  { %p1767_p11 = scmp.ne.s32.totalorder %s57_s16, %s1766_s24  ;;  %p1772_p13 = scmp.lt.s32.totalorder %s1766_s24, %s1766_s24 }
  0x1f   :  { %p1773_p0 = por %p1772_p13, %p1771_p12 }
  0x21   :  { %p1774_p1 = pnand %p1773_p0, %p1767_p11 }
  0x23   :  { %1777 = shalt.err (!%p1774_p1)
}
  0x24   :  { %62 = dma.hbm_to_vmem [thread:$0]  %s2246_s3, 1024, %s57_s16, [#allocation9], %s1921_s11, %s1921_s11, %s1922_s12  }
  0x25   :  { %s1924_s26 = smov [#allocation11]   ;;  %s1925_s28 = smov [#allocation2]  }
  0x26   :  { %s78_s27 = sshll.u32 %s1924_s26, 4  ;;  %s22_s29 = sshll.u32 %s1925_s28, 4  ;;  %s79_s27 = int_to_ptr.vmem [resolvable:$true] %s78_s27  ;;  %s2000_s29 = int_to_ptr.vmem [resolvable:$true] %s22_s29 }
  0x27   :  { %s1778_s9 = scalar_lea.hbm %s2248_s5, 2048 }
  0x28   :  { %p1779_p2 = scmp.ne.s32.totalorder %s2248_s5, %s1778_s9  ;;  %p1782_p3 = scmp.lt.u32.totalorder %s1778_s9, %s2248_s5 }
  0x2a   :  { %p1784_p4 = pnand %p1782_p3, %p1779_p2 }
  0x2c   :  { %1787 = shalt.err (!%p1784_p4)
}
  0x2d   :  { %s1788_s3 = scalar_lea.vmem %s79_s27, 2048  ;;  %p1793_p6 = scmp.lt.s32.totalorder %s79_s27, %s79_s27 }
  0x2e   :  { %p1789_p5 = scmp.ne.s32.totalorder %s79_s27, %s1788_s3  ;;  %p1794_p7 = scmp.lt.s32.totalorder %s1788_s3, %s1788_s3 }
  0x30   :  { %p1795_p8 = por %p1794_p7, %p1793_p6 }
  0x32   :  { %p1796_p9 = pnand %p1795_p8, %p1789_p5 }
  0x34   :  { %1799 = shalt.err (!%p1796_p9)
}
  0x35   :  { %s1926_s11 = smov 128   ;;  %s1927_s12 = smov 8  }
  0x36   :  { %84 = dma.hbm_to_vmem [thread:$0]  %s2248_s5, 2048, %s79_s27, [#allocation12], %s1926_s11, %s1926_s11, %s1927_s12  }
  0x37   :  { %s1800_s20 = scalar_lea.hbm %s2243_s0, 2048 }
  0x38   :  { %p1801_p10 = scmp.ne.s32.totalorder %s2243_s0, %s1800_s20  ;;  %p1804_p11 = scmp.lt.u32.totalorder %s1800_s20, %s2243_s0 }
  0x3a   :  { %p1806_p12 = pnand %p1804_p11, %p1801_p10 }
  0x3c   :  { %1809 = shalt.err (!%p1806_p12)
}
  0x3d   :  { %s1810_s1 = scalar_lea.vmem %s2000_s29, 2048  ;;  %p1815_p0 = scmp.lt.s32.totalorder %s2000_s29, %s2000_s29 }
  0x3e   :  { %p1811_p13 = scmp.ne.s32.totalorder %s2000_s29, %s1810_s1  ;;  %p1816_p1 = scmp.lt.s32.totalorder %s1810_s1, %s1810_s1 }
  0x40   :  { %p1817_p2 = por %p1816_p1, %p1815_p0 }
  0x42   :  { %p1818_p3 = pnand %p1817_p2, %p1811_p13 }
  0x44   :  { %1821 = shalt.err (!%p1818_p3)
}
  0x45   :  { %28 = dma.hbm_to_vmem [thread:$0]  %s2243_s0, 2048, %s2000_s29, [#allocation3], %s1926_s11, %s1926_s11, %s1927_s12  }
  0x46   :  { %s1928_s26 = smov [#allocation7]   ;;  %s1929_s28 = smov [#allocation10]  }
  0x47   :  { %s47_s27 = sshll.u32 %s1928_s26, 4  ;;  %s69_s30 = sshll.u32 %s1929_s28, 4  ;;  %s48_s27 = int_to_ptr.vmem [resolvable:$true] %s47_s27  ;;  %s70_s30 = int_to_ptr.vmem [resolvable:$true] %s69_s30 }
  0x48   :  { %s1822_s10 = scalar_lea.hbm %s2245_s2, 16 }
  0x49   :  { %p1823_p4 = scmp.ne.s32.totalorder %s2245_s2, %s1822_s10  ;;  %p1826_p5 = scmp.lt.u32.totalorder %s1822_s10, %s2245_s2 }
  0x4b   :  { %p1828_p6 = pnand %p1826_p5, %p1823_p4 }
  0x4d   :  { %1831 = shalt.err (!%p1828_p6)
}
  0x4e   :  { %s1832_s0 = scalar_lea.vmem %s48_s27, 16  ;;  %s1836_s29 = scalar_lea.vmem %s48_s27, 32 }
  0x4f   :  { %p1833_p7 = scmp.ne.s32.totalorder %s48_s27, %s1832_s0  ;;  %p1837_p8 = scmp.lt.s32.totalorder %s48_s27, %s48_s27 }
  0x50   :  { %p1838_p9 = scmp.lt.s32.totalorder %s1836_s29, %s1832_s0 }
  0x52   :  { %p1839_p10 = por %p1838_p9, %p1837_p8 }
  0x54   :  { %p1840_p11 = pnand %p1839_p10, %p1833_p7 }
  0x56   :  { %1843 = shalt.err (!%p1840_p11)
}
  0x57   :  { %50 = dma.hbm_to_vmem [thread:$0]  %s2245_s2, 16, %s48_s27, [#allocation6]  }
  0x58   :  { %s1844_s18 = scalar_lea.hbm %s2247_s4, 16 }
  0x59   :  { %p1845_p12 = scmp.ne.s32.totalorder %s2247_s4, %s1844_s18  ;;  %p1848_p13 = scmp.lt.u32.totalorder %s1844_s18, %s2247_s4 }
  0x5b   :  { %p1850_p0 = pnand %p1848_p13, %p1845_p12 }
  0x5d   :  { %1853 = shalt.err (!%p1850_p0)
}
  0x5e   :  { %s1854_s23 = scalar_lea.vmem %s70_s30, 16  ;;  %s1858_s24 = scalar_lea.vmem %s70_s30, 32 }
  0x5f   :  { %p1855_p1 = scmp.ne.s32.totalorder %s70_s30, %s1854_s23  ;;  %p1859_p2 = scmp.lt.s32.totalorder %s70_s30, %s70_s30 }
  0x60   :  { %p1860_p3 = scmp.lt.s32.totalorder %s1858_s24, %s1854_s23 }
  0x62   :  { %p1861_p4 = por %p1860_p3, %p1859_p2 }
  0x64   :  { %p1862_p5 = pnand %p1861_p4, %p1855_p1 }
  0x66   :  { %1865 = shalt.err (!%p1862_p5)
}
  0x67   :  { %72 = dma.hbm_to_vmem [thread:$0]  %s2247_s4, 16, %s70_s30, [#allocation9]  }
  0x68   :  { %s1930_s5 = smov [#allocation13]   ;;  %s1866_s28 = scalar_lea.hbm %s2249_s6, 32 }
  0x69   :  { %s91_s25 = sshll.u32 %s1930_s5, 4  ;;  %p1867_p6 = scmp.ne.s32.totalorder %s2249_s6, %s1866_s28  ;;  %s92_s25 = int_to_ptr.vmem [resolvable:$true] %s91_s25 }
  0x6a   :  { %p1870_p7 = scmp.lt.u32.totalorder %s1866_s28, %s2249_s6 }
  0x6c   :  { %p1872_p8 = pnand %p1870_p7, %p1867_p6 }
  0x6e   :  { %1875 = shalt.err (!%p1872_p8)
}
  0x6f   :  { %s1876_s14 = scalar_lea.vmem %s92_s25, 32  ;;  %p1881_p10 = scmp.lt.s32.totalorder %s92_s25, %s92_s25 }
  0x70   :  { %p1877_p9 = scmp.ne.s32.totalorder %s92_s25, %s1876_s14  ;;  %p1882_p11 = scmp.lt.s32.totalorder %s1876_s14, %s1876_s14 }
  0x72   :  { %p1883_p12 = por %p1882_p11, %p1881_p10 }
  0x74   :  { %p1884_p13 = pnand %p1883_p12, %p1877_p9 }
  0x76   :  { %1887 = shalt.err (!%p1884_p13)
}
  0x77   :  { %94 = dma.hbm_to_vmem [thread:$0]  %s2249_s6, 32, %s92_s25, [#allocation12]  }
  0x78   :  { %1910 = dma.done.wait [#allocation3], 2048  }
  0x79   :  { %1911 = vsyncadd [#allocation3], 4294965248 }
  0x7a   :  { %1912 = dma.done.wait [#allocation6], 2064  }
  0x7b   :  { %1913 = vsyncadd [#allocation6], 4294965232 }
  0x7c   :  { %1914 = dma.done.wait [#allocation9], 1040  }
  0x7d   :  { %1915 = vsyncadd [#allocation9], 4294966256 }
  0x7e   :  { %1916 = dma.done.wait [#allocation12], 2080  }
  0x7f   :  { %1917 = vsyncadd [#allocation12], 4294965216  ;;  %v1662_v0 = vld [vmem:[#allocation5 + $0x40] sm:$0xff]   ;;  %v1664_v2 = vld [vmem:[#allocation5 + $0x48] sm:$0xff]   ;;  %vm205_vm0 = vcmask 39936   ;;  %s1933_s6 = smov [#allocation14]  }
  0x80   :  { %v1663_v1 = vld [vmem:[#allocation5] sm:$0xff]   ;;  %1518 = vmatprep.subr.bf16.mxu0 %v1662_v0  ;;  %v1665_v3 = vld [vmem:[#allocation5 + $0x8] sm:$0xff]   ;;  %v1666_v4 = vld [vmem:[#allocation5 + $0x50] sm:$0xff]   ;;  %s1437_s15 = sshll.u32 %s1933_s6, 4  ;;  %s1438_s15 = int_to_ptr.vmem [resolvable:$true] %s1437_s15 }
  0x81   :  { %1519 = vmatpush3.bf16.msra.mxu0 %v1663_v1  ;;  %v1667_v5 = vld [vmem:[#allocation5 + $0x10] sm:$0xff]   ;;  %v1668_v6 = vld [vmem:[#allocation5 + $0x58] sm:$0xff]   ;;  %v1670_v8 = vld [vmem:[#allocation5 + $0x60] sm:$0xff]   ;;  %s1888_s3 = scalar_lea.vmem %s1438_s15, 512  ;;  %p1893_p1 = scmp.lt.s32.totalorder %s1438_s15, %s1438_s15 }
  0x82   :  { %1520 = vmatprep.subr.bf16.mxu0 %v1664_v2  ;;  %v1669_v7 = vld [vmem:[#allocation5 + $0x18] sm:$0xff]   ;;  %v1671_v9 = vld [vmem:[#allocation5 + $0x20] sm:$0xff]   ;;  %v1672_v10 = vld [vmem:[#allocation5 + $0x68] sm:$0xff]   ;;  %p1889_p0 = scmp.ne.s32.totalorder %s1438_s15, %s1888_s3  ;;  %p1894_p2 = scmp.lt.s32.totalorder %s1888_s3, %s1888_s3 }
  0x83   :  { %v1680_v11 = vld [vmem:[#allocation2 + $0x4] ss:$8 sps:$4 sm:$0xff]   ;;  %v1674_v13 = vld [vmem:[#allocation5 + $0x70] sm:$0xff]   ;;  %v1676_v15 = vld [vmem:[#allocation5 + $0x78] sm:$0xff]  }
  0x84   :  { %v1673_v12 = vld [vmem:[#allocation5 + $0x28] sm:$0xff]   ;;  %1485 = vmatprep.mubr.msk.bf16.mxu0 %vm205_vm0, %v1680_v11  ;;  %v1675_v14 = vld [vmem:[#allocation5 + $0x30] sm:$0xff]   ;;  %v1677_v16 = vld [vmem:[#allocation5 + $0x38] sm:$0xff]   ;;  %p1895_p3 = por %p1894_p2, %p1893_p1 }
  0x85   :  { %1521 = vmatpush3.bf16.msra.mxu0 %v1665_v3  ;;  %v1702_v17 = vld [vmem:[#allocation8] sm:$0xff]   ;;  %v1703_v19 = vld [vmem:[#allocation8 + $0x8] sm:$0xff]   ;;  %v1681_v20 = vld [vmem:[#allocation2 + $0x14] ss:$8 sps:$4 sm:$0xff]  }
  0x86   :  { %1522 = vmatprep.subr.bf16.mxu0 %v1666_v4  ;;  %v1678_v18 = vld [vmem:[#allocation2] ss:$8 sps:$4 sm:$0xff]   ;;  %1598 = vmatprep.subr.bf16.mxu1 %v1702_v17  ;;  %v1704_v21 = vld [vmem:[#allocation8 + $0x10] sm:$0xff]   ;;  %v1684_v23 = vld [vmem:[#allocation2 + $0x24] ss:$8 sps:$4 sm:$0xff]   ;;  %p1896_p4 = pnand %p1895_p3, %p1889_p0 }
  0x87   :  { %1599 = vmatpush3.bf16.msra.mxu1 %v1702_v17  ;;  %v1683_v22 = vld [vmem:[#allocation2 + $0x10] ss:$8 sps:$4 sm:$0xff]   ;;  %v1686_v24 = vld [vmem:[#allocation2 + $0x20] ss:$8 sps:$4 sm:$0xff]   ;;  %v1687_v25 = vld [vmem:[#allocation2 + $0x34] ss:$8 sps:$4 sm:$0xff]  }
  0x88   :  { %1600 = vmatprep.subr.bf16.mxu1 %v1703_v19  ;;  %v1689_v26 = vld [vmem:[#allocation2 + $0x30] ss:$8 sps:$4 sm:$0xff]   ;;  %v1690_v27 = vld [vmem:[#allocation2 + $0x44] ss:$8 sps:$4 sm:$0xff]   ;;  %v1692_v28 = vld [vmem:[#allocation2 + $0x40] ss:$8 sps:$4 sm:$0xff]  }
  0x89   :  { %1523 = vmatpush3.bf16.msra.mxu0 %v1667_v5  ;;  %v1693_v29 = vld [vmem:[#allocation2 + $0x54] ss:$8 sps:$4 sm:$0xff]   ;;  %v1695_v30 = vld [vmem:[#allocation2 + $0x50] ss:$8 sps:$4 sm:$0xff]   ;;  %v1696_v31 = vld [vmem:[#allocation2 + $0x64] ss:$8 sps:$4 sm:$0xff]  }
  0x8a   :  { %1524 = vmatprep.subr.bf16.mxu0 %v1668_v6  ;;  %v1698_v32 = vld [vmem:[#allocation2 + $0x60] ss:$8 sps:$4 sm:$0xff]   ;;  %v1699_v33 = vld [vmem:[#allocation2 + $0x74] ss:$8 sps:$4 sm:$0xff]   ;;  %v1701_v34 = vld [vmem:[#allocation2 + $0x70] ss:$8 sps:$4 sm:$0xff]  }
  0x8b   :  { %1601 = vmatpush3.bf16.msra.mxu1 %v1703_v19  ;;  %v1705_v35 = vld [vmem:[#allocation8 + $0x18] sm:$0xff]   ;;  %v1706_v36 = vld [vmem:[#allocation8 + $0x20] sm:$0xff]   ;;  %v1707_v37 = vld [vmem:[#allocation8 + $0x28] sm:$0xff]  }
  0x8c   :  { %1602 = vmatprep.subr.bf16.mxu1 %v1704_v21  ;;  %v1708_v38 = vld [vmem:[#allocation8 + $0x30] sm:$0xff]   ;;  %v1709_v39 = vld [vmem:[#allocation8 + $0x38] sm:$0xff]   ;;  %v1710_v40 = vld [vmem:[#allocation11] ss:$8 sps:$4 sm:$0xff]  }
  0x8d   :  { %1525 = vmatpush3.bf16.msra.mxu0 %v1669_v7  ;;  %v1712_v41 = vld [vmem:[#allocation11 + $0x4] ss:$8 sps:$4 sm:$0xff]   ;;  %v1715_v42 = vld [vmem:[#allocation11 + $0x14] ss:$8 sps:$4 sm:$0xff]   ;;  %v1713_v43 = vld [vmem:[#allocation11 + $0x10] ss:$8 sps:$4 sm:$0xff]  }
  0x8e   :  { %1526 = vmatprep.subr.bf16.mxu0 %v1670_v8  ;;  %v1718_v44 = vld [vmem:[#allocation11 + $0x24] ss:$8 sps:$4 sm:$0xff]   ;;  %v1716_v45 = vld [vmem:[#allocation11 + $0x20] ss:$8 sps:$4 sm:$0xff]   ;;  %v2075_v46 = vld [vmem:[#allocation11 + $0x34] ss:$8 sps:$4 sm:$0xff]  }
  0x8f   :  { %1603 = vmatpush3.bf16.msra.mxu1 %v1704_v21  ;;  %v2077_v47 = vld [vmem:[#allocation11 + $0x30] ss:$8 sps:$4 sm:$0xff]   ;;  %v2080_v48 = vld [vmem:[#allocation11 + $0x44] ss:$8 sps:$4 sm:$0xff]   ;;  %v2083_v49 = vld [vmem:[#allocation11 + $0x40] ss:$8 sps:$4 sm:$0xff]  }
  0x90   :  { %1604 = vmatprep.subr.bf16.mxu1 %v1705_v35  ;;  %v2086_v50 = vld [vmem:[#allocation11 + $0x54] ss:$8 sps:$4 sm:$0xff]   ;;  %v2089_v51 = vld [vmem:[#allocation11 + $0x50] ss:$8 sps:$4 sm:$0xff]  }
  0x91   :  { %1527 = vmatpush3.bf16.msra.mxu0 %v1671_v9  ;;  %v2093_v54 = vld [vmem:[#allocation7] ss:$0 sm:$0xff] }
  0x92   :  { %1528 = vmatprep.subr.bf16.mxu0 %v1672_v10 }
  0x93   :  { %1605 = vmatpush3.bf16.msra.mxu1 %v1705_v35 }
  0x94   :  { %1606 = vmatprep.subr.bf16.mxu1 %v1706_v36 }
  0x95   :  { %1529 = vmatpush3.bf16.msra.mxu0 %v1673_v12 }
  0x96   :  { %1530 = vmatprep.subr.bf16.mxu0 %v1674_v13 }
  0x97   :  { %1607 = vmatpush3.bf16.msra.mxu1 %v1706_v36 }
  0x98   :  { %1608 = vmatprep.subr.bf16.mxu1 %v1707_v37 }
  0x99   :  { %1531 = vmatpush3.bf16.msra.mxu0 %v1675_v14 }
  0x9a   :  { %1532 = vmatprep.subr.bf16.mxu0 %v1676_v15 }
  0x9b   :  { %1609 = vmatpush3.bf16.msra.mxu1 %v1707_v37 }
  0x9c   :  { %1610 = vmatprep.subr.bf16.mxu1 %v1708_v38 }
  0x9d   :  { %1533 = vmatpush3.bf16.msra.mxu0 %v1677_v16 }
  0x9e   :  { %787 = vmatprep.subr.bf16.mxu0 %v1712_v41 }
  0x9f   :  { %1611 = vmatpush3.bf16.msra.mxu1 %v1708_v38 }
  0xa0   :  { %399 = vmatmul.mubr.bf16.vlgmr.msra.gmra.mrb[0].mxu0 %v1678_v18  ;;  %1612 = vmatprep.subr.bf16.mxu1 %v1709_v39 }
  0xa1   :  { %1486 = vmatprep.mubr.msk.bf16.mxu0 %vm205_vm0, %v1681_v20  ;;  %788 = vmatpush1.bf16.msra.mxu0 %v1710_v40 }
  0xa2   :  { %789 = vmatprep.subr.bf16.mxu0 %v1715_v42 }
  0xa3   :  { %1613 = vmatpush3.bf16.msra.mxu1 %v1709_v39 }
  0xa4   :  { %1630 = vmatprep.subr.bf16.mxu1 %v1712_v41 }
  0xa5   :  { %790 = vmatpush1.bf16.msra.mxu0 %v1713_v43 }
  0xa6   :  { %791 = vmatprep.subr.bf16.mxu0 %v1718_v44 }
  0xa8   :  { %407 = vmatmul.mubr.bf16.gmra.mrb[4].mxu0 %v1683_v22 }
  0xa9   :  { %1487 = vmatprep.mubr.msk.bf16.mxu0 %vm205_vm0, %v1684_v23  ;;  %792 = vmatpush1.bf16.msra.mxu0 %v1716_v45 }
  0xaa   :  { %793 = vmatprep.subr.bf16.mxu0 %v2075_v46 }
  0xad   :  { %794 = vmatpush1.bf16.msra.mxu0 %v2077_v47 }
  0xae   :  { %795 = vmatprep.subr.bf16.mxu0 %v2080_v48 }
  0xb0   :  { %415 = vmatmul.mubr.bf16.gmra.mrb[8].mxu0 %v1686_v24 }
  0xb1   :  { %1488 = vmatprep.mubr.msk.bf16.mxu0 %vm205_vm0, %v1687_v25  ;;  %796 = vmatpush1.bf16.msra.mxu0 %v2083_v49 }
  0xb2   :  { %797 = vmatprep.subr.bf16.mxu0 %v2086_v50 }
  0xb5   :  { %798 = vmatpush1.bf16.msra.mxu0 %v2089_v51 }
  0xb8   :  { %423 = vmatmul.mubr.bf16.gmra.mrb[12].mxu0 %v1689_v26 }
  0xb9   :  { %1489 = vmatprep.mubr.msk.bf16.mxu0 %vm205_vm0, %v1690_v27 }
  0xc0   :  { %431 = vmatmul.mubr.bf16.gmra.mrb[16].mxu0 %v1692_v28 }
  0xc1   :  { %1490 = vmatprep.mubr.msk.bf16.mxu0 %vm205_vm0, %v1693_v29 }
  0xc8   :  { %439 = vmatmul.mubr.bf16.gmra.mrb[20].mxu0 %v1695_v30 }
  0xc9   :  { %1491 = vmatprep.mubr.msk.bf16.mxu0 %vm205_vm0, %v1696_v31 }
  0xd0   :  { %447 = vmatmul.mubr.bf16.gmra.mrb[24].mxu0 %v1698_v32 }
  0xd1   :  { %1492 = vmatprep.mubr.msk.bf16.mxu0 %vm205_vm0, %v1699_v33 }
  0xd8   :  { %455 = vmatmul.mubr.bf16.gmra.mrb[28].mxu0 %v1701_v34 }
 0x173   :  { %v1534_v52 = vpop.f32.mrb[0].mxu0 }
 0x174   :  { %v1535_v53 = vpop.f32.mrb[1].mxu0 }
 0x175   :  { %v1536_v55 = vadd.f32 %v1535_v53, %v1534_v52  ;;  %v1537_v56 = vpop.f32.mrb[2].mxu0 }
 0x176   :  { %v1538_v57 = vpop.f32.mrb[3].mxu0 }
 0x177   :  { %v1539_v58 = vadd.f32 %v1538_v57, %v1537_v56  ;;  %v401_v59 = vadd.f32 %v1536_v55, %v2093_v54 }
 0x179   :  { %v404_v60 = vadd.f32 %v1539_v58, %v2093_v54  ;;  %v463_v62 = vmax.f32 %v401_v59, 0.0 }
 0x17b   :  { %v1540_v61 = vpop.f32.mrb[4].mxu0  ;;  %v464_v63 = vmax.f32 %v404_v60, 0.0 }
 0x17c   :  { %v1541_v0 = vpop.f32.mrb[5].mxu0 }
 0x17d   :  { %v1542_v1 = vadd.f32 %v1541_v0, %v1540_v61  ;;  %v1543_v2 = vpop.f32.mrb[6].mxu0  ;;  %v479_v3 = vpack.c.bf16 %v464_v63, %v463_v62 }
 0x17e   :  { %v1544_v4 = vpop.f32.mrb[7].mxu0 }
 0x17f   :  { %v409_v5 = vadd.f32 %v1542_v1, %v2093_v54  ;;  %v1545_v6 = vadd.f32 %v1544_v4, %v1543_v2  ;;  %1614 = vmatprep.mubr.bf16.mxu1 %v479_v3 }
 0x181   :  { %v412_v7 = vadd.f32 %v1545_v6, %v2093_v54  ;;  %v465_v8 = vmax.f32 %v409_v5, 0.0 }
 0x183   :  { %v466_v9 = vmax.f32 %v412_v7, 0.0  ;;  %v1546_v10 = vpop.f32.mrb[8].mxu0 }
 0x184   :  { %v1547_v11 = vpop.f32.mrb[9].mxu0 }
 0x185   :  { %v1548_v12 = vadd.f32 %v1547_v11, %v1546_v10  ;;  %v1549_v13 = vpop.f32.mrb[10].mxu0  ;;  %v480_v14 = vpack.c.bf16 %v466_v9, %v465_v8 }
 0x186   :  { %v1550_v15 = vpop.f32.mrb[11].mxu0 }
 0x187   :  { %v417_v16 = vadd.f32 %v1548_v12, %v2093_v54  ;;  %v1551_v17 = vadd.f32 %v1550_v15, %v1549_v13  ;;  %1615 = vmatmul.mubr.bf16.vlgmr.msra.gmra.mrb[0].mxu1 %v480_v14  ;;  %v1730_v14 = vld [vmem:[#allocation11 + $0x64] ss:$8 sps:$4 sm:$0xff]   ;;  %v1728_v15 = vld [vmem:[#allocation11 + $0x60] ss:$8 sps:$4 sm:$0xff]  }
 0x188   :  { %1638 = vmatpush1.bf16.msra.mxu1 %v1710_v40  ;;  %799 = vmatprep.subr.bf16.mxu0 %v1730_v14 }
 0x189   :  { %v420_v18 = vadd.f32 %v1551_v17, %v2093_v54  ;;  %1631 = vmatprep.subr.bf16.mxu1 %v1715_v42  ;;  %v467_v19 = vmax.f32 %v417_v16, 0.0  ;;  %800 = vmatpush1.bf16.msra.mxu0 %v1728_v15  ;;  %v1733_v16 = vld [vmem:[#allocation11 + $0x74] ss:$8 sps:$4 sm:$0xff]   ;;  %v1731_v17 = vld [vmem:[#allocation11 + $0x70] ss:$8 sps:$4 sm:$0xff]  }
 0x18a   :  { %801 = vmatprep.subr.bf16.mxu0 %v1733_v16 }
 0x18b   :  { %v468_v20 = vmax.f32 %v420_v18, 0.0  ;;  %v1552_v21 = vpop.f32.mrb[12].mxu0  ;;  %v1931_v18 = vmov 0  }
 0x18c   :  { %v1553_v22 = vpop.f32.mrb[13].mxu0  ;;  %1639 = vmatpush1.bf16.msra.mxu1 %v1713_v43  ;;  %819 = vmatprep.mubr.bf16.mxu0 %v1931_v18 }
 0x18d   :  { %v1554_v23 = vadd.f32 %v1553_v22, %v1552_v21  ;;  %v1555_v24 = vpop.f32.mrb[14].mxu0  ;;  %v481_v25 = vpack.c.bf16 %v468_v20, %v467_v19  ;;  %1632 = vmatprep.subr.bf16.mxu1 %v1718_v44  ;;  %802 = vmatpush1.bf16.msra.mxu0 %v1731_v17 }
 0x18e   :  { %v1556_v26 = vpop.f32.mrb[15].mxu0 }
 0x18f   :  { %v425_v27 = vadd.f32 %v1554_v23, %v2093_v54  ;;  %v1557_v28 = vadd.f32 %v1556_v26, %v1555_v24  ;;  %1618 = vmatprep.mubr.bf16.mxu1 %v481_v25 }
 0x190   :  { %1640 = vmatpush1.bf16.msra.mxu1 %v1716_v45 }
 0x191   :  { %v428_v29 = vadd.f32 %v1557_v28, %v2093_v54  ;;  %1633 = vmatprep.subr.bf16.mxu1 %v2075_v46  ;;  %v469_v30 = vmax.f32 %v425_v27, 0.0 }
 0x193   :  { %v470_v31 = vmax.f32 %v428_v29, 0.0  ;;  %v1558_v32 = vpop.f32.mrb[16].mxu0 }
 0x194   :  { %v1559_v33 = vpop.f32.mrb[17].mxu0  ;;  %1641 = vmatpush1.bf16.msra.mxu1 %v2077_v47 }
 0x195   :  { %v1560_v34 = vadd.f32 %v1559_v33, %v1558_v32  ;;  %v1561_v35 = vpop.f32.mrb[18].mxu0  ;;  %v482_v36 = vpack.c.bf16 %v470_v31, %v469_v30  ;;  %1634 = vmatprep.subr.bf16.mxu1 %v2080_v48 }
 0x196   :  { %v1562_v37 = vpop.f32.mrb[19].mxu0 }
 0x197   :  { %v433_v38 = vadd.f32 %v1560_v34, %v2093_v54  ;;  %v1563_v39 = vadd.f32 %v1562_v37, %v1561_v35  ;;  %1619 = vmatmul.mubr.bf16.gmra.mrb[4].mxu1 %v482_v36 }
 0x198   :  { %1642 = vmatpush1.bf16.msra.mxu1 %v2083_v49 }
 0x199   :  { %v436_v40 = vadd.f32 %v1563_v39, %v2093_v54  ;;  %1635 = vmatprep.subr.bf16.mxu1 %v2086_v50  ;;  %v471_v41 = vmax.f32 %v433_v38, 0.0 }
 0x19b   :  { %v472_v42 = vmax.f32 %v436_v40, 0.0  ;;  %v1564_v43 = vpop.f32.mrb[20].mxu0 }
 0x19c   :  { %v1565_v44 = vpop.f32.mrb[21].mxu0  ;;  %1643 = vmatpush1.bf16.msra.mxu1 %v2089_v51 }
 0x19d   :  { %v1566_v45 = vadd.f32 %v1565_v44, %v1564_v43  ;;  %v1567_v46 = vpop.f32.mrb[22].mxu0  ;;  %v483_v47 = vpack.c.bf16 %v472_v42, %v471_v41  ;;  %1636 = vmatprep.subr.bf16.mxu1 %v1730_v14 }
 0x19e   :  { %v1568_v48 = vpop.f32.mrb[23].mxu0 }
 0x19f   :  { %v441_v52 = vadd.f32 %v1566_v45, %v2093_v54  ;;  %v1569_v53 = vadd.f32 %v1568_v48, %v1567_v46  ;;  %1622 = vmatprep.mubr.bf16.mxu1 %v483_v47 }
 0x1a0   :  { %1644 = vmatpush1.bf16.msra.mxu1 %v1728_v15  ;;  %v695_v15 = vld [vmem:[#allocation13] sm:$0x3] }
 0x1a1   :  { %v444_v49 = vadd.f32 %v1569_v53, %v2093_v54  ;;  %v473_v55 = vmax.f32 %v441_v52, 0.0  ;;  %1637 = vmatprep.subr.bf16.mxu1 %v1733_v16 }
 0x1a3   :  { %v474_v56 = vmax.f32 %v444_v49, 0.0  ;;  %v1570_v57 = vpop.f32.mrb[24].mxu0 }
 0x1a4   :  { %v1571_v50 = vpop.f32.mrb[25].mxu0  ;;  %1645 = vmatpush1.bf16.msra.mxu1 %v1731_v17 }
 0x1a5   :  { %v1572_v58 = vadd.f32 %v1571_v50, %v1570_v57  ;;  %v1573_v59 = vpop.f32.mrb[26].mxu0  ;;  %v484_v60 = vpack.c.bf16 %v474_v56, %v473_v55 }
 0x1a6   :  { %v1574_v61 = vpop.f32.mrb[27].mxu0 }
 0x1a7   :  { %v449_v51 = vadd.f32 %v1572_v58, %v2093_v54  ;;  %v1575_v62 = vadd.f32 %v1574_v61, %v1573_v59  ;;  %1623 = vmatmul.mubr.bf16.gmra.mrb[8].mxu1 %v484_v60 }
 0x1a9   :  { %v452_v63 = vadd.f32 %v1575_v62, %v2093_v54  ;;  %v475_v0 = vmax.f32 %v449_v51, 0.0 }
 0x1ab   :  { %v476_v1 = vmax.f32 %v452_v63, 0.0  ;;  %v1576_v2 = vpop.f32.mrb[28].mxu0 }
 0x1ac   :  { %v1577_v3 = vpop.f32.mrb[29].mxu0 }
 0x1ad   :  { %v1578_v4 = vadd.f32 %v1577_v3, %v1576_v2  ;;  %v1579_v5 = vpop.f32.mrb[30].mxu0  ;;  %v485_v6 = vpack.c.bf16 %v476_v1, %v475_v0 }
 0x1ae   :  { %v1580_v7 = vpop.f32.mrb[31].mxu0 }
 0x1af   :  { %v457_v8 = vadd.f32 %v1578_v4, %v2093_v54  ;;  %v1581_v9 = vadd.f32 %v1580_v7, %v1579_v5  ;;  %1626 = vmatprep.mubr.bf16.mxu1 %v485_v6 }
 0x1b1   :  { %v460_v10 = vadd.f32 %v1581_v9, %v2093_v54  ;;  %v477_v11 = vmax.f32 %v457_v8, 0.0  ;;  %v1493_v54 = vld [vmem:[#allocation10] ss:$0 sm:$0xff] }
 0x1b3   :  { %v478_v12 = vmax.f32 %v460_v10, 0.0 }
 0x1b5   :  { %v486_v13 = vpack.c.bf16 %v478_v12, %v477_v11  ;;  %v697_v12 = vlaneseq }
 0x1b7   :  { %1627 = vmatmul.mubr.bf16.gmra.mrb[12].mxu1 %v486_v13  ;;  %v698_v13 = vshrl.u32 %v697_v12, 7  ;;  %vm2139_vm1 = vcmp.lt.s32.totalorder %v697_v12, 256 }
 0x1b8   :  { %839 = vmatprep.mubr.bf16.mxu1 %v1931_v18 }
 0x1b9   :  { %v699_v14 = vsub.s32 0, %v698_v13  ;;  %v703_v16 = vsub.s32 1, %v698_v13 }
 0x1bb   :  { %v2125_v17 = vrot.slane %v695_v15, %v699_v14 }
 0x25a   :  { %v1616_v19 = vpop.f32.mrb[0].mxu1 }
 0x25b   :  { %v601_v20 = vadd.f32 %v1616_v19, %v1493_v54  ;;  %v592_v21 = vpop.f32.mrb[1].mxu1  ;;  %v2127_v19 = vrot.slane %v695_v15, %v703_v16 }
 0x25c   :  { %v593_v22 = vadd.f32 %v1493_v54, %v592_v21  ;;  %v1617_v23 = vpop.f32.mrb[2].mxu1 }
 0x25d   :  { %v604_v24 = vadd.f32 %v1617_v23, %v1493_v54  ;;  %v595_v25 = vpop.f32.mrb[3].mxu1  ;;  %v657_v27 = vmax.f32 %v601_v20, 0.0  ;;  %v1932_v23 = vmov 1966171168  }
 0x25e   :  { %v596_v26 = vadd.f32 %v1493_v54, %v595_v25  ;;  %v655_v29 = vmax.f32 %v593_v22, 0.0 }
 0x25f   :  { %v658_v28 = vmax.f32 %v604_v24, 0.0  ;;  %v1158_v24 = vunpack.c.l.s4 %v1932_v23 }
 0x260   :  { %v656_v30 = vmax.f32 %v596_v26, 0.0 }
 0x261   :  { %v672_v31 = vpack.c.bf16 %v658_v28, %v657_v27 }
 0x262   :  { %v671_v32 = vpack.c.bf16 %v656_v30, %v655_v29 }
 0x264   :  { %820 = vmatmul.mubr.bf16.vlgmr.msra.gmra.mrb[32].mxu0 %v671_v32 }
 0x265   :  { %829 = vmatprep.mubr.bf16.mxu0 %v1931_v18 }
 0x26a   :  { %v1620_v33 = vpop.f32.mrb[4].mxu1 }
 0x26b   :  { %v617_v34 = vadd.f32 %v1620_v33, %v1493_v54  ;;  %v608_v35 = vpop.f32.mrb[5].mxu1  ;;  %v1159_v33 = vunpack.c.0.s8 %v1158_v24 }
 0x26c   :  { %v609_v36 = vadd.f32 %v1493_v54, %v608_v35  ;;  %v1621_v37 = vpop.f32.mrb[6].mxu1  ;;  %830 = vmatmul.mubr.bf16.gmra.mrb[36].mxu0 %v672_v31 }
 0x26d   :  { %v620_v38 = vadd.f32 %v1621_v37, %v1493_v54  ;;  %v611_v39 = vpop.f32.mrb[7].mxu1  ;;  %v661_v41 = vmax.f32 %v617_v34, 0.0 }
 0x26e   :  { %v612_v40 = vadd.f32 %v1493_v54, %v611_v39  ;;  %v659_v43 = vmax.f32 %v609_v36, 0.0 }
 0x26f   :  { %v662_v42 = vmax.f32 %v620_v38, 0.0 }
 0x270   :  { %v660_v44 = vmax.f32 %v612_v40, 0.0 }
 0x271   :  { %v674_v45 = vpack.c.bf16 %v662_v42, %v661_v41 }
 0x272   :  { %v673_v46 = vpack.c.bf16 %v660_v44, %v659_v43 }
 0x274   :  { %840 = vmatmul.mubr.bf16.vlgmr.msra.gmra.mrb[16].mxu1 %v673_v46 }
 0x275   :  { %849 = vmatprep.mubr.bf16.mxu1 %v1931_v18 }
 0x27a   :  { %v1624_v47 = vpop.f32.mrb[8].mxu1 }
 0x27b   :  { %v633_v48 = vadd.f32 %v1624_v47, %v1493_v54  ;;  %v624_v52 = vpop.f32.mrb[9].mxu1 }
 0x27c   :  { %v625_v53 = vadd.f32 %v1493_v54, %v624_v52  ;;  %v1625_v49 = vpop.f32.mrb[10].mxu1  ;;  %850 = vmatmul.mubr.bf16.gmra.mrb[20].mxu1 %v674_v45  ;;  %v2134_v45 = vsub.s32 %v1159_v33, %v698_v13 }
 0x27d   :  { %v636_v55 = vadd.f32 %v1625_v49, %v1493_v54  ;;  %v627_v56 = vpop.f32.mrb[11].mxu1  ;;  %859 = vmatprep.mubr.bf16.mxu1 %v1931_v18  ;;  %v665_v50 = vmax.f32 %v633_v48, 0.0 }
 0x27e   :  { %v628_v57 = vadd.f32 %v1493_v54, %v627_v56  ;;  %v663_v59 = vmax.f32 %v625_v53, 0.0 }
 0x27f   :  { %v666_v58 = vmax.f32 %v636_v55, 0.0 }
 0x280   :  { %v664_v60 = vmax.f32 %v628_v57, 0.0 }
 0x281   :  { %v676_v61 = vpack.c.bf16 %v666_v58, %v665_v50 }
 0x282   :  { %v675_v51 = vpack.c.bf16 %v664_v60, %v663_v59 }
 0x284   :  { %860 = vmatmul.mubr.bf16.gmra.mrb[24].mxu1 %v675_v51 }
 0x285   :  { %869 = vmatprep.mubr.bf16.mxu1 %v1931_v18 }
 0x28a   :  { %v1628_v62 = vpop.f32.mrb[12].mxu1 }
 0x28b   :  { %v649_v63 = vadd.f32 %v1628_v62, %v1493_v54  ;;  %v640_v0 = vpop.f32.mrb[13].mxu1 }
 0x28c   :  { %v641_v1 = vadd.f32 %v1493_v54, %v640_v0  ;;  %v1629_v2 = vpop.f32.mrb[14].mxu1  ;;  %870 = vmatmul.mubr.bf16.gmra.mrb[28].mxu1 %v676_v61 }
 0x28d   :  { %v652_v3 = vadd.f32 %v1629_v2, %v1493_v54  ;;  %v643_v4 = vpop.f32.mrb[15].mxu1  ;;  %879 = vmatprep.mubr.bf16.mxu1 %v1931_v18  ;;  %v669_v6 = vmax.f32 %v649_v63, 0.0 }
 0x28e   :  { %v644_v5 = vadd.f32 %v1493_v54, %v643_v4  ;;  %v667_v8 = vmax.f32 %v641_v1, 0.0 }
 0x28f   :  { %v670_v7 = vmax.f32 %v652_v3, 0.0 }
 0x290   :  { %v668_v9 = vmax.f32 %v644_v5, 0.0 }
 0x291   :  { %v678_v10 = vpack.c.bf16 %v670_v7, %v669_v6 }
 0x292   :  { %v677_v11 = vpack.c.bf16 %v668_v9, %v667_v8 }
 0x294   :  { %880 = vmatmul.mubr.bf16.gmra.mrb[32].mxu1 %v677_v11 }
 0x295   :  { %889 = vmatprep.mubr.bf16.mxu1 %v1931_v18 }
 0x29c   :  { %890 = vmatmul.mubr.bf16.gmra.mrb[36].mxu1 %v678_v10 }
 0x337   :  { %v821_v54 = vpop.f32.mrb[32].mxu0 }
 0x338   :  { %v822_v20 = vadd.f32 %v821_v54, %v2125_v17  ;;  %v823_v21 = vpop.f32.mrb[33].mxu0 }
 0x339   :  { %v824_v22 = vadd.f32 %v823_v21, %v2127_v19  ;;  %v825_v25 = vpop.f32.mrb[34].mxu0 }
 0x33a   :  { %v900_v18 = vmax.f32 %v822_v20, 0.0  ;;  %v826_v26 = vadd.f32 %v825_v25, %v2125_v17  ;;  %v827_v27 = vpop.f32.mrb[35].mxu0 }
 0x33b   :  { %v901_v28 = vmax.f32 %v824_v22, 0.0  ;;  %v828_v29 = vadd.f32 %v827_v27, %v2127_v19 }
 0x33c   :  { %v932_v30 = vrot.slane %v900_v18, 4  ;;  %v902_v31 = vmax.f32 %v826_v26, 0.0 }
 0x33d   :  { %v938_v32 = vrot.slane %v901_v28, 4  ;;  %v903_v34 = vmax.f32 %v828_v29, 0.0 }
 0x33e   :  { %v933_v35 = vmax.f32 %v900_v18, %v932_v30  ;;  %v944_v36 = vrot.slane %v902_v31, 4 }
 0x33f   :  { %v939_v37 = vmax.f32 %v901_v28, %v938_v32  ;;  %v950_v38 = vrot.slane %v903_v34, 4  ;;  %v831_v39 = vpop.f32.mrb[36].mxu0 }
 0x340   :  { %v934_v40 = vrot.slane %v933_v35, 2  ;;  %v945_v41 = vmax.f32 %v902_v31, %v944_v36  ;;  %v832_v42 = vadd.f32 %v831_v39, %v2125_v17  ;;  %v833_v43 = vpop.f32.mrb[37].mxu0 }
 0x341   :  { %v940_v44 = vrot.slane %v939_v37, 2  ;;  %v951_v46 = vmax.f32 %v903_v34, %v950_v38  ;;  %v834_v47 = vadd.f32 %v833_v43, %v2127_v19  ;;  %v835_v48 = vpop.f32.mrb[38].mxu0 }
 0x342   :  { %v935_v52 = vmax.f32 %v933_v35, %v934_v40  ;;  %v946_v53 = vrot.slane %v945_v41, 2  ;;  %v904_v49 = vmax.f32 %v832_v42, 0.0  ;;  %v836_v55 = vadd.f32 %v835_v48, %v2125_v17  ;;  %v837_v56 = vpop.f32.mrb[39].mxu0 }
 0x343   :  { %v941_v57 = vmax.f32 %v939_v37, %v940_v44  ;;  %v952_v50 = vrot.slane %v951_v46, 2  ;;  %v905_v58 = vmax.f32 %v834_v47, 0.0  ;;  %v838_v59 = vadd.f32 %v837_v56, %v2127_v19 }
 0x344   :  { %v936_v60 = vrot.slane %v935_v52, 1  ;;  %v947_v51 = vmax.f32 %v945_v41, %v946_v53  ;;  %v956_v62 = vrot.slane %v904_v49, 4  ;;  %v906_v63 = vmax.f32 %v836_v55, 0.0 }
 0x345   :  { %v942_v0 = vrot.slane %v941_v57, 1  ;;  %v953_v1 = vmax.f32 %v951_v46, %v952_v50  ;;  %v962_v2 = vrot.slane %v905_v58, 4  ;;  %v907_v3 = vmax.f32 %v838_v59, 0.0 }
 0x346   :  { %v937_v4 = vmax.f32 %v935_v52, %v936_v60  ;;  %v948_v5 = vrot.slane %v947_v51, 1  ;;  %v957_v6 = vmax.f32 %v904_v49, %v956_v62  ;;  %v968_v7 = vrot.slane %v906_v63, 4 }
 0x347   :  { %v943_v8 = vmax.f32 %v941_v57, %v942_v0  ;;  %v954_v9 = vrot.slane %v953_v1, 1  ;;  %v963_v10 = vmax.f32 %v905_v58, %v962_v2  ;;  %v974_v11 = vrot.slane %v907_v3, 4  ;;  %v841_v13 = vpop.f32.mrb[16].mxu1 }
 0x348   :  { %v949_v12 = vmax.f32 %v947_v51, %v948_v5  ;;  %v958_v14 = vrot.slane %v957_v6, 2  ;;  %v969_v15 = vmax.f32 %v906_v63, %v968_v7  ;;  %v842_v16 = vadd.f32 %v841_v13, %v2125_v17  ;;  %v843_v54 = vpop.f32.mrb[17].mxu1 }
 0x349   :  { %v1156_v20 = vcombine.low %v937_v4, %v943_v8  ;;  %v955_v21 = vmax.f32 %v953_v1, %v954_v9  ;;  %v964_v22 = vrot.slane %v963_v10, 2  ;;  %v975_v23 = vmax.f32 %v907_v3, %v974_v11  ;;  %v845_v24 = vpop.f32.mrb[18].mxu1 }
 0x34a   :  { %v959_v25 = vmax.f32 %v957_v6, %v958_v14  ;;  %v970_v18 = vrot.slane %v969_v15, 2  ;;  %v908_v26 = vmax.f32 %v842_v16, 0.0  ;;  %v844_v27 = vadd.f32 %v843_v54, %v2127_v19  ;;  %v847_v28 = vpop.f32.mrb[19].mxu1 }
 0x34b   :  { %v1163_v29 = vrot.slane %v1156_v20, %v2134_v45  ;;  %v1171_v30 = vcombine.low %v949_v12, %v955_v21  ;;  %v965_v31 = vmax.f32 %v963_v10, %v964_v22  ;;  %v976_v32 = vrot.slane %v975_v23, 2 }
 0x34c   :  { %v960_v33 = vrot.slane %v959_v25, 1  ;;  %v971_v34 = vmax.f32 %v969_v15, %v970_v18  ;;  %v980_v35 = vrot.slane %v908_v26, 4  ;;  %v909_v36 = vmax.f32 %v844_v27, 0.0 }
 0x34d   :  { %v1170_v37 = vrot.slane %v1163_v29, %v2134_v45  ;;  %v1178_v38 = vrot.slane %v1171_v30, %v2134_v45  ;;  %v966_v39 = vrot.slane %v965_v31, 1  ;;  %v977_v40 = vmax.f32 %v975_v23, %v976_v32 }
 0x34e   :  { %v961_v41 = vmax.f32 %v959_v25, %v960_v33  ;;  %v972_v42 = vrot.slane %v971_v34, 1  ;;  %v981_v43 = vmax.f32 %v908_v26, %v980_v35  ;;  %v986_v44 = vrot.slane %v909_v36, 4 }
 0x34f   :  { %1416 = vst.msk [vmem:[#allocation14] sm:$0x3] %vm2139_vm1, %v1170_v37  ;;  %v1185_v46 = vrot.slane %v1178_v38, %v2134_v45  ;;  %v967_v47 = vmax.f32 %v965_v31, %v966_v39  ;;  %v978_v48 = vrot.slane %v977_v40, 1  ;;  %v846_v52 = vadd.f32 %v845_v24, %v2125_v17  ;;  %v851_v53 = vpop.f32.mrb[20].mxu1 }
 0x350   :  { %v973_v49 = vmax.f32 %v971_v34, %v972_v42  ;;  %v982_v55 = vrot.slane %v981_v43, 2  ;;  %v987_v56 = vmax.f32 %v909_v36, %v986_v44  ;;  %v848_v57 = vadd.f32 %v847_v28, %v2127_v19  ;;  %v853_v50 = vpop.f32.mrb[21].mxu1 }
 0x351   :  { %1417 = vst.msk [vmem:[#allocation14 + $0x2] sm:$0x3] %vm2139_vm1, %v1185_v46  ;;  %v1186_v58 = vcombine.low %v961_v41, %v967_v47  ;;  %v979_v59 = vmax.f32 %v977_v40, %v978_v48  ;;  %v910_v60 = vmax.f32 %v846_v52, 0.0  ;;  %v852_v51 = vadd.f32 %v851_v53, %v2125_v17  ;;  %v855_v62 = vpop.f32.mrb[22].mxu1 }
 0x352   :  { %v983_v63 = vmax.f32 %v981_v43, %v982_v55  ;;  %v988_v0 = vrot.slane %v987_v56, 2  ;;  %v911_v1 = vmax.f32 %v848_v57, 0.0  ;;  %v854_v2 = vadd.f32 %v853_v50, %v2127_v19  ;;  %v857_v3 = vpop.f32.mrb[23].mxu1 }
 0x353   :  { %v1193_v4 = vrot.slane %v1186_v58, %v2134_v45  ;;  %v1201_v5 = vcombine.low %v973_v49, %v979_v59  ;;  %v992_v6 = vrot.slane %v910_v60, 4  ;;  %v912_v7 = vmax.f32 %v852_v51, 0.0 }
 0x354   :  { %v984_v8 = vrot.slane %v983_v63, 1  ;;  %v989_v9 = vmax.f32 %v987_v56, %v988_v0  ;;  %v998_v10 = vrot.slane %v911_v1, 4  ;;  %v913_v11 = vmax.f32 %v854_v2, 0.0 }
 0x355   :  { %v1200_v13 = vrot.slane %v1193_v4, %v2134_v45  ;;  %v1208_v12 = vrot.slane %v1201_v5, %v2134_v45  ;;  %v993_v14 = vmax.f32 %v910_v60, %v992_v6  ;;  %v1004_v15 = vrot.slane %v912_v7, 4 }
 0x356   :  { %v985_v16 = vmax.f32 %v983_v63, %v984_v8  ;;  %v990_v54 = vrot.slane %v989_v9, 1  ;;  %v999_v20 = vmax.f32 %v911_v1, %v998_v10  ;;  %v1010_v21 = vrot.slane %v913_v11, 4 }
 0x357   :  { %1418 = vst.msk [vmem:[#allocation14 + $0x4] sm:$0x3] %vm2139_vm1, %v1200_v13  ;;  %v1215_v22 = vrot.slane %v1208_v12, %v2134_v45  ;;  %v994_v23 = vrot.slane %v993_v14, 2  ;;  %v1005_v24 = vmax.f32 %v912_v7, %v1004_v15  ;;  %v856_v25 = vadd.f32 %v855_v62, %v2125_v17  ;;  %v861_v18 = vpop.f32.mrb[24].mxu1 }
 0x358   :  { %v991_v26 = vmax.f32 %v989_v9, %v990_v54  ;;  %v1000_v27 = vrot.slane %v999_v20, 2  ;;  %v1011_v28 = vmax.f32 %v913_v11, %v1010_v21  ;;  %v858_v29 = vadd.f32 %v857_v3, %v2127_v19  ;;  %v863_v30 = vpop.f32.mrb[25].mxu1 }
 0x359   :  { %1419 = vst.msk [vmem:[#allocation14 + $0x6] sm:$0x3] %vm2139_vm1, %v1215_v22  ;;  %v995_v31 = vmax.f32 %v993_v14, %v994_v23  ;;  %v1006_v32 = vrot.slane %v1005_v24, 2  ;;  %v914_v33 = vmax.f32 %v856_v25, 0.0  ;;  %v862_v34 = vadd.f32 %v861_v18, %v2125_v17  ;;  %v865_v35 = vpop.f32.mrb[26].mxu1 }
 0x35a   :  { %v1216_v36 = vcombine.low %v985_v16, %v991_v26  ;;  %v1001_v37 = vmax.f32 %v999_v20, %v1000_v27  ;;  %v1012_v38 = vrot.slane %v1011_v28, 2  ;;  %v915_v39 = vmax.f32 %v858_v29, 0.0  ;;  %v867_v40 = vpop.f32.mrb[27].mxu1 }
 0x35b   :  { %v996_v41 = vrot.slane %v995_v31, 1  ;;  %v1007_v42 = vmax.f32 %v1005_v24, %v1006_v32  ;;  %v1016_v43 = vrot.slane %v914_v33, 4  ;;  %v916_v44 = vmax.f32 %v862_v34, 0.0 }
 0x35c   :  { %v1223_v46 = vrot.slane %v1216_v36, %v2134_v45  ;;  %v1002_v47 = vrot.slane %v1001_v37, 1  ;;  %v1013_v48 = vmax.f32 %v1011_v28, %v1012_v38  ;;  %v1022_v52 = vrot.slane %v915_v39, 4 }
 0x35d   :  { %v997_v53 = vmax.f32 %v995_v31, %v996_v41  ;;  %v1008_v49 = vrot.slane %v1007_v42, 1  ;;  %v1017_v55 = vmax.f32 %v914_v33, %v1016_v43  ;;  %v1028_v56 = vrot.slane %v916_v44, 4 }
 0x35e   :  { %v1230_v57 = vrot.slane %v1223_v46, %v2134_v45  ;;  %v1003_v50 = vmax.f32 %v1001_v37, %v1002_v47  ;;  %v1014_v58 = vrot.slane %v1013_v48, 1  ;;  %v1023_v59 = vmax.f32 %v915_v39, %v1022_v52 }
 0x35f   :  { %v1009_v60 = vmax.f32 %v1007_v42, %v1008_v49  ;;  %v1018_v51 = vrot.slane %v1017_v55, 2  ;;  %v1029_v62 = vmax.f32 %v916_v44, %v1028_v56  ;;  %v864_v63 = vadd.f32 %v863_v30, %v2127_v19  ;;  %v871_v0 = vpop.f32.mrb[28].mxu1 }
 0x360   :  { %1420 = vst.msk [vmem:[#allocation14 + $0x8] sm:$0x3] %vm2139_vm1, %v1230_v57  ;;  %v1231_v1 = vcombine.low %v997_v53, %v1003_v50  ;;  %v1015_v2 = vmax.f32 %v1013_v48, %v1014_v58  ;;  %v1024_v3 = vrot.slane %v1023_v59, 2  ;;  %v866_v4 = vadd.f32 %v865_v35, %v2125_v17  ;;  %v873_v5 = vpop.f32.mrb[29].mxu1 }
 0x361   :  { %v1019_v6 = vmax.f32 %v1017_v55, %v1018_v51  ;;  %v1030_v7 = vrot.slane %v1029_v62, 2  ;;  %v917_v8 = vmax.f32 %v864_v63, 0.0  ;;  %v868_v9 = vadd.f32 %v867_v40, %v2127_v19  ;;  %v875_v10 = vpop.f32.mrb[30].mxu1 }
 0x362   :  { %v1238_v11 = vrot.slane %v1231_v1, %v2134_v45  ;;  %v1246_v13 = vcombine.low %v1009_v60, %v1015_v2  ;;  %v1025_v12 = vmax.f32 %v1023_v59, %v1024_v3  ;;  %v918_v14 = vmax.f32 %v866_v4, 0.0  ;;  %v877_v15 = vpop.f32.mrb[31].mxu1 }
 0x363   :  { %v1020_v16 = vrot.slane %v1019_v6, 1  ;;  %v1031_v54 = vmax.f32 %v1029_v62, %v1030_v7  ;;  %v1034_v20 = vrot.slane %v917_v8, 4  ;;  %v919_v21 = vmax.f32 %v868_v9, 0.0 }
 0x364   :  { %v1245_v22 = vrot.slane %v1238_v11, %v2134_v45  ;;  %v1253_v23 = vrot.slane %v1246_v13, %v2134_v45  ;;  %v1026_v24 = vrot.slane %v1025_v12, 1  ;;  %v1040_v25 = vrot.slane %v918_v14, 4 }
 0x365   :  { %v1021_v18 = vmax.f32 %v1019_v6, %v1020_v16  ;;  %v1032_v26 = vrot.slane %v1031_v54, 1  ;;  %v1035_v27 = vmax.f32 %v917_v8, %v1034_v20  ;;  %v1046_v28 = vrot.slane %v919_v21, 4 }
 0x366   :  { %1421 = vst.msk [vmem:[#allocation14 + $0xa] sm:$0x3] %vm2139_vm1, %v1245_v22  ;;  %v1260_v29 = vrot.slane %v1253_v23, %v2134_v45  ;;  %v1027_v30 = vmax.f32 %v1025_v12, %v1026_v24  ;;  %v1041_v31 = vmax.f32 %v918_v14, %v1040_v25  ;;  %v872_v32 = vadd.f32 %v871_v0, %v2125_v17 }
 0x367   :  { %v1033_v33 = vmax.f32 %v1031_v54, %v1032_v26  ;;  %v1036_v34 = vrot.slane %v1035_v27, 2  ;;  %v1047_v35 = vmax.f32 %v919_v21, %v1046_v28  ;;  %v874_v36 = vadd.f32 %v873_v5, %v2127_v19  ;;  %v881_v37 = vpop.f32.mrb[32].mxu1 }
 0x368   :  { %1422 = vst.msk [vmem:[#allocation14 + $0xc] sm:$0x3] %vm2139_vm1, %v1260_v29  ;;  %v1261_v38 = vcombine.low %v1021_v18, %v1027_v30  ;;  %v1042_v39 = vrot.slane %v1041_v31, 2  ;;  %v920_v40 = vmax.f32 %v872_v32, 0.0  ;;  %v876_v41 = vadd.f32 %v875_v10, %v2125_v17  ;;  %v883_v42 = vpop.f32.mrb[33].mxu1 }
 0x369   :  { %v1037_v43 = vmax.f32 %v1035_v27, %v1036_v34  ;;  %v1048_v44 = vrot.slane %v1047_v35, 2  ;;  %v921_v46 = vmax.f32 %v874_v36, 0.0  ;;  %v878_v47 = vadd.f32 %v877_v15, %v2127_v19  ;;  %v885_v48 = vpop.f32.mrb[34].mxu1 }
 0x36a   :  { %v1268_v52 = vrot.slane %v1261_v38, %v2134_v45  ;;  %v1043_v53 = vmax.f32 %v1041_v31, %v1042_v39  ;;  %v1052_v49 = vrot.slane %v920_v40, 4  ;;  %v922_v55 = vmax.f32 %v876_v41, 0.0  ;;  %v887_v56 = vpop.f32.mrb[35].mxu1 }
 0x36b   :  { %v1038_v57 = vrot.slane %v1037_v43, 1  ;;  %v1049_v50 = vmax.f32 %v1047_v35, %v1048_v44  ;;  %v1058_v58 = vrot.slane %v921_v46, 4  ;;  %v923_v59 = vmax.f32 %v878_v47, 0.0 }
 0x36c   :  { %v1275_v60 = vrot.slane %v1268_v52, %v2134_v45  ;;  %v1044_v51 = vrot.slane %v1043_v53, 1  ;;  %v1053_v62 = vmax.f32 %v920_v40, %v1052_v49  ;;  %v1064_v63 = vrot.slane %v922_v55, 4 }
 0x36d   :  { %v1039_v0 = vmax.f32 %v1037_v43, %v1038_v57  ;;  %v1050_v1 = vrot.slane %v1049_v50, 1  ;;  %v1059_v2 = vmax.f32 %v921_v46, %v1058_v58  ;;  %v1070_v3 = vrot.slane %v923_v59, 4 }
 0x36e   :  { %1423 = vst.msk [vmem:[#allocation14 + $0xe] sm:$0x3] %vm2139_vm1, %v1275_v60  ;;  %v1045_v4 = vmax.f32 %v1043_v53, %v1044_v51  ;;  %v1054_v5 = vrot.slane %v1053_v62, 2  ;;  %v1065_v6 = vmax.f32 %v922_v55, %v1064_v63  ;;  %v882_v7 = vadd.f32 %v881_v37, %v2125_v17 }
 0x36f   :  { %v1276_v8 = vcombine.low %v1033_v33, %v1039_v0  ;;  %v1051_v9 = vmax.f32 %v1049_v50, %v1050_v1  ;;  %v1060_v10 = vrot.slane %v1059_v2, 2  ;;  %v1071_v11 = vmax.f32 %v923_v59, %v1070_v3  ;;  %v891_v13 = vpop.f32.mrb[36].mxu1 }
 0x370   :  { %v1055_v12 = vmax.f32 %v1053_v62, %v1054_v5  ;;  %v1066_v14 = vrot.slane %v1065_v6, 2  ;;  %v924_v15 = vmax.f32 %v882_v7, 0.0  ;;  %v884_v16 = vadd.f32 %v883_v42, %v2127_v19  ;;  %v893_v54 = vpop.f32.mrb[37].mxu1 }
 0x371   :  { %v1283_v20 = vrot.slane %v1276_v8, %v2134_v45  ;;  %v1291_v21 = vcombine.low %v1045_v4, %v1051_v9  ;;  %v1061_v22 = vmax.f32 %v1059_v2, %v1060_v10  ;;  %v1072_v23 = vrot.slane %v1071_v11, 2  ;;  %v895_v24 = vpop.f32.mrb[38].mxu1 }
 0x372   :  { %v1056_v25 = vrot.slane %v1055_v12, 1  ;;  %v1067_v18 = vmax.f32 %v1065_v6, %v1066_v14  ;;  %v1076_v26 = vrot.slane %v924_v15, 4  ;;  %v925_v27 = vmax.f32 %v884_v16, 0.0  ;;  %v897_v28 = vpop.f32.mrb[39].mxu1 }
 0x373   :  { %v1290_v29 = vrot.slane %v1283_v20, %v2134_v45  ;;  %v1298_v30 = vrot.slane %v1291_v21, %v2134_v45  ;;  %v1062_v31 = vrot.slane %v1061_v22, 1  ;;  %v1073_v32 = vmax.f32 %v1071_v11, %v1072_v23 }
 0x374   :  { %v1057_v33 = vmax.f32 %v1055_v12, %v1056_v25  ;;  %v1068_v34 = vrot.slane %v1067_v18, 1  ;;  %v1077_v35 = vmax.f32 %v924_v15, %v1076_v26  ;;  %v1082_v36 = vrot.slane %v925_v27, 4 }
 0x375   :  { %1424 = vst.msk [vmem:[#allocation14 + $0x10] sm:$0x3] %vm2139_vm1, %v1290_v29  ;;  %v1305_v37 = vrot.slane %v1298_v30, %v2134_v45  ;;  %v1063_v38 = vmax.f32 %v1061_v22, %v1062_v31  ;;  %v1074_v39 = vrot.slane %v1073_v32, 1  ;;  %v886_v40 = vadd.f32 %v885_v48, %v2125_v17 }
 0x376   :  { %v1069_v41 = vmax.f32 %v1067_v18, %v1068_v34  ;;  %v1078_v42 = vrot.slane %v1077_v35, 2  ;;  %v1083_v43 = vmax.f32 %v925_v27, %v1082_v36  ;;  %v888_v44 = vadd.f32 %v887_v56, %v2127_v19 }
 0x377   :  { %1425 = vst.msk [vmem:[#allocation14 + $0x12] sm:$0x3] %vm2139_vm1, %v1305_v37  ;;  %v1306_v46 = vcombine.low %v1057_v33, %v1063_v38  ;;  %v1075_v47 = vmax.f32 %v1073_v32, %v1074_v39  ;;  %v926_v52 = vmax.f32 %v886_v40, 0.0  ;;  %v892_v53 = vadd.f32 %v891_v13, %v2125_v17 }
 0x378   :  { %v1079_v49 = vmax.f32 %v1077_v35, %v1078_v42  ;;  %v1084_v55 = vrot.slane %v1083_v43, 2  ;;  %v927_v57 = vmax.f32 %v888_v44, 0.0  ;;  %v894_v50 = vadd.f32 %v893_v54, %v2127_v19 }
 0x379   :  { %v1313_v48 = vrot.slane %v1306_v46, %v2134_v45  ;;  %v1321_v58 = vcombine.low %v1069_v41, %v1075_v47  ;;  %v1088_v59 = vrot.slane %v926_v52, 4  ;;  %v928_v60 = vmax.f32 %v892_v53, 0.0 }
 0x37a   :  { %v1080_v51 = vrot.slane %v1079_v49, 1  ;;  %v1085_v56 = vmax.f32 %v1083_v43, %v1084_v55  ;;  %v1094_v62 = vrot.slane %v927_v57, 4  ;;  %v929_v63 = vmax.f32 %v894_v50, 0.0 }
 0x37b   :  { %v1320_v0 = vrot.slane %v1313_v48, %v2134_v45  ;;  %v1328_v1 = vrot.slane %v1321_v58, %v2134_v45  ;;  %v1089_v2 = vmax.f32 %v926_v52, %v1088_v59  ;;  %v1100_v3 = vrot.slane %v928_v60, 4 }
 0x37c   :  { %v1081_v4 = vmax.f32 %v1079_v49, %v1080_v51  ;;  %v1086_v5 = vrot.slane %v1085_v56, 1  ;;  %v1095_v6 = vmax.f32 %v927_v57, %v1094_v62  ;;  %v1106_v7 = vrot.slane %v929_v63, 4 }
 0x37d   :  { %1426 = vst.msk [vmem:[#allocation14 + $0x14] sm:$0x3] %vm2139_vm1, %v1320_v0  ;;  %v1335_v8 = vrot.slane %v1328_v1, %v2134_v45  ;;  %v1090_v9 = vrot.slane %v1089_v2, 2  ;;  %v1101_v10 = vmax.f32 %v928_v60, %v1100_v3  ;;  %v896_v11 = vadd.f32 %v895_v24, %v2125_v17 }
 0x37e   :  { %v1087_v13 = vmax.f32 %v1085_v56, %v1086_v5  ;;  %v1096_v12 = vrot.slane %v1095_v6, 2  ;;  %v1107_v14 = vmax.f32 %v929_v63, %v1106_v7  ;;  %v898_v15 = vadd.f32 %v897_v28, %v2127_v19 }
 0x37f   :  { %1427 = vst.msk [vmem:[#allocation14 + $0x16] sm:$0x3] %vm2139_vm1, %v1335_v8  ;;  %v1091_v16 = vmax.f32 %v1089_v2, %v1090_v9  ;;  %v1102_v54 = vrot.slane %v1101_v10, 2  ;;  %v930_v20 = vmax.f32 %v896_v11, 0.0 }
 0x380   :  { %v1336_v21 = vcombine.low %v1081_v4, %v1087_v13  ;;  %v1097_v22 = vmax.f32 %v1095_v6, %v1096_v12  ;;  %v1108_v23 = vrot.slane %v1107_v14, 2  ;;  %v931_v25 = vmax.f32 %v898_v15, 0.0 }
 0x381   :  { %v1092_v18 = vrot.slane %v1091_v16, 1  ;;  %v1103_v26 = vmax.f32 %v1101_v10, %v1102_v54  ;;  %v1112_v27 = vrot.slane %v930_v20, 4 }
 0x382   :  { %v1343_v17 = vrot.slane %v1336_v21, %v2134_v45  ;;  %v1098_v24 = vrot.slane %v1097_v22, 1  ;;  %v1109_v29 = vmax.f32 %v1107_v14, %v1108_v23  ;;  %v1118_v30 = vrot.slane %v931_v25, 4 }
 0x383   :  { %v1093_v31 = vmax.f32 %v1091_v16, %v1092_v18  ;;  %v1104_v19 = vrot.slane %v1103_v26, 1  ;;  %v1113_v28 = vmax.f32 %v930_v20, %v1112_v27 }
 0x384   :  { %v1350_v32 = vrot.slane %v1343_v17, %v2134_v45  ;;  %v1099_v33 = vmax.f32 %v1097_v22, %v1098_v24  ;;  %v1110_v34 = vrot.slane %v1109_v29, 1  ;;  %v1119_v35 = vmax.f32 %v931_v25, %v1118_v30 }
 0x385   :  { %v1105_v36 = vmax.f32 %v1103_v26, %v1104_v19  ;;  %v1114_v37 = vrot.slane %v1113_v28, 2 }
 0x386   :  { %1428 = vst.msk [vmem:[#allocation14 + $0x18] sm:$0x3] %vm2139_vm1, %v1350_v32  ;;  %v1351_v38 = vcombine.low %v1093_v31, %v1099_v33  ;;  %v1111_v39 = vmax.f32 %v1109_v29, %v1110_v34  ;;  %v1120_v40 = vrot.slane %v1119_v35, 2 }
 0x387   :  { %v1115_v41 = vmax.f32 %v1113_v28, %v1114_v37 }
 0x388   :  { %v1358_v42 = vrot.slane %v1351_v38, %v2134_v45  ;;  %v1366_v43 = vcombine.low %v1105_v36, %v1111_v39  ;;  %v1121_v44 = vmax.f32 %v1119_v35, %v1120_v40 }
 0x389   :  { %v1116_v46 = vrot.slane %v1115_v41, 1 }
 0x38a   :  { %v1365_v47 = vrot.slane %v1358_v42, %v2134_v45  ;;  %v1373_v52 = vrot.slane %v1366_v43, %v2134_v45  ;;  %v1122_v53 = vrot.slane %v1121_v44, 1 }
 0x38b   :  { %v1117_v49 = vmax.f32 %v1115_v41, %v1116_v46 }
 0x38c   :  { %1429 = vst.msk [vmem:[#allocation14 + $0x1a] sm:$0x3] %vm2139_vm1, %v1365_v47  ;;  %v1380_v55 = vrot.slane %v1373_v52, %v2134_v45  ;;  %v1123_v57 = vmax.f32 %v1121_v44, %v1122_v53 }
 0x38e   :  { %1430 = vst.msk [vmem:[#allocation14 + $0x1c] sm:$0x3] %vm2139_vm1, %v1380_v55  ;;  %v1381_v50 = vcombine.low %v1117_v49, %v1123_v57 }
 0x390   :  { %v1388_v48 = vrot.slane %v1381_v50, %v2134_v45 }
 0x392   :  { %v1395_v58 = vrot.slane %v1388_v48, %v2134_v45 }
 0x394   :  { %1431 = vst.msk [vmem:[#allocation14 + $0x1e] sm:$0x3] %vm2139_vm1, %v1395_v58 }
 0x395   :  { %1899 = shalt.err (!%p1896_p4)
}
 0x396   :  { %s1900_s11 = scalar_lea.hbm %s2250_s7, 512 }
 0x397   :  { %p1901_p5 = scmp.ne.s32.totalorder %s2250_s7, %s1900_s11  ;;  %p1904_p6 = scmp.lt.u32.totalorder %s1900_s11, %s2250_s7 }
 0x399   :  { %p1906_p7 = pnand %p1904_p6, %p1901_p5 }
 0x39b   :  { %1909 = shalt.err (!%p1906_p7)
}
 0x39c   :  { %s1934_s19 = smov 32   ;;  %s1935_s20 = smov 2  }
 0x39d   :  { %1443 = dma.vmem_to_hbm [thread:$0]  %s1438_s15, 512, %s2250_s7, [#allocation4], %s1934_s19, %s1934_s19, %s1935_s20  }
 0x39e   :  { %1918 = dma.done.wait [#allocation4], 512  }
 0x39f   :  { %1919 = vsyncadd [#allocation4], 4294966784 }
 0x3a0   :  { %1447 = vsyncpa [#allocation3], 1 }
 0x3a1   :  { %1448 = vsyncpa [#allocation6], 1 }
 0x3a2   :  { %1449 = vsyncpa [#allocation9], 1 }
 0x3a3   :  { %1450 = vsyncpa [#allocation12], 1 }
 0x3a4   :  { %1451 = vsyncpa [#allocation4], 1 }

// kernel: pointnet2_forward.5
= control target key start
LH: loop header
LB: loop body
LE: loop exit
PB: predicated region body
PF: predicated region fallthrough
CT: control target
= control target key end

     0   :  { %12 = vsyncpa [#allocation3], 0  ;;  %s4284_s0 = inlined_call_operand.hbm [shape: bf16[16,261], index: 0, kind: input, shape index: {}]   ;;  %s4285_s1 = inlined_call_operand.hbm [shape: bf16[384,256], index: 1, kind: input, shape index: {}]   ;;  %s4286_s2 = inlined_call_operand.hbm [shape: f32[1,256], index: 2, kind: input, shape index: {}]   ;;  %s4287_s3 = inlined_call_operand.hbm [shape: bf16[256,512], index: 3, kind: input, shape index: {}]   ;;  %s4288_s4 = inlined_call_operand.hbm [shape: f32[1,512], index: 4, kind: input, shape index: {}]   ;;  %s4289_s5 = inlined_call_operand.hbm [shape: bf16[512,1024], index: 5, kind: input, shape index: {}]   ;;  %s4290_s6 = inlined_call_operand.hbm [shape: f32[1,1024], index: 6, kind: input, shape index: {}]   ;;  %s4291_s7 = inlined_call_operand.hbm [shape: f32[2,1,1024], index: 7, kind: output, shape index: {}]  }
   0x1   :  { %13 = vsyncpa [#allocation6], 0 }
   0x2   :  { %14 = vsyncpa [#allocation9], 0 }
   0x3   :  { %15 = vsyncpa [#allocation12], 0 }
   0x4   :  { %16 = vsyncpa [#allocation4], 0  ;;  %s3997_s24 = smov [#allocation5]   ;;  %s3811_s28 = scalar_lea.hbm %s4285_s1, 6144 }
   0x5   :  { %s34_s25 = sshll.u32 %s3997_s24, 4  ;;  %p3812_p0 = scmp.ne.s32.totalorder %s4285_s1, %s3811_s28  ;;  %s35_s25 = int_to_ptr.vmem [resolvable:$true] %s34_s25 }
   0x6   :  { %p3815_p1 = scmp.lt.u32.totalorder %s3811_s28, %s4285_s1 }
   0x8   :  { %p3817_p2 = pnand %p3815_p1, %p3812_p0 }
   0xa   :  { %3820 = shalt.err (!%p3817_p2)
}
   0xb   :  { %s3821_s10 = scalar_lea.vmem %s35_s25, 6144  ;;  %p3826_p4 = scmp.lt.s32.totalorder %s35_s25, %s35_s25 }
   0xc   :  { %p3822_p3 = scmp.ne.s32.totalorder %s35_s25, %s3821_s10  ;;  %p3827_p5 = scmp.lt.s32.totalorder %s3821_s10, %s3821_s10 }
   0xe   :  { %p3828_p6 = por %p3827_p5, %p3826_p4 }
  0x10   :  { %p3829_p7 = pnand %p3828_p6, %p3822_p3 }
  0x12   :  { %3832 = shalt.err (!%p3829_p7)
}
  0x13   :  { %s3998_s11 = smov 128   ;;  %s3999_s12 = smov 8  }
  0x14   :  { %40 = dma.hbm_to_vmem [thread:$0]  %s4285_s1, 6144, %s35_s25, [#allocation6], %s3998_s11, %s3998_s11, %s3999_s12  }
  0x15   :  { %s4000_s15 = smov [#allocation8]   ;;  %s3833_s19 = scalar_lea.hbm %s4287_s3, 8192 }
  0x16   :  { %s56_s16 = sshll.u32 %s4000_s15, 4  ;;  %p3834_p8 = scmp.ne.s32.totalorder %s4287_s3, %s3833_s19  ;;  %s57_s16 = int_to_ptr.vmem [resolvable:$true] %s56_s16 }
  0x17   :  { %p3837_p9 = scmp.lt.u32.totalorder %s3833_s19, %s4287_s3 }
  0x19   :  { %p3839_p10 = pnand %p3837_p9, %p3834_p8 }
  0x1b   :  { %3842 = shalt.err (!%p3839_p10)
}
  0x1c   :  { %s3843_s24 = scalar_lea.vmem %s57_s16, 8192  ;;  %p3848_p12 = scmp.lt.s32.totalorder %s57_s16, %s57_s16 }
  0x1d   :  { %p3844_p11 = scmp.ne.s32.totalorder %s57_s16, %s3843_s24  ;;  %p3849_p13 = scmp.lt.s32.totalorder %s3843_s24, %s3843_s24 }
  0x1f   :  { %p3850_p0 = por %p3849_p13, %p3848_p12 }
  0x21   :  { %p3851_p1 = pnand %p3850_p0, %p3844_p11 }
  0x23   :  { %3854 = shalt.err (!%p3851_p1)
}
  0x24   :  { %s4001_s1 = smov 256   ;;  %s4002_s25 = smov 16  }
  0x25   :  { %62 = dma.hbm_to_vmem [thread:$0]  %s4287_s3, 8192, %s57_s16, [#allocation9], %s4001_s1, %s4001_s1, %s4002_s25  }
  0x26   :  { %s4003_s28 = smov [#allocation11]   ;;  %s3855_s9 = scalar_lea.hbm %s4289_s5, 32768 }
  0x27   :  { %s78_s29 = sshll.u32 %s4003_s28, 4  ;;  %p3856_p2 = scmp.ne.s32.totalorder %s4289_s5, %s3855_s9  ;;  %s79_s29 = int_to_ptr.vmem [resolvable:$true] %s78_s29 }
  0x28   :  { %p3859_p3 = scmp.lt.u32.totalorder %s3855_s9, %s4289_s5 }
  0x2a   :  { %p3861_p4 = pnand %p3859_p3, %p3856_p2 }
  0x2c   :  { %3864 = shalt.err (!%p3861_p4)
}
  0x2d   :  { %s3865_s17 = scalar_lea.vmem %s79_s29, 32768  ;;  %p3870_p6 = scmp.lt.s32.totalorder %s79_s29, %s79_s29 }
  0x2e   :  { %p3866_p5 = scmp.ne.s32.totalorder %s79_s29, %s3865_s17  ;;  %p3871_p7 = scmp.lt.s32.totalorder %s3865_s17, %s3865_s17 }
  0x30   :  { %p3872_p8 = por %p3871_p7, %p3870_p6 }
  0x32   :  { %p3873_p9 = pnand %p3872_p8, %p3866_p5 }
  0x34   :  { %3876 = shalt.err (!%p3873_p9)
}
  0x35   :  { %s4004_s3 = smov 512   ;;  %s4005_s16 = smov 32  }
  0x36   :  { %84 = dma.hbm_to_vmem [thread:$0]  %s4289_s5, 32768, %s79_s29, [#allocation12], %s4004_s3, %s4004_s3, %s4005_s16  }
  0x37   :  { %s4006_s20 = smov [#allocation2]   ;;  %s3877_s24 = scalar_lea.hbm %s4284_s0, 384 }
  0x38   :  { %s22_s21 = sshll.u32 %s4006_s20, 4  ;;  %p3878_p10 = scmp.ne.s32.totalorder %s4284_s0, %s3877_s24  ;;  %s23_s21 = int_to_ptr.vmem [resolvable:$true] %s22_s21 }
  0x39   :  { %p3881_p11 = scmp.lt.u32.totalorder %s3877_s24, %s4284_s0 }
  0x3b   :  { %p3883_p12 = pnand %p3881_p11, %p3878_p10 }
  0x3d   :  { %3886 = shalt.err (!%p3883_p12)
}
  0x3e   :  { %s3887_s28 = scalar_lea.vmem %s23_s21, 384  ;;  %p3892_p0 = scmp.lt.s32.totalorder %s23_s21, %s23_s21 }
  0x3f   :  { %p3888_p13 = scmp.ne.s32.totalorder %s23_s21, %s3887_s28  ;;  %p3893_p1 = scmp.lt.s32.totalorder %s3887_s28, %s3887_s28 }
  0x41   :  { %p3894_p2 = por %p3893_p1, %p3892_p0 }
  0x43   :  { %p3895_p3 = pnand %p3894_p2, %p3888_p13 }
  0x45   :  { %3898 = shalt.err (!%p3895_p3)
}
  0x46   :  { %s4007_s5 = smov 192   ;;  %s4008_s29 = smov 12  }
  0x47   :  { %28 = dma.hbm_to_vmem [thread:$0]  %s4284_s0, 384, %s23_s21, [#allocation3], %s4007_s5, %s4007_s5, %s4008_s29  }
  0x48   :  { %s4009_s9 = smov [#allocation7]   ;;  %s4010_s13 = smov [#allocation10]  }
  0x49   :  { %s47_s10 = sshll.u32 %s4009_s9, 4  ;;  %s69_s14 = sshll.u32 %s4010_s13, 4  ;;  %s48_s10 = int_to_ptr.vmem [resolvable:$true] %s47_s10  ;;  %s70_s14 = int_to_ptr.vmem [resolvable:$true] %s69_s14 }
  0x4a   :  { %s3899_s3 = scalar_lea.hbm %s4286_s2, 32 }
  0x4b   :  { %p3900_p4 = scmp.ne.s32.totalorder %s4286_s2, %s3899_s3  ;;  %p3903_p5 = scmp.lt.u32.totalorder %s3899_s3, %s4286_s2 }
  0x4d   :  { %p3905_p6 = pnand %p3903_p5, %p3900_p4 }
  0x4f   :  { %3908 = shalt.err (!%p3905_p6)
}
  0x50   :  { %s3909_s0 = scalar_lea.vmem %s48_s10, 32  ;;  %p3914_p8 = scmp.lt.s32.totalorder %s48_s10, %s48_s10 }
  0x51   :  { %p3910_p7 = scmp.ne.s32.totalorder %s48_s10, %s3909_s0  ;;  %p3915_p9 = scmp.lt.s32.totalorder %s3909_s0, %s3909_s0 }
  0x53   :  { %p3916_p10 = por %p3915_p9, %p3914_p8 }
  0x55   :  { %p3917_p11 = pnand %p3916_p10, %p3910_p7 }
  0x57   :  { %3920 = shalt.err (!%p3917_p11)
}
  0x58   :  { %50 = dma.hbm_to_vmem [thread:$0]  %s4286_s2, 32, %s48_s10, [#allocation6]  }
  0x59   :  { %s3921_s1 = scalar_lea.hbm %s4288_s4, 64 }
  0x5a   :  { %p3922_p12 = scmp.ne.s32.totalorder %s4288_s4, %s3921_s1  ;;  %p3925_p13 = scmp.lt.u32.totalorder %s3921_s1, %s4288_s4 }
  0x5c   :  { %p3927_p0 = pnand %p3925_p13, %p3922_p12 }
  0x5e   :  { %3930 = shalt.err (!%p3927_p0)
}
  0x5f   :  { %s3931_s5 = scalar_lea.vmem %s70_s14, 64  ;;  %p3936_p2 = scmp.lt.s32.totalorder %s70_s14, %s70_s14 }
  0x60   :  { %p3932_p1 = scmp.ne.s32.totalorder %s70_s14, %s3931_s5  ;;  %p3937_p3 = scmp.lt.s32.totalorder %s3931_s5, %s3931_s5 }
  0x62   :  { %p3938_p4 = por %p3937_p3, %p3936_p2 }
  0x64   :  { %p3939_p5 = pnand %p3938_p4, %p3932_p1 }
  0x66   :  { %3942 = shalt.err (!%p3939_p5)
}
  0x67   :  { %72 = dma.hbm_to_vmem [thread:$0]  %s4288_s4, 64, %s70_s14, [#allocation9]  }
  0x68   :  { %s4011_s30 = smov [#allocation13]   ;;  %s3943_s13 = scalar_lea.hbm %s4290_s6, 128 }
  0x69   :  { %s91_s8 = sshll.u32 %s4011_s30, 4  ;;  %p3944_p6 = scmp.ne.s32.totalorder %s4290_s6, %s3943_s13  ;;  %s92_s8 = int_to_ptr.vmem [resolvable:$true] %s91_s8 }
  0x6a   :  { %p3947_p7 = scmp.lt.u32.totalorder %s3943_s13, %s4290_s6 }
  0x6c   :  { %p3949_p8 = pnand %p3947_p7, %p3944_p6 }
  0x6e   :  { %3952 = shalt.err (!%p3949_p8)
}
  0x6f   :  { %s3953_s18 = scalar_lea.vmem %s92_s8, 128  ;;  %p3958_p10 = scmp.lt.s32.totalorder %s92_s8, %s92_s8 }
  0x70   :  { %p3954_p9 = scmp.ne.s32.totalorder %s92_s8, %s3953_s18  ;;  %p3959_p11 = scmp.lt.s32.totalorder %s3953_s18, %s3953_s18 }
  0x72   :  { %p3960_p12 = por %p3959_p11, %p3958_p10 }
  0x74   :  { %p3961_p13 = pnand %p3960_p12, %p3954_p9 }
  0x76   :  { %3964 = shalt.err (!%p3961_p13)
}
  0x77   :  { %94 = dma.hbm_to_vmem [thread:$0]  %s4290_s6, 128, %s92_s8, [#allocation12]  }
  0x78   :  { %3987 = dma.done.wait [#allocation3], 384  }
  0x79   :  { %3988 = vsyncadd [#allocation3], 4294966912 }
  0x7a   :  { %3989 = dma.done.wait [#allocation6], 6176  }
  0x7b   :  { %3990 = vsyncadd [#allocation6], 4294961120 }
  0x7c   :  { %3991 = dma.done.wait [#allocation9], 8256  }
  0x7d   :  { %3992 = vsyncadd [#allocation9], 4294959040 }
  0x7e   :  { %3993 = dma.done.wait [#allocation12], 32896  }
  0x7f   :  { %3994 = vsyncadd [#allocation12], 4294934400  ;;  %v3639_v0 = vld [vmem:[#allocation5 + $0x4] ss:$8 sps:$4 sm:$0xff]   ;;  %v3641_v1 = vld [vmem:[#allocation5] ss:$8 sps:$4 sm:$0xff]  }
  0x80   :  { %441 = vmatprep.subr.bf16.mxu0 %v3639_v0  ;;  %v3642_v2 = vld [vmem:[#allocation5 + $0x14] ss:$8 sps:$4 sm:$0xff]   ;;  %v3644_v3 = vld [vmem:[#allocation5 + $0x10] ss:$8 sps:$4 sm:$0xff]   ;;  %v3645_v4 = vld [vmem:[#allocation5 + $0x24] ss:$8 sps:$4 sm:$0xff]  }
  0x81   :  { %442 = vmatpush1.bf16.msra.mxu0 %v3641_v1  ;;  %v3647_v5 = vld [vmem:[#allocation5 + $0x20] ss:$8 sps:$4 sm:$0xff]   ;;  %v3648_v6 = vld [vmem:[#allocation5 + $0x34] ss:$8 sps:$4 sm:$0xff]   ;;  %v3650_v7 = vld [vmem:[#allocation5 + $0x30] ss:$8 sps:$4 sm:$0xff]  }
  0x82   :  { %443 = vmatprep.subr.bf16.mxu0 %v3642_v2  ;;  %v3651_v8 = vld [vmem:[#allocation5 + $0x44] ss:$8 sps:$4 sm:$0xff]   ;;  %v3653_v9 = vld [vmem:[#allocation5 + $0x40] ss:$8 sps:$4 sm:$0xff]   ;;  %v3654_v10 = vld [vmem:[#allocation5 + $0x54] ss:$8 sps:$4 sm:$0xff]  }
  0x83   :  { %v3656_v11 = vld [vmem:[#allocation5 + $0x50] ss:$8 sps:$4 sm:$0xff]   ;;  %v3657_v12 = vld [vmem:[#allocation5 + $0x64] ss:$8 sps:$4 sm:$0xff]   ;;  %v3659_v14 = vld [vmem:[#allocation5 + $0x60] ss:$8 sps:$4 sm:$0xff]  }
  0x84   :  { %v3689_v13 = vld [vmem:[#allocation2 + $0x4] ss:$12 sps:$4 sm:$0xff]   ;;  %v3660_v15 = vld [vmem:[#allocation5 + $0x74] ss:$8 sps:$4 sm:$0xff]   ;;  %v3665_v18 = vld [vmem:[#allocation5 + $0x80] ss:$8 sps:$4 sm:$0xff]  }
  0x85   :  { %444 = vmatpush1.bf16.msra.mxu0 %v3644_v3  ;;  %473 = vmatprep.mubr.bf16.mxu0 %v3689_v13  ;;  %v3662_v16 = vld [vmem:[#allocation5 + $0x70] ss:$8 sps:$4 sm:$0xff]   ;;  %v3663_v17 = vld [vmem:[#allocation5 + $0x84] ss:$8 sps:$4 sm:$0xff]   ;;  %v3666_v19 = vld [vmem:[#allocation5 + $0x94] ss:$8 sps:$4 sm:$0xff]  }
  0x86   :  { %445 = vmatprep.subr.bf16.mxu0 %v3645_v4  ;;  %v3668_v20 = vld [vmem:[#allocation5 + $0x90] ss:$8 sps:$4 sm:$0xff]   ;;  %v3669_v23 = vld [vmem:[#allocation5 + $0xa4] ss:$8 sps:$4 sm:$0xff]   ;;  %v3671_v26 = vld [vmem:[#allocation5 + $0xa0] ss:$8 sps:$4 sm:$0xff]  }
  0x87   :  { %v3715_v21 = vld [vmem:[#allocation8 + $0x4] ss:$16 sps:$4 sm:$0xff]   ;;  %v3717_v22 = vld [vmem:[#allocation8] ss:$16 sps:$4 sm:$0xff]   ;;  %v4012_v56 = vmov 0   ;;  %vm136_vm0 = vcmask 39936  }
  0x88   :  { %v3718_v24 = vld [vmem:[#allocation8 + $0x24] ss:$16 sps:$4 sm:$0xff]   ;;  %939 = vmatprep.subr.bf16.mxu1 %v3715_v21  ;;  %v3720_v25 = vld [vmem:[#allocation8 + $0x20] ss:$16 sps:$4 sm:$0xff]   ;;  %s4014_s6 = smov [#allocation14]  }
  0x89   :  { %446 = vmatpush1.bf16.msra.mxu0 %v3647_v5  ;;  %940 = vmatpush1.bf16.msra.mxu1 %v3717_v22  ;;  %v3721_v27 = vld [vmem:[#allocation8 + $0x44] ss:$16 sps:$4 sm:$0xff]   ;;  %v3723_v29 = vld [vmem:[#allocation8 + $0x40] ss:$16 sps:$4 sm:$0xff]   ;;  %s3194_s19 = sshll.u32 %s4014_s6, 4  ;;  %s3195_s19 = int_to_ptr.vmem [resolvable:$true] %s3194_s19 }
  0x8a   :  { %447 = vmatprep.subr.bf16.mxu0 %v3648_v6  ;;  %941 = vmatprep.subr.bf16.mxu1 %v3718_v24  ;;  %v3672_v28 = vld [vmem:[#allocation5 + $0xb4] ss:$8 sps:$4 sm:$0xff]   ;;  %v3674_v30 = vld [vmem:[#allocation5 + $0xb0] ss:$8 sps:$4 sm:$0xff]   ;;  %v3675_v32 = vld [vmem:[#allocation5 + $0xc4] ss:$8 sps:$4 sm:$0xff]   ;;  %p3970_p1 = scmp.lt.s32.totalorder %s3195_s19, %s3195_s19 }
  0x8b   :  { %v3724_v31 = vld [vmem:[#allocation8 + $0x64] ss:$16 sps:$4 sm:$0xff]   ;;  %v3726_v33 = vld [vmem:[#allocation8 + $0x60] ss:$16 sps:$4 sm:$0xff]   ;;  %s3965_s20 = scalar_lea.vmem %s3195_s19, 256 }
  0x8c   :  { %v3677_v34 = vld [vmem:[#allocation5 + $0xc0] ss:$8 sps:$4 sm:$0xff]   ;;  %v3678_v36 = vld [vmem:[#allocation5 + $0xd4] ss:$8 sps:$4 sm:$0xff]   ;;  %v3680_v38 = vld [vmem:[#allocation5 + $0xd0] ss:$8 sps:$4 sm:$0xff]   ;;  %p3966_p0 = scmp.ne.s32.totalorder %s3195_s19, %s3965_s20  ;;  %p3971_p2 = scmp.lt.s32.totalorder %s3965_s20, %s3965_s20 }
  0x8d   :  { %448 = vmatpush1.bf16.msra.mxu0 %v3650_v7  ;;  %942 = vmatpush1.bf16.msra.mxu1 %v3720_v25  ;;  %v3727_v35 = vld [vmem:[#allocation8 + $0x84] ss:$16 sps:$4 sm:$0xff]   ;;  %v3729_v37 = vld [vmem:[#allocation8 + $0x80] ss:$16 sps:$4 sm:$0xff]  }
  0x8e   :  { %449 = vmatprep.subr.bf16.mxu0 %v3651_v8  ;;  %943 = vmatprep.subr.bf16.mxu1 %v3721_v27  ;;  %v3730_v39 = vld [vmem:[#allocation8 + $0xa4] ss:$16 sps:$4 sm:$0xff]   ;;  %v3732_v41 = vld [vmem:[#allocation8 + $0xa0] ss:$16 sps:$4 sm:$0xff]   ;;  %p3972_p3 = por %p3971_p2, %p3970_p1 }
  0x8f   :  { %v3681_v40 = vld [vmem:[#allocation5 + $0xe4] ss:$8 sps:$4 sm:$0xff]   ;;  %v3683_v42 = vld [vmem:[#allocation5 + $0xe0] ss:$8 sps:$4 sm:$0xff]   ;;  %v3684_v44 = vld [vmem:[#allocation5 + $0xf4] ss:$8 sps:$4 sm:$0xff]  }
  0x90   :  { %v3733_v43 = vld [vmem:[#allocation8 + $0xc4] ss:$16 sps:$4 sm:$0xff]   ;;  %v3735_v45 = vld [vmem:[#allocation8 + $0xc0] ss:$16 sps:$4 sm:$0xff]   ;;  %p3973_p4 = pnand %p3972_p3, %p3966_p0 }
  0x91   :  { %450 = vmatpush1.bf16.msra.mxu0 %v3653_v9  ;;  %944 = vmatpush1.bf16.msra.mxu1 %v3723_v29  ;;  %v3686_v46 = vld [vmem:[#allocation5 + $0xf0] ss:$8 sps:$4 sm:$0xff]   ;;  %v3692_v48 = vld [vmem:[#allocation5 + $0x104] ss:$8 sps:$4 sm:$0xff]   ;;  %v3687_v49 = vld [vmem:[#allocation2] ss:$12 sps:$4 sm:$0xff]  }
  0x92   :  { %451 = vmatprep.subr.bf16.mxu0 %v3654_v10  ;;  %945 = vmatprep.subr.bf16.mxu1 %v3724_v31  ;;  %v3736_v47 = vld [vmem:[#allocation8 + $0xe4] ss:$16 sps:$4 sm:$0xff]   ;;  %v3738_v50 = vld [vmem:[#allocation8 + $0xe0] ss:$16 sps:$4 sm:$0xff]  }
  0x93   :  { %v3690_v51 = vld [vmem:[#allocation5 + $0x100] ss:$8 sps:$4 sm:$0xff]   ;;  %v3695_v52 = vld [vmem:[#allocation5 + $0x114] ss:$8 sps:$4 sm:$0xff]   ;;  %v3693_v55 = vld [vmem:[#allocation5 + $0x110] ss:$8 sps:$4 sm:$0xff]  }
  0x94   :  { %v3739_v53 = vld [vmem:[#allocation8 + $0x104] ss:$16 sps:$4 sm:$0xff]   ;;  %v3741_v54 = vld [vmem:[#allocation8 + $0x100] ss:$16 sps:$4 sm:$0xff]  }
  0x95   :  { %452 = vmatpush1.bf16.msra.mxu0 %v3656_v11  ;;  %946 = vmatpush1.bf16.msra.mxu1 %v3726_v33  ;;  %v3742_v57 = vld [vmem:[#allocation8 + $0x124] ss:$16 sps:$4 sm:$0xff]   ;;  %v3744_v59 = vld [vmem:[#allocation8 + $0x120] ss:$16 sps:$4 sm:$0xff]  }
  0x96   :  { %453 = vmatprep.subr.bf16.mxu0 %v3657_v12  ;;  %947 = vmatprep.subr.bf16.mxu1 %v3727_v35  ;;  %v3698_v58 = vld [vmem:[#allocation5 + $0x124] ss:$8 sps:$4 sm:$0xff]   ;;  %v3696_v60 = vld [vmem:[#allocation5 + $0x120] ss:$8 sps:$4 sm:$0xff]   ;;  %v3701_v62 = vld [vmem:[#allocation5 + $0x134] ss:$8 sps:$4 sm:$0xff]  }
  0x97   :  { %v3745_v61 = vld [vmem:[#allocation8 + $0x144] ss:$16 sps:$4 sm:$0xff]   ;;  %v3747_v63 = vld [vmem:[#allocation8 + $0x140] ss:$16 sps:$4 sm:$0xff]  }
  0x98   :  { %v3699_v0 = vld [vmem:[#allocation5 + $0x130] ss:$8 sps:$4 sm:$0xff]   ;;  %v3704_v2 = vld [vmem:[#allocation5 + $0x144] ss:$8 sps:$4 sm:$0xff]   ;;  %v3702_v4 = vld [vmem:[#allocation5 + $0x140] ss:$8 sps:$4 sm:$0xff]  }
  0x99   :  { %454 = vmatpush1.bf16.msra.mxu0 %v3659_v14  ;;  %948 = vmatpush1.bf16.msra.mxu1 %v3729_v37  ;;  %v3748_v1 = vld [vmem:[#allocation8 + $0x164] ss:$16 sps:$4 sm:$0xff]   ;;  %v3750_v3 = vld [vmem:[#allocation8 + $0x160] ss:$16 sps:$4 sm:$0xff]  }
  0x9a   :  { %455 = vmatprep.subr.bf16.mxu0 %v3660_v15  ;;  %949 = vmatprep.subr.bf16.mxu1 %v3730_v39  ;;  %v3751_v5 = vld [vmem:[#allocation8 + $0x184] ss:$16 sps:$4 sm:$0xff]   ;;  %v3753_v7 = vld [vmem:[#allocation8 + $0x180] ss:$16 sps:$4 sm:$0xff]  }
  0x9b   :  { %v3707_v6 = vld [vmem:[#allocation5 + $0x154] ss:$8 sps:$4 sm:$0xff]   ;;  %v3705_v8 = vld [vmem:[#allocation5 + $0x150] ss:$8 sps:$4 sm:$0xff]   ;;  %v3710_v10 = vld [vmem:[#allocation5 + $0x164] ss:$8 sps:$4 sm:$0xff]  }
  0x9c   :  { %v3754_v9 = vld [vmem:[#allocation8 + $0x1a4] ss:$16 sps:$4 sm:$0xff]   ;;  %v3756_v11 = vld [vmem:[#allocation8 + $0x1a0] ss:$16 sps:$4 sm:$0xff]  }
  0x9d   :  { %456 = vmatpush1.bf16.msra.mxu0 %v3662_v16  ;;  %950 = vmatpush1.bf16.msra.mxu1 %v3732_v41  ;;  %v3708_v12 = vld [vmem:[#allocation5 + $0x160] ss:$8 sps:$4 sm:$0xff]   ;;  %v3713_v13 = vld [vmem:[#allocation5 + $0x174] ss:$8 sps:$4 sm:$0xff]   ;;  %v3711_v14 = vld [vmem:[#allocation5 + $0x170] ss:$8 sps:$4 sm:$0xff]  }
  0x9e   :  { %457 = vmatprep.subr.bf16.mxu0 %v3663_v17  ;;  %951 = vmatprep.subr.bf16.mxu1 %v3733_v43  ;;  %v3714_v15 = vld [vmem:[#allocation2 + $0x8] ss:$12 sps:$4 sm:$0xff]   ;;  %v3757_v16 = vld [vmem:[#allocation8 + $0x1c4] ss:$16 sps:$4 sm:$0xff]  }
  0x9f   :  { %v3759_v17 = vld [vmem:[#allocation8 + $0x1c0] ss:$16 sps:$4 sm:$0xff]   ;;  %v1037_v21 = vld [vmem:[#allocation11] sm:$0xff] }
  0xa0   :  { %v1041_v22 = vld [vmem:[#allocation11 + $0x20] sm:$0xff] }
  0xa1   :  { %458 = vmatpush1.bf16.msra.mxu0 %v3665_v18  ;;  %952 = vmatpush1.bf16.msra.mxu1 %v3735_v45  ;;  %v3760_v18 = vld [vmem:[#allocation8 + $0x1e4] ss:$16 sps:$4 sm:$0xff]   ;;  %v3326_v24 = vcombine.high %v1037_v21, %v1041_v22 }
  0xa2   :  { %459 = vmatprep.subr.bf16.mxu0 %v3666_v19  ;;  %953 = vmatprep.subr.bf16.mxu1 %v3736_v47  ;;  %v3762_v19 = vld [vmem:[#allocation8 + $0x1e0] ss:$16 sps:$4 sm:$0xff]   ;;  %v1045_v25 = vld [vmem:[#allocation11 + $0x40] sm:$0xff] }
  0xa3   :  { %v1053_v29 = vld [vmem:[#allocation11 + $0x80] sm:$0xff] }
  0xa4   :  { %v1061_v33 = vld [vmem:[#allocation11 + $0xc0] sm:$0xff] }
  0xa5   :  { %460 = vmatpush1.bf16.msra.mxu0 %v3668_v20  ;;  %954 = vmatpush1.bf16.msra.mxu1 %v3738_v50  ;;  %v3765_v20 = vld [vmem:[#allocation8 + $0xc] ss:$16 sps:$4 sm:$0xff]   ;;  %v1069_v37 = vld [vmem:[#allocation11 + $0x100] sm:$0xff] }
  0xa6   :  { %461 = vmatprep.subr.bf16.mxu0 %v3669_v23  ;;  %955 = vmatprep.subr.bf16.mxu1 %v3739_v53  ;;  %v3325_v23 = vcombine.low %v1037_v21, %v1041_v22  ;;  %v1077_v41 = vld [vmem:[#allocation11 + $0x140] sm:$0xff] }
  0xa7   :  { %v1085_v45 = vld [vmem:[#allocation11 + $0x180] sm:$0xff] }
  0xa8   :  { %v1097_v50 = vld [vmem:[#allocation11 + $0x1e0] sm:$0xff] }
  0xa9   :  { %462 = vmatpush1.bf16.msra.mxu0 %v3671_v26  ;;  %956 = vmatpush1.bf16.msra.mxu1 %v3741_v54  ;;  %v1049_v26 = vld [vmem:[#allocation11 + $0x60] sm:$0xff] }
  0xaa   :  { %463 = vmatprep.subr.bf16.mxu0 %v3672_v28  ;;  %957 = vmatprep.subr.bf16.mxu1 %v3742_v57  ;;  %v3334_v27 = vcombine.high %v1045_v25, %v1049_v26  ;;  %v3333_v28 = vcombine.low %v1045_v25, %v1049_v26  ;;  %v1101_v53 = vld [vmem:[#allocation11 + $0x200] sm:$0xff] }
  0xab   :  { %v1105_v54 = vld [vmem:[#allocation11 + $0x220] sm:$0xff] }
  0xac   :  { %v1109_v57 = vld [vmem:[#allocation11 + $0x240] sm:$0xff] }
  0xad   :  { %464 = vmatpush1.bf16.msra.mxu0 %v3674_v30  ;;  %958 = vmatpush1.bf16.msra.mxu1 %v3744_v59  ;;  %v1057_v30 = vld [vmem:[#allocation11 + $0xa0] sm:$0xff] }
  0xae   :  { %465 = vmatprep.subr.bf16.mxu0 %v3675_v32  ;;  %959 = vmatprep.subr.bf16.mxu1 %v3745_v61  ;;  %v3342_v31 = vcombine.high %v1053_v29, %v1057_v30  ;;  %v3341_v32 = vcombine.low %v1053_v29, %v1057_v30  ;;  %v1117_v61 = vld [vmem:[#allocation11 + $0x280] sm:$0xff] }
  0xb1   :  { %466 = vmatpush1.bf16.msra.mxu0 %v3677_v34  ;;  %960 = vmatpush1.bf16.msra.mxu1 %v3747_v63  ;;  %v1065_v34 = vld [vmem:[#allocation11 + $0xe0] sm:$0xff]  ;;  %v191_v63 = vlaneseq }
  0xb2   :  { %467 = vmatprep.subr.bf16.mxu0 %v3678_v36  ;;  %961 = vmatprep.subr.bf16.mxu1 %v3748_v1  ;;  %v3350_v35 = vcombine.high %v1061_v33, %v1065_v34  ;;  %v3349_v36 = vcombine.low %v1061_v33, %v1065_v34  ;;  %v3763_v34 = vld [vmem:[#allocation8 + $0x8] ss:$16 sps:$4 sm:$0xff]  }
  0xb5   :  { %468 = vmatpush1.bf16.msra.mxu0 %v3680_v38  ;;  %962 = vmatpush1.bf16.msra.mxu1 %v3750_v3  ;;  %v1073_v38 = vld [vmem:[#allocation11 + $0x120] sm:$0xff] }
  0xb6   :  { %469 = vmatprep.subr.bf16.mxu0 %v3681_v40  ;;  %963 = vmatprep.subr.bf16.mxu1 %v3751_v5  ;;  %v3358_v39 = vcombine.high %v1069_v37, %v1073_v38  ;;  %v3357_v40 = vcombine.low %v1069_v37, %v1073_v38  ;;  %v1129_v3 = vld [vmem:[#allocation11 + $0x2e0] sm:$0xff]  ;;  %v3771_v37 = vld [vmem:[#allocation8 + $0x4c] ss:$16 sps:$4 sm:$0xff]  }
  0xb7   :  { %v3769_v38 = vld [vmem:[#allocation8 + $0x48] ss:$16 sps:$4 sm:$0xff]  }
  0xb9   :  { %470 = vmatpush1.bf16.msra.mxu0 %v3683_v42  ;;  %964 = vmatpush1.bf16.msra.mxu1 %v3753_v7  ;;  %v1081_v42 = vld [vmem:[#allocation11 + $0x160] sm:$0xff] }
  0xba   :  { %471 = vmatprep.subr.bf16.mxu0 %v3684_v44  ;;  %965 = vmatprep.subr.bf16.mxu1 %v3754_v9  ;;  %v3366_v43 = vcombine.high %v1077_v41, %v1081_v42  ;;  %v3365_v44 = vcombine.low %v1077_v41, %v1081_v42  ;;  %v1133_v7 = vld [vmem:[#allocation11 + $0x300] sm:$0xff]  ;;  %v3777_v41 = vld [vmem:[#allocation8 + $0x8c] ss:$16 sps:$4 sm:$0xff]  }
  0xbb   :  { %v3775_v42 = vld [vmem:[#allocation8 + $0x88] ss:$16 sps:$4 sm:$0xff]  }
  0xbd   :  { %472 = vmatpush1.bf16.msra.mxu0 %v3686_v46  ;;  %966 = vmatpush1.bf16.msra.mxu1 %v3756_v11  ;;  %v1089_v46 = vld [vmem:[#allocation11 + $0x1a0] sm:$0xff]  ;;  %v189_v11 = vld [vmem:[#allocation7] sm:$0x3] }
  0xbe   :  { %484 = vmatprep.subr.bf16.mxu0 %v3692_v48  ;;  %967 = vmatprep.subr.bf16.mxu1 %v3757_v16  ;;  %v3374_v47 = vcombine.high %v1085_v45, %v1089_v46  ;;  %v3373_v48 = vcombine.low %v1085_v45, %v1089_v46  ;;  %v3783_v45 = vld [vmem:[#allocation8 + $0xcc] ss:$16 sps:$4 sm:$0xff]   ;;  %v3781_v46 = vld [vmem:[#allocation8 + $0xc8] ss:$16 sps:$4 sm:$0xff]  }
  0xc0   :  { %474 = vmatmul.mubr.bf16.vlgmr.msra.gmra.mrb[0].mxu0 %v3687_v49  ;;  %v1093_v49 = vld [vmem:[#allocation11 + $0x1c0] sm:$0xff] }
  0xc1   :  { %485 = vmatpush1.bf16.msra.mxu0 %v3690_v51  ;;  %516 = vmatprep.mubr.bf16.mxu0 %v4012_v56  ;;  %v3382_v51 = vcombine.high %v1093_v49, %v1097_v50  ;;  %v3389_v56 = vcombine.low %v1101_v53, %v1105_v54 }
  0xc2   :  { %486 = vmatprep.subr.bf16.mxu0 %v3695_v52  ;;  %968 = vmatpush1.bf16.msra.mxu1 %v3759_v17  ;;  %v3381_v52 = vcombine.low %v1093_v49, %v1097_v50  ;;  %v3789_v49 = vld [vmem:[#allocation8 + $0x10c] ss:$16 sps:$4 sm:$0xff]   ;;  %v3787_v50 = vld [vmem:[#allocation8 + $0x108] ss:$16 sps:$4 sm:$0xff]  }
  0xc3   :  { %969 = vmatprep.subr.bf16.mxu1 %v3760_v18 }
  0xc5   :  { %487 = vmatpush1.bf16.msra.mxu0 %v3693_v55  ;;  %v3390_v55 = vcombine.high %v1101_v53, %v1105_v54  ;;  %v3795_v53 = vld [vmem:[#allocation8 + $0x14c] ss:$16 sps:$4 sm:$0xff]   ;;  %v3793_v54 = vld [vmem:[#allocation8 + $0x148] ss:$16 sps:$4 sm:$0xff]  }
  0xc6   :  { %488 = vmatprep.subr.bf16.mxu0 %v3698_v58  ;;  %970 = vmatpush1.bf16.msra.mxu1 %v3762_v19  ;;  %v1113_v58 = vld [vmem:[#allocation11 + $0x260] sm:$0xff] }
  0xc7   :  { %982 = vmatprep.subr.bf16.mxu1 %v3765_v20  ;;  %v3398_v59 = vcombine.high %v1109_v57, %v1113_v58 }
  0xc9   :  { %489 = vmatpush1.bf16.msra.mxu0 %v3696_v60  ;;  %v3397_v60 = vcombine.low %v1109_v57, %v1113_v58  ;;  %v3801_v57 = vld [vmem:[#allocation8 + $0x18c] ss:$16 sps:$4 sm:$0xff]   ;;  %v3799_v58 = vld [vmem:[#allocation8 + $0x188] ss:$16 sps:$4 sm:$0xff]  }
  0xca   :  { %490 = vmatprep.subr.bf16.mxu0 %v3701_v62  ;;  %v1121_v62 = vld [vmem:[#allocation11 + $0x2a0] sm:$0xff] }
  0xcb   :  { %v3405_v1 = vcombine.low %v1117_v61, %v1121_v62 }
  0xcd   :  { %491 = vmatpush1.bf16.msra.mxu0 %v3699_v0  ;;  %v3406_v0 = vcombine.high %v1117_v61, %v1121_v62  ;;  %v3807_v61 = vld [vmem:[#allocation8 + $0x1cc] ss:$16 sps:$4 sm:$0xff]   ;;  %v3805_v62 = vld [vmem:[#allocation8 + $0x1c8] ss:$16 sps:$4 sm:$0xff]  }
  0xce   :  { %492 = vmatprep.subr.bf16.mxu0 %v3704_v2  ;;  %v1125_v2 = vld [vmem:[#allocation11 + $0x2c0] sm:$0xff] }
  0xcf   :  { %v3414_v5 = vcombine.high %v1125_v2, %v1129_v3 }
  0xd1   :  { %493 = vmatpush1.bf16.msra.mxu0 %v3702_v4  ;;  %v4142_v4 = vshrl.u32 %v191_v63, 7  ;;  %v3810_v63 = vld [vmem:[#allocation8 + $0x1ec] ss:$16 sps:$4 sm:$0xff]  }
  0xd2   :  { %494 = vmatprep.subr.bf16.mxu0 %v3707_v6  ;;  %v3413_v6 = vcombine.low %v1125_v2, %v1129_v3  ;;  %v3808_v2 = vld [vmem:[#allocation8 + $0x1e8] ss:$16 sps:$4 sm:$0xff]  }
  0xd3   :  { %v4145_v9 = vsub.s32 0, %v4142_v4 }
  0xd5   :  { %495 = vmatpush1.bf16.msra.mxu0 %v3705_v8  ;;  %v1137_v8 = vld [vmem:[#allocation11 + $0x320] sm:$0xff]  ;;  %v194_v16 = vrot.slane %v189_v11, %v4145_v9 }
  0xd6   :  { %496 = vmatprep.subr.bf16.mxu0 %v3710_v10  ;;  %v3422_v10 = vcombine.high %v1133_v7, %v1137_v8 }
  0xd9   :  { %497 = vmatpush1.bf16.msra.mxu0 %v3708_v12  ;;  %v4148_v12 = vsub.s32 1, %v4142_v4 }
  0xda   :  { %498 = vmatprep.subr.bf16.mxu0 %v3713_v13  ;;  %v3421_v13 = vcombine.low %v1133_v7, %v1137_v8 }
  0xdb   :  { %v198_v18 = vrot.slane %v189_v11, %v4148_v12  ;;  %v1058_v11 = vld [vmem:[#allocation11 + $0xa8] sm:$0xff] }
  0xdd   :  { %499 = vmatpush1.bf16.msra.mxu0 %v3711_v14  ;;  %v1141_v14 = vld [vmem:[#allocation11 + $0x340] sm:$0xff] }
  0xde   :  { %2615 = vmatprep.subr.bf16.mxu0 %v3326_v24 }
  0xe0   :  { %3260 = vmatmul.mubr.msk.bf16.vlgmr.msra.gmra.mrb[0].mxu0 %vm136_vm0, %v3714_v15  ;;  %v1145_v15 = vld [vmem:[#allocation11 + $0x360] sm:$0xff] }
  0xe1   :  { %2616 = vmatpush1.bf16.msra.mxu0 %v3325_v23  ;;  %v3430_v17 = vcombine.high %v1141_v14, %v1145_v15  ;;  %v3429_v19 = vcombine.low %v1141_v14, %v1145_v15  ;;  %v1062_v15 = vld [vmem:[#allocation11 + $0xc8] sm:$0xff] }
  0xe2   :  { %2617 = vmatprep.subr.bf16.mxu0 %v3334_v27 }
  0xe5   :  { %2618 = vmatpush1.bf16.msra.mxu0 %v3333_v28 }
  0xe6   :  { %2619 = vmatprep.subr.bf16.mxu0 %v3342_v31 }
  0xe9   :  { %2620 = vmatpush1.bf16.msra.mxu0 %v3341_v32 }
  0xea   :  { %2621 = vmatprep.subr.bf16.mxu0 %v3350_v35  ;;  %v3768_v35 = vld [vmem:[#allocation8 + $0x2c] ss:$16 sps:$4 sm:$0xff]  }
  0xed   :  { %2622 = vmatpush1.bf16.msra.mxu0 %v3349_v36  ;;  %v3766_v36 = vld [vmem:[#allocation8 + $0x28] ss:$16 sps:$4 sm:$0xff]  }
  0xee   :  { %2623 = vmatprep.subr.bf16.mxu0 %v3358_v39  ;;  %v3774_v39 = vld [vmem:[#allocation8 + $0x6c] ss:$16 sps:$4 sm:$0xff]  }
  0xf1   :  { %2624 = vmatpush1.bf16.msra.mxu0 %v3357_v40  ;;  %v3772_v40 = vld [vmem:[#allocation8 + $0x68] ss:$16 sps:$4 sm:$0xff]  }
  0xf2   :  { %2625 = vmatprep.subr.bf16.mxu0 %v3366_v43  ;;  %v3780_v43 = vld [vmem:[#allocation8 + $0xac] ss:$16 sps:$4 sm:$0xff]  }
  0xf5   :  { %2626 = vmatpush1.bf16.msra.mxu0 %v3365_v44  ;;  %v3778_v44 = vld [vmem:[#allocation8 + $0xa8] ss:$16 sps:$4 sm:$0xff]  }
  0xf6   :  { %2627 = vmatprep.subr.bf16.mxu0 %v3374_v47  ;;  %v3786_v47 = vld [vmem:[#allocation8 + $0xec] ss:$16 sps:$4 sm:$0xff]  }
  0xf9   :  { %2628 = vmatpush1.bf16.msra.mxu0 %v3373_v48  ;;  %v3784_v48 = vld [vmem:[#allocation8 + $0xe8] ss:$16 sps:$4 sm:$0xff]  }
  0xfa   :  { %2629 = vmatprep.subr.bf16.mxu0 %v3382_v51  ;;  %v3792_v51 = vld [vmem:[#allocation8 + $0x12c] ss:$16 sps:$4 sm:$0xff]  }
  0xfd   :  { %2630 = vmatpush1.bf16.msra.mxu0 %v3381_v52  ;;  %v3790_v52 = vld [vmem:[#allocation8 + $0x128] ss:$16 sps:$4 sm:$0xff]  }
  0xfe   :  { %2631 = vmatprep.subr.bf16.mxu0 %v3390_v55  ;;  %v3798_v55 = vld [vmem:[#allocation8 + $0x16c] ss:$16 sps:$4 sm:$0xff]  }
 0x101   :  { %2632 = vmatpush1.bf16.msra.mxu0 %v3389_v56  ;;  %v3796_v56 = vld [vmem:[#allocation8 + $0x168] ss:$16 sps:$4 sm:$0xff]  }
 0x102   :  { %2633 = vmatprep.subr.bf16.mxu0 %v3398_v59  ;;  %v3804_v59 = vld [vmem:[#allocation8 + $0x1ac] ss:$16 sps:$4 sm:$0xff]  }
 0x105   :  { %2634 = vmatpush1.bf16.msra.mxu0 %v3397_v60  ;;  %v3802_v60 = vld [vmem:[#allocation8 + $0x1a8] ss:$16 sps:$4 sm:$0xff]  }
 0x106   :  { %2635 = vmatprep.subr.bf16.mxu0 %v3406_v0  ;;  %v1038_v0 = vld [vmem:[#allocation11 + $0x8] sm:$0xff] }
 0x109   :  { %2636 = vmatpush1.bf16.msra.mxu0 %v3405_v1  ;;  %v1042_v1 = vld [vmem:[#allocation11 + $0x28] sm:$0xff] }
 0x10a   :  { %2637 = vmatprep.subr.bf16.mxu0 %v3414_v5  ;;  %v3328_v3 = vcombine.high %v1038_v0, %v1042_v1  ;;  %v1046_v5 = vld [vmem:[#allocation11 + $0x48] sm:$0xff]  ;;  %v3327_v7 = vcombine.low %v1038_v0, %v1042_v1 }
 0x10d   :  { %2638 = vmatpush1.bf16.msra.mxu0 %v3413_v6  ;;  %v1050_v6 = vld [vmem:[#allocation11 + $0x68] sm:$0xff] }
 0x10e   :  { %2639 = vmatprep.subr.bf16.mxu0 %v3422_v10  ;;  %v3336_v8 = vcombine.high %v1046_v5, %v1050_v6  ;;  %v1054_v10 = vld [vmem:[#allocation11 + $0x88] sm:$0xff] }
 0x10f   :  { %v3344_v14 = vcombine.high %v1054_v10, %v1058_v11 }
 0x111   :  { %2640 = vmatpush1.bf16.msra.mxu0 %v3421_v13  ;;  %v3335_v13 = vcombine.low %v1046_v5, %v1050_v6 }
 0x112   :  { %2641 = vmatprep.subr.bf16.mxu0 %v3430_v17  ;;  %v3343_v17 = vcombine.low %v1054_v10, %v1058_v11 }
 0x115   :  { %2642 = vmatpush1.bf16.msra.mxu0 %v3429_v19  ;;  %v1070_v19 = vld [vmem:[#allocation11 + $0x108] sm:$0xff] }
 0x1b3   :  { %v518_v20 = vpop.f32.mrb[0].mxu0 }
 0x1b4   :  { %v3581_v21 = vadd.f32 %v518_v20, %v194_v16  ;;  %v520_v22 = vpop.f32.mrb[1].mxu0  ;;  %v1074_v20 = vld [vmem:[#allocation11 + $0x128] sm:$0xff] }
 0x1b5   :  { %v3582_v23 = vadd.f32 %v520_v22, %v198_v18  ;;  %v522_v24 = vpop.f32.mrb[2].mxu0  ;;  %v3360_v22 = vcombine.high %v1070_v19, %v1074_v20 }
 0x1b6   :  { %v3583_v25 = vadd.f32 %v522_v24, %v194_v16  ;;  %v524_v26 = vpop.f32.mrb[3].mxu0  ;;  %v527_v28 = vmax.f32 %v3581_v21, 0.0  ;;  %v1066_v16 = vld [vmem:[#allocation11 + $0xe8] sm:$0xff] }
 0x1b7   :  { %v3584_v27 = vadd.f32 %v524_v26, %v198_v18  ;;  %v528_v30 = vmax.f32 %v3582_v23, 0.0  ;;  %v3352_v18 = vcombine.high %v1062_v15, %v1066_v16  ;;  %v3351_v21 = vcombine.low %v1062_v15, %v1066_v16  ;;  %v1078_v23 = vld [vmem:[#allocation11 + $0x148] sm:$0xff] }
 0x1b8   :  { %v529_v29 = vmax.f32 %v3583_v25, 0.0  ;;  %v1082_v24 = vld [vmem:[#allocation11 + $0x168] sm:$0xff]  ;;  %v3359_v25 = vcombine.low %v1070_v19, %v1074_v20 }
 0x1b9   :  { %v530_v31 = vmax.f32 %v3584_v27, 0.0  ;;  %v3368_v26 = vcombine.high %v1078_v23, %v1082_v24  ;;  %v1086_v27 = vld [vmem:[#allocation11 + $0x188] sm:$0xff] }
 0x1ba   :  { %v4152_v32 = vpack.c.bf16 %v529_v29, %v527_v28  ;;  %v1090_v28 = vld [vmem:[#allocation11 + $0x1a8] sm:$0xff]  ;;  %v3367_v29 = vcombine.low %v1078_v23, %v1082_v24  ;;  %v4172_v23 = vld [vmem:[#allocation10] sm:$0xf] }
 0x1bb   :  { %v532_v33 = vpack.c.bf16 %v530_v31, %v528_v30  ;;  %v3376_v30 = vcombine.high %v1086_v27, %v1090_v28  ;;  %v1094_v31 = vld [vmem:[#allocation11 + $0x1c8] sm:$0xff]  ;;  %v602_v24 = vrot.slane %v4172_v23, %v4145_v9 }
 0x1bd   :  { %971 = vmatprep.mubr.bf16.mxu1 %v532_v33 }
 0x1be   :  { %972 = vmatmul.mubr.bf16.vlgmr.msra.gmra.mrb[0].mxu1 %v4152_v32 }
 0x1bf   :  { %983 = vmatpush1.bf16.msra.mxu1 %v3763_v34  ;;  %1014 = vmatprep.mubr.bf16.mxu1 %v532_v33  ;;  %v1149_v33 = vld [vmem:[#allocation11 + $0x380] sm:$0xff] }
 0x1c0   :  { %984 = vmatprep.subr.bf16.mxu1 %v3768_v35  ;;  %v1153_v34 = vld [vmem:[#allocation11 + $0x3a0] sm:$0xff] }
 0x1c1   :  { %v3438_v35 = vcombine.high %v1149_v33, %v1153_v34 }
 0x1c3   :  { %985 = vmatpush1.bf16.msra.mxu1 %v3766_v36  ;;  %v3375_v36 = vcombine.low %v1086_v27, %v1090_v28  ;;  %2643 = vmatprep.subr.bf16.mxu0 %v3438_v35 }
 0x1c4   :  { %986 = vmatprep.subr.bf16.mxu1 %v3771_v37  ;;  %v3437_v37 = vcombine.low %v1149_v33, %v1153_v34 }
 0x1c6   :  { %2644 = vmatpush1.bf16.msra.mxu0 %v3437_v37 }
 0x1c7   :  { %987 = vmatpush1.bf16.msra.mxu1 %v3769_v38 }
 0x1c8   :  { %988 = vmatprep.subr.bf16.mxu1 %v3774_v39  ;;  %v1102_v39 = vld [vmem:[#allocation11 + $0x208] sm:$0xff] }
 0x1cb   :  { %989 = vmatpush1.bf16.msra.mxu1 %v3772_v40  ;;  %v1106_v40 = vld [vmem:[#allocation11 + $0x228] sm:$0xff] }
 0x1cc   :  { %990 = vmatprep.subr.bf16.mxu1 %v3777_v41  ;;  %v1157_v41 = vld [vmem:[#allocation11 + $0x3c0] sm:$0xff] }
 0x1cf   :  { %991 = vmatpush1.bf16.msra.mxu1 %v3775_v42  ;;  %v1161_v42 = vld [vmem:[#allocation11 + $0x3e0] sm:$0xff] }
 0x1d0   :  { %992 = vmatprep.subr.bf16.mxu1 %v3780_v43  ;;  %v3446_v43 = vcombine.high %v1157_v41, %v1161_v42 }
 0x1d2   :  { %2645 = vmatprep.subr.bf16.mxu0 %v3446_v43 }
 0x1d3   :  { %993 = vmatpush1.bf16.msra.mxu1 %v3778_v44 }
 0x1d4   :  { %994 = vmatprep.subr.bf16.mxu1 %v3783_v45  ;;  %v3445_v45 = vcombine.low %v1157_v41, %v1161_v42  ;;  %v1178_v41 = vld [vmem:[#allocation11 + $0x468] sm:$0xff] }
 0x1d6   :  { %2646 = vmatpush1.bf16.msra.mxu0 %v3445_v45 }
 0x1d7   :  { %995 = vmatpush1.bf16.msra.mxu1 %v3781_v46  ;;  %v3392_v46 = vcombine.high %v1102_v39, %v1106_v40 }
 0x1d8   :  { %996 = vmatprep.subr.bf16.mxu1 %v3786_v47  ;;  %v1110_v47 = vld [vmem:[#allocation11 + $0x248] sm:$0xff] }
 0x1db   :  { %997 = vmatpush1.bf16.msra.mxu1 %v3784_v48  ;;  %v1114_v48 = vld [vmem:[#allocation11 + $0x268] sm:$0xff] }
 0x1dc   :  { %998 = vmatprep.subr.bf16.mxu1 %v3789_v49  ;;  %v4156_v49 = vld [vmem:[#allocation11 + $0x400] sm:$0xff] }
 0x1df   :  { %999 = vmatpush1.bf16.msra.mxu1 %v3787_v50  ;;  %v4158_v50 = vld [vmem:[#allocation11 + $0x420] sm:$0xff] }
 0x1e0   :  { %1000 = vmatprep.subr.bf16.mxu1 %v3792_v51  ;;  %v4160_v51 = vld [vmem:[#allocation11 + $0x408] sm:$0xff] }
 0x1e3   :  { %1001 = vmatpush1.bf16.msra.mxu1 %v3790_v52  ;;  %v3454_v52 = vcombine.high %v4156_v49, %v4158_v50 }
 0x1e4   :  { %1002 = vmatprep.subr.bf16.mxu1 %v3795_v53  ;;  %v4164_v53 = vld [vmem:[#allocation11 + $0x428] sm:$0xff] }
 0x1e5   :  { %2658 = vmatprep.subr.bf16.mxu0 %v3454_v52  ;;  %v1186_v52 = vld [vmem:[#allocation11 + $0x4a8] sm:$0xff] }
 0x1e7   :  { %1003 = vmatpush1.bf16.msra.mxu1 %v3793_v54  ;;  %v3391_v54 = vcombine.low %v1102_v39, %v1106_v40  ;;  %v1177_v39 = vld [vmem:[#allocation11 + $0x460] sm:$0xff]  ;;  %v1174_v40 = vld [vmem:[#allocation11 + $0x448] sm:$0xff] }
 0x1e8   :  { %1004 = vmatprep.subr.bf16.mxu1 %v3798_v55  ;;  %v3453_v55 = vcombine.low %v4156_v49, %v4158_v50  ;;  %v3464_v45 = vcombine.high %v1174_v40, %v1178_v41 }
 0x1eb   :  { %1005 = vmatpush1.bf16.msra.mxu1 %v3796_v56  ;;  %v3455_v56 = vcombine.low %v4160_v51, %v4164_v53 }
 0x1ec   :  { %1006 = vmatprep.subr.bf16.mxu1 %v3801_v57  ;;  %v3400_v57 = vcombine.high %v1110_v47, %v1114_v48 }
 0x1ef   :  { %1007 = vmatpush1.bf16.msra.mxu1 %v3799_v58  ;;  %v1118_v58 = vld [vmem:[#allocation11 + $0x288] sm:$0xff] }
 0x1f0   :  { %1008 = vmatprep.subr.bf16.mxu1 %v3804_v59  ;;  %v1122_v59 = vld [vmem:[#allocation11 + $0x2a8] sm:$0xff] }
 0x1f1   :  { %v3407_v0 = vcombine.low %v1118_v58, %v1122_v59 }
 0x1f3   :  { %1009 = vmatpush1.bf16.msra.mxu1 %v3802_v60  ;;  %v3399_v60 = vcombine.low %v1110_v47, %v1114_v48  ;;  %v1185_v47 = vld [vmem:[#allocation11 + $0x4a0] sm:$0xff]  ;;  %v1182_v48 = vld [vmem:[#allocation11 + $0x488] sm:$0xff] }
 0x1f4   :  { %1010 = vmatprep.subr.bf16.mxu1 %v3807_v61  ;;  %v3408_v61 = vcombine.high %v1118_v58, %v1122_v59  ;;  %v3472_v59 = vcombine.high %v1182_v48, %v1186_v52 }
 0x1f7   :  { %1011 = vmatpush1.bf16.msra.mxu1 %v3805_v62  ;;  %v1126_v62 = vld [vmem:[#allocation11 + $0x2c8] sm:$0xff] }
 0x1f8   :  { %1012 = vmatprep.subr.bf16.mxu1 %v3810_v63  ;;  %v1130_v63 = vld [vmem:[#allocation11 + $0x2e8] sm:$0xff] }
 0x1f9   :  { %v3416_v1 = vcombine.high %v1126_v62, %v1130_v63  ;;  %v3415_v5 = vcombine.low %v1126_v62, %v1130_v63  ;;  %v1190_v62 = vld [vmem:[#allocation11 + $0x4c8] sm:$0xff] }
 0x1fa   :  { %v1194_v63 = vld [vmem:[#allocation11 + $0x4e8] sm:$0xff] }
 0x1fb   :  { %1013 = vmatpush1.bf16.msra.mxu1 %v3808_v2  ;;  %v1134_v2 = vld [vmem:[#allocation11 + $0x308] sm:$0xff]  ;;  %v3480_v50 = vcombine.high %v1190_v62, %v1194_v63 }
 0x1fc   :  { %2701 = vmatprep.subr.bf16.mxu1 %v3328_v3  ;;  %v1138_v3 = vld [vmem:[#allocation11 + $0x328] sm:$0xff] }
 0x1fd   :  { %v3424_v6 = vcombine.high %v1134_v2, %v1138_v3  ;;  %v3423_v10 = vcombine.low %v1134_v2, %v1138_v3  ;;  %v3479_v3 = vcombine.low %v1190_v62, %v1194_v63 }
 0x1fe   :  { %1015 = vmatmul.mubr.bf16.vlgmr.msra.gmra.mrb[4].mxu1 %v4152_v32  ;;  %v1098_v32 = vld [vmem:[#allocation11 + $0x1e8] sm:$0xff] }
 0x1ff   :  { %2702 = vmatpush1.bf16.msra.mxu1 %v3327_v7  ;;  %v3384_v38 = vcombine.high %v1094_v31, %v1098_v32  ;;  %v3383_v44 = vcombine.low %v1094_v31, %v1098_v32  ;;  %v1142_v7 = vld [vmem:[#allocation11 + $0x348] sm:$0xff] }
 0x200   :  { %2703 = vmatprep.subr.bf16.mxu1 %v3336_v8  ;;  %v1146_v8 = vld [vmem:[#allocation11 + $0x368] sm:$0xff] }
 0x201   :  { %v3432_v11 = vcombine.high %v1142_v7, %v1146_v8  ;;  %v3431_v15 = vcombine.low %v1142_v7, %v1146_v8  ;;  %v1205_v7 = vld [vmem:[#allocation11 + $0x540] sm:$0xff] }
 0x202   :  { %v1209_v8 = vld [vmem:[#allocation11 + $0x560] sm:$0xff] }
 0x203   :  { %2704 = vmatpush1.bf16.msra.mxu1 %v3335_v13  ;;  %v1150_v13 = vld [vmem:[#allocation11 + $0x388] sm:$0xff] }
 0x204   :  { %2705 = vmatprep.subr.bf16.mxu1 %v3344_v14  ;;  %v1154_v14 = vld [vmem:[#allocation11 + $0x3a8] sm:$0xff] }
 0x205   :  { %v3440_v16 = vcombine.high %v1150_v13, %v1154_v14  ;;  %v3439_v19 = vcombine.low %v1150_v13, %v1154_v14 }
 0x207   :  { %2706 = vmatpush1.bf16.msra.mxu1 %v3343_v17  ;;  %v1158_v17 = vld [vmem:[#allocation11 + $0x3c8] sm:$0xff] }
 0x208   :  { %2707 = vmatprep.subr.bf16.mxu1 %v3352_v18  ;;  %v1162_v18 = vld [vmem:[#allocation11 + $0x3e8] sm:$0xff] }
 0x209   :  { %v3448_v20 = vcombine.high %v1158_v17, %v1162_v18 }
 0x20b   :  { %2708 = vmatpush1.bf16.msra.mxu1 %v3351_v21  ;;  %v3447_v21 = vcombine.low %v1158_v17, %v1162_v18  ;;  %v1213_v17 = vld [vmem:[#allocation11 + $0x580] sm:$0xff] }
 0x20c   :  { %2709 = vmatprep.subr.bf16.mxu1 %v3360_v22  ;;  %v3456_v22 = vcombine.high %v4160_v51, %v4164_v53  ;;  %v1197_v51 = vld [vmem:[#allocation11 + $0x500] sm:$0xff] }
 0x20d   :  { %v1201_v53 = vld [vmem:[#allocation11 + $0x520] sm:$0xff] }
 0x20e   :  { %v3485_v13 = vcombine.low %v1197_v51, %v1201_v53  ;;  %v1217_v18 = vld [vmem:[#allocation11 + $0x5a0] sm:$0xff] }
 0x20f   :  { %2710 = vmatpush1.bf16.msra.mxu1 %v3359_v25  ;;  %v606_v25 = vrot.slane %v4172_v23, %v4148_v12 }
 0x210   :  { %2711 = vmatprep.subr.bf16.mxu1 %v3368_v26 }
 0x213   :  { %2712 = vmatpush1.bf16.msra.mxu1 %v3367_v29 }
 0x214   :  { %2713 = vmatprep.subr.bf16.mxu1 %v3376_v30 }
 0x217   :  { %2714 = vmatpush1.bf16.msra.mxu1 %v3375_v36  ;;  %v1173_v36 = vld [vmem:[#allocation11 + $0x440] sm:$0xff] }
 0x218   :  { %2715 = vmatprep.subr.bf16.mxu1 %v3384_v38 }
 0x21b   :  { %2716 = vmatpush1.bf16.msra.mxu1 %v3383_v44  ;;  %v3462_v44 = vcombine.high %v1173_v36, %v1177_v39 }
 0x21c   :  { %2717 = vmatprep.subr.bf16.mxu1 %v3392_v46  ;;  %v1181_v46 = vld [vmem:[#allocation11 + $0x480] sm:$0xff] }
 0x21d   :  { %v3470_v58 = vcombine.high %v1181_v46, %v1185_v47 }
 0x21f   :  { %2718 = vmatpush1.bf16.msra.mxu1 %v3391_v54  ;;  %v3461_v54 = vcombine.low %v1173_v36, %v1177_v39  ;;  %v1230_v36 = vld [vmem:[#allocation11 + $0x608] sm:$0xff] }
 0x220   :  { %2719 = vmatprep.subr.bf16.mxu1 %v3400_v57  ;;  %v3463_v57 = vcombine.low %v1174_v40, %v1178_v41 }
 0x223   :  { %2720 = vmatpush1.bf16.msra.mxu1 %v3399_v60  ;;  %v1189_v60 = vld [vmem:[#allocation11 + $0x4c0] sm:$0xff] }
 0x224   :  { %2721 = vmatprep.subr.bf16.mxu1 %v3408_v61  ;;  %v1193_v61 = vld [vmem:[#allocation11 + $0x4e0] sm:$0xff] }
 0x225   :  { %v3478_v49 = vcombine.high %v1189_v60, %v1193_v61  ;;  %v3477_v2 = vcombine.low %v1189_v60, %v1193_v61  ;;  %v1246_v60 = vld [vmem:[#allocation11 + $0x688] sm:$0xff] }
 0x226   :  { %v1250_v61 = vld [vmem:[#allocation11 + $0x6a8] sm:$0xff] }
 0x227   :  { %2722 = vmatpush1.bf16.msra.mxu1 %v3407_v0  ;;  %v3469_v0 = vcombine.low %v1181_v46, %v1185_v47  ;;  %v1238_v46 = vld [vmem:[#allocation11 + $0x648] sm:$0xff] }
 0x228   :  { %2723 = vmatprep.subr.bf16.mxu1 %v3416_v1  ;;  %v3471_v1 = vcombine.low %v1182_v48, %v1186_v52  ;;  %v1242_v47 = vld [vmem:[#allocation11 + $0x668] sm:$0xff] }
 0x229   :  { %v3527_v63 = vcombine.low %v1238_v46, %v1242_v47 }
 0x22b   :  { %2724 = vmatpush1.bf16.msra.mxu1 %v3415_v5  ;;  %v3486_v5 = vcombine.high %v1197_v51, %v1201_v53  ;;  %v1254_v51 = vld [vmem:[#allocation11 + $0x6c8] sm:$0xff] }
 0x22c   :  { %2725 = vmatprep.subr.bf16.mxu1 %v3424_v6  ;;  %v1258_v53 = vld [vmem:[#allocation11 + $0x6e8] sm:$0xff] }
 0x22f   :  { %2726 = vmatpush1.bf16.msra.mxu1 %v3423_v10  ;;  %v1206_v10 = vld [vmem:[#allocation11 + $0x548] sm:$0xff] }
 0x230   :  { %2727 = vmatprep.subr.bf16.mxu1 %v3432_v11  ;;  %v1210_v11 = vld [vmem:[#allocation11 + $0x568] sm:$0xff] }
 0x233   :  { %2728 = vmatpush1.bf16.msra.mxu1 %v3431_v15  ;;  %v3494_v15 = vcombine.high %v1205_v7, %v1209_v8 }
 0x234   :  { %2729 = vmatprep.subr.bf16.mxu1 %v3440_v16  ;;  %v3496_v16 = vcombine.high %v1206_v10, %v1210_v11 }
 0x237   :  { %2730 = vmatpush1.bf16.msra.mxu1 %v3439_v19  ;;  %v1214_v19 = vld [vmem:[#allocation11 + $0x588] sm:$0xff] }
 0x238   :  { %2731 = vmatprep.subr.bf16.mxu1 %v3448_v20  ;;  %v1218_v20 = vld [vmem:[#allocation11 + $0x5a8] sm:$0xff] }
 0x23b   :  { %2732 = vmatpush1.bf16.msra.mxu1 %v3447_v21  ;;  %v3493_v21 = vcombine.low %v1205_v7, %v1209_v8  ;;  %v1262_v7 = vld [vmem:[#allocation11 + $0x708] sm:$0xff] }
 0x23c   :  { %2744 = vmatprep.subr.bf16.mxu1 %v3456_v22  ;;  %v3495_v22 = vcombine.low %v1206_v10, %v1210_v11  ;;  %v1266_v8 = vld [vmem:[#allocation11 + $0x728] sm:$0xff]  ;;  %v3543_v11 = vcombine.low %v1254_v51, %v1258_v53 }
 0x291   :  { %v973_v26 = vpop.f32.mrb[0].mxu1 }
 0x292   :  { %v974_v27 = vadd.f32 %v973_v26, %v602_v24  ;;  %v975_v28 = vpop.f32.mrb[1].mxu1  ;;  %v1221_v26 = vld [vmem:[#allocation11 + $0x5c0] sm:$0xff] }
 0x293   :  { %v976_v29 = vadd.f32 %v975_v28, %v606_v25  ;;  %v977_v30 = vpop.f32.mrb[2].mxu1  ;;  %v1222_v28 = vld [vmem:[#allocation11 + $0x5c8] sm:$0xff] }
 0x294   :  { %v978_v31 = vadd.f32 %v977_v30, %v602_v24  ;;  %v979_v32 = vpop.f32.mrb[3].mxu1  ;;  %v1025_v34 = vmax.f32 %v974_v27, 0.0  ;;  %v3502_v24 = vcombine.high %v1213_v17, %v1217_v18  ;;  %v1225_v27 = vld [vmem:[#allocation11 + $0x5e0] sm:$0xff]  ;;  %v3501_v30 = vcombine.low %v1213_v17, %v1217_v18  ;;  %v1270_v17 = vld [vmem:[#allocation11 + $0x748] sm:$0xff] }
 0x295   :  { %v980_v33 = vadd.f32 %v979_v32, %v606_v25  ;;  %v1026_v37 = vmax.f32 %v976_v29, 0.0  ;;  %v3504_v25 = vcombine.high %v1214_v19, %v1218_v20  ;;  %v1226_v29 = vld [vmem:[#allocation11 + $0x5e8] sm:$0xff]  ;;  %v3510_v32 = vcombine.high %v1221_v26, %v1225_v27 }
 0x296   :  { %v1029_v35 = vmax.f32 %v978_v31, 0.0  ;;  %v3503_v31 = vcombine.low %v1214_v19, %v1218_v20  ;;  %v3511_v39 = vcombine.low %v1222_v28, %v1226_v29  ;;  %v1274_v18 = vld [vmem:[#allocation11 + $0x768] sm:$0xff]  ;;  %v3551_v20 = vcombine.low %v1262_v7, %v1266_v8 }
 0x297   :  { %v1030_v38 = vmax.f32 %v980_v33, 0.0  ;;  %v3512_v33 = vcombine.high %v1222_v28, %v1226_v29  ;;  %v1278_v28 = vld [vmem:[#allocation11 + $0x788] sm:$0xff] }
 0x298   :  { %v4178_v42 = vpack.c.bf16 %v1029_v35, %v1025_v34  ;;  %v1229_v34 = vld [vmem:[#allocation11 + $0x600] sm:$0xff]  ;;  %v1282_v29 = vld [vmem:[#allocation11 + $0x7a8] sm:$0xff] }
 0x299   :  { %v4180_v43 = vpack.c.bf16 %v1030_v38, %v1026_v37  ;;  %v1233_v35 = vld [vmem:[#allocation11 + $0x620] sm:$0xff]  ;;  %v1234_v37 = vld [vmem:[#allocation11 + $0x628] sm:$0xff]  ;;  %v3509_v38 = vcombine.low %v1221_v26, %v1225_v27  ;;  %v613_v26 = vsub.s32 3, %v4142_v4 }
 0x29a   :  { %v3518_v40 = vcombine.high %v1229_v34, %v1233_v35  ;;  %v3520_v41 = vcombine.high %v1230_v36, %v1234_v37  ;;  %v3517_v48 = vcombine.low %v1229_v34, %v1233_v35  ;;  %v3519_v52 = vcombine.low %v1230_v36, %v1234_v37  ;;  %v1281_v27 = vld [vmem:[#allocation11 + $0x7a0] sm:$0xff] }
 0x29b   :  { %2647 = vmatprep.mubr.bf16.mxu0 %v4180_v43  ;;  %2733 = vmatprep.mubr.bf16.mxu1 %v4180_v43  ;;  %v3568_v34 = vcombine.high %v1278_v28, %v1282_v29  ;;  %v1285_v35 = vld [vmem:[#allocation11 + $0x7c0] sm:$0xff]  ;;  %v614_v36 = vrot.slane %v4172_v23, %v613_v26 }
 0x29c   :  { %2648 = vmatmul.mubr.bf16.vlgmr.msra.gmra.mrb[4].mxu0 %v4178_v42  ;;  %2734 = vmatmul.mubr.bf16.vlgmr.msra.gmra.mrb[8].mxu1 %v4178_v42  ;;  %v1289_v37 = vld [vmem:[#allocation11 + $0x7e0] sm:$0xff] }
 0x29d   :  { %2659 = vmatpush1.bf16.msra.mxu0 %v3453_v55  ;;  %2745 = vmatpush1.bf16.msra.mxu1 %v3455_v56  ;;  %v1198_v55 = vld [vmem:[#allocation11 + $0x508] sm:$0xff] }
 0x29e   :  { %2660 = vmatprep.subr.bf16.mxu0 %v3462_v44  ;;  %2746 = vmatprep.subr.bf16.mxu1 %v3464_v45  ;;  %v1202_v56 = vld [vmem:[#allocation11 + $0x528] sm:$0xff]  ;;  %v1237_v44 = vld [vmem:[#allocation11 + $0x640] sm:$0xff] }
 0x29f   :  { %v3488_v6 = vcombine.high %v1198_v55, %v1202_v56  ;;  %v3487_v14 = vcombine.low %v1198_v55, %v1202_v56  ;;  %v1241_v45 = vld [vmem:[#allocation11 + $0x660] sm:$0xff]  ;;  %v3535_v56 = vcombine.low %v1246_v60, %v1250_v61 }
 0x2a0   :  { %v3525_v62 = vcombine.low %v1237_v44, %v1241_v45 }
 0x2a1   :  { %2661 = vmatpush1.bf16.msra.mxu0 %v3461_v54  ;;  %2747 = vmatpush1.bf16.msra.mxu1 %v3463_v57  ;;  %v3526_v54 = vcombine.high %v1237_v44, %v1241_v45  ;;  %v3528_v57 = vcombine.high %v1238_v46, %v1242_v47  ;;  %v3567_v44 = vcombine.low %v1278_v28, %v1282_v29  ;;  %v1068_v28 = vld [vmem:[#allocation11 + $0xf8] sm:$0xff] }
 0x2a2   :  { %2662 = vmatprep.subr.bf16.mxu0 %v3470_v58  ;;  %2748 = vmatprep.subr.bf16.mxu1 %v3472_v59  ;;  %v1245_v58 = vld [vmem:[#allocation11 + $0x680] sm:$0xff]  ;;  %v3574_v47 = vcombine.high %v1285_v35, %v1289_v37 }
 0x2a3   :  { %v1249_v59 = vld [vmem:[#allocation11 + $0x6a0] sm:$0xff] }
 0x2a4   :  { %v3533_v55 = vcombine.low %v1245_v58, %v1249_v59 }
 0x2a5   :  { %2663 = vmatpush1.bf16.msra.mxu0 %v3469_v0  ;;  %2749 = vmatpush1.bf16.msra.mxu1 %v3471_v1  ;;  %v3534_v0 = vcombine.high %v1245_v58, %v1249_v59  ;;  %v3536_v1 = vcombine.high %v1246_v60, %v1250_v61  ;;  %v1043_v58 = vld [vmem:[#allocation11 + $0x30] sm:$0xff]  ;;  %v1040_v59 = vld [vmem:[#allocation11 + $0x18] sm:$0xff] }
 0x2a6   :  { %2664 = vmatprep.subr.bf16.mxu0 %v3478_v49  ;;  %2750 = vmatprep.subr.bf16.mxu1 %v3480_v50  ;;  %v1253_v49 = vld [vmem:[#allocation11 + $0x6c0] sm:$0xff] }
 0x2a7   :  { %v1257_v50 = vld [vmem:[#allocation11 + $0x6e0] sm:$0xff] }
 0x2a8   :  { %v3541_v10 = vcombine.low %v1253_v49, %v1257_v50 }
 0x2a9   :  { %2665 = vmatpush1.bf16.msra.mxu0 %v3477_v2  ;;  %2751 = vmatpush1.bf16.msra.mxu1 %v3479_v3  ;;  %v3542_v2 = vcombine.high %v1253_v49, %v1257_v50  ;;  %v3544_v3 = vcombine.high %v1254_v51, %v1258_v53 }
 0x2aa   :  { %2666 = vmatprep.subr.bf16.mxu0 %v3486_v5  ;;  %2752 = vmatprep.subr.bf16.mxu1 %v3488_v6  ;;  %v1261_v5 = vld [vmem:[#allocation11 + $0x700] sm:$0xff] }
 0x2ab   :  { %v1265_v6 = vld [vmem:[#allocation11 + $0x720] sm:$0xff] }
 0x2ac   :  { %v3549_v19 = vcombine.low %v1261_v5, %v1265_v6 }
 0x2ad   :  { %2667 = vmatpush1.bf16.msra.mxu0 %v3485_v13  ;;  %2753 = vmatpush1.bf16.msra.mxu1 %v3487_v14  ;;  %v3550_v13 = vcombine.high %v1261_v5, %v1265_v6  ;;  %v3552_v14 = vcombine.high %v1262_v7, %v1266_v8  ;;  %v1048_v5 = vld [vmem:[#allocation11 + $0x58] sm:$0xff] }
 0x2ae   :  { %2668 = vmatprep.subr.bf16.mxu0 %v3494_v15  ;;  %2754 = vmatprep.subr.bf16.mxu1 %v3496_v16  ;;  %v1269_v15 = vld [vmem:[#allocation11 + $0x740] sm:$0xff]  ;;  %v1052_v6 = vld [vmem:[#allocation11 + $0x78] sm:$0xff] }
 0x2af   :  { %v1273_v16 = vld [vmem:[#allocation11 + $0x760] sm:$0xff] }
 0x2b1   :  { %2669 = vmatpush1.bf16.msra.mxu0 %v3493_v21  ;;  %2755 = vmatpush1.bf16.msra.mxu1 %v3495_v22  ;;  %v3558_v21 = vcombine.high %v1269_v15, %v1273_v16  ;;  %v3560_v22 = vcombine.high %v1270_v17, %v1274_v18 }
 0x2b2   :  { %2670 = vmatprep.subr.bf16.mxu0 %v3502_v24  ;;  %2756 = vmatprep.subr.bf16.mxu1 %v3504_v25  ;;  %v609_v24 = vsub.s32 2, %v4142_v4  ;;  %v1277_v25 = vld [vmem:[#allocation11 + $0x780] sm:$0xff] }
 0x2b5   :  { %2671 = vmatpush1.bf16.msra.mxu0 %v3501_v30  ;;  %2757 = vmatpush1.bf16.msra.mxu1 %v3503_v31  ;;  %v3557_v30 = vcombine.low %v1269_v15, %v1273_v16  ;;  %v3559_v31 = vcombine.low %v1270_v17, %v1274_v18  ;;  %v1059_v15 = vld [vmem:[#allocation11 + $0xb0] sm:$0xff]  ;;  %v1056_v16 = vld [vmem:[#allocation11 + $0x98] sm:$0xff] }
 0x2b6   :  { %2672 = vmatprep.subr.bf16.mxu0 %v3510_v32  ;;  %2758 = vmatprep.subr.bf16.mxu1 %v3512_v33  ;;  %v610_v32 = vrot.slane %v4172_v23, %v609_v24  ;;  %v3566_v33 = vcombine.high %v1277_v25, %v1281_v27  ;;  %v1044_v23 = vld [vmem:[#allocation11 + $0x38] sm:$0xff] }
 0x2b7   :  { %v3332_v51 = vcombine.high %v1040_v59, %v1044_v23  ;;  %v1060_v17 = vld [vmem:[#allocation11 + $0xb8] sm:$0xff] }
 0x2b9   :  { %2673 = vmatpush1.bf16.msra.mxu0 %v3509_v38  ;;  %2759 = vmatpush1.bf16.msra.mxu1 %v3511_v39  ;;  %v1286_v38 = vld [vmem:[#allocation11 + $0x7c8] sm:$0xff] }
 0x2ba   :  { %2674 = vmatprep.subr.bf16.mxu0 %v3518_v40  ;;  %2760 = vmatprep.subr.bf16.mxu1 %v3520_v41  ;;  %v1290_v39 = vld [vmem:[#allocation11 + $0x7e8] sm:$0xff]  ;;  %v3565_v41 = vcombine.low %v1277_v25, %v1281_v27  ;;  %v1067_v25 = vld [vmem:[#allocation11 + $0xf0] sm:$0xff]  ;;  %v1064_v27 = vld [vmem:[#allocation11 + $0xd8] sm:$0xff] }
 0x2bd   :  { %2675 = vmatpush1.bf16.msra.mxu0 %v3517_v48  ;;  %2761 = vmatpush1.bf16.msra.mxu1 %v3519_v52  ;;  %v3576_v48 = vcombine.high %v1286_v38, %v1290_v39  ;;  %v1039_v52 = vld [vmem:[#allocation11 + $0x10] sm:$0xff] }
 0x2be   :  { %2676 = vmatprep.subr.bf16.mxu0 %v3526_v54  ;;  %2762 = vmatprep.subr.bf16.mxu1 %v3528_v57  ;;  %v3330_v50 = vcombine.high %v1039_v52, %v1043_v58  ;;  %v3329_v8 = vcombine.low %v1039_v52, %v1043_v58  ;;  %v1088_v58 = vld [vmem:[#allocation11 + $0x198] sm:$0xff] }
 0x2c1   :  { %2677 = vmatpush1.bf16.msra.mxu0 %v3525_v62  ;;  %2763 = vmatpush1.bf16.msra.mxu1 %v3527_v63  ;;  %v3573_v63 = vcombine.low %v1285_v35, %v1289_v37  ;;  %v1076_v35 = vld [vmem:[#allocation11 + $0x138] sm:$0xff]  ;;  %v3355_v37 = vcombine.low %v1064_v27, %v1068_v28 }
 0x2c2   :  { %2678 = vmatprep.subr.bf16.mxu0 %v3534_v0  ;;  %2764 = vmatprep.subr.bf16.mxu1 %v3536_v1  ;;  %v3575_v0 = vcombine.low %v1286_v38, %v1290_v39 }
 0x2c5   :  { %2679 = vmatpush1.bf16.msra.mxu0 %v3533_v55  ;;  %2765 = vmatpush1.bf16.msra.mxu1 %v3535_v56  ;;  %v1047_v56 = vld [vmem:[#allocation11 + $0x50] sm:$0xff] }
 0x2c6   :  { %2680 = vmatprep.subr.bf16.mxu0 %v3542_v2  ;;  %2766 = vmatprep.subr.bf16.mxu1 %v3544_v3  ;;  %v1051_v3 = vld [vmem:[#allocation11 + $0x70] sm:$0xff] }
 0x2c7   :  { %v3337_v18 = vcombine.low %v1047_v56, %v1051_v3 }
 0x2c9   :  { %2681 = vmatpush1.bf16.msra.mxu0 %v3541_v10  ;;  %2767 = vmatpush1.bf16.msra.mxu1 %v3543_v11  ;;  %v3331_v10 = vcombine.low %v1040_v59, %v1044_v23  ;;  %v3338_v11 = vcombine.high %v1047_v56, %v1051_v3  ;;  %v1092_v59 = vld [vmem:[#allocation11 + $0x1b8] sm:$0xff]  ;;  %v1103_v56 = vld [vmem:[#allocation11 + $0x210] sm:$0xff] }
 0x2ca   :  { %2682 = vmatprep.subr.bf16.mxu0 %v3550_v13  ;;  %2768 = vmatprep.subr.bf16.mxu1 %v3552_v14  ;;  %v3340_v13 = vcombine.high %v1048_v5, %v1052_v6  ;;  %v1055_v14 = vld [vmem:[#allocation11 + $0x90] sm:$0xff] }
 0x2cb   :  { %v3345_v29 = vcombine.low %v1055_v14, %v1059_v15  ;;  %v1107_v3 = vld [vmem:[#allocation11 + $0x230] sm:$0xff] }
 0x2cd   :  { %2683 = vmatpush1.bf16.msra.mxu0 %v3549_v19  ;;  %2769 = vmatpush1.bf16.msra.mxu1 %v3551_v20  ;;  %v3339_v19 = vcombine.low %v1048_v5, %v1052_v6  ;;  %v3346_v20 = vcombine.high %v1055_v14, %v1059_v15  ;;  %v1104_v5 = vld [vmem:[#allocation11 + $0x218] sm:$0xff]  ;;  %v1111_v14 = vld [vmem:[#allocation11 + $0x250] sm:$0xff] }
 0x2ce   :  { %2684 = vmatprep.subr.bf16.mxu0 %v3558_v21  ;;  %2770 = vmatprep.subr.bf16.mxu1 %v3560_v22  ;;  %v3348_v21 = vcombine.high %v1056_v16, %v1060_v17  ;;  %v1063_v22 = vld [vmem:[#allocation11 + $0xd0] sm:$0xff]  ;;  %v1108_v6 = vld [vmem:[#allocation11 + $0x238] sm:$0xff] }
 0x2cf   :  { %v1115_v15 = vld [vmem:[#allocation11 + $0x270] sm:$0xff] }
 0x2d1   :  { %v1016_v40 = vpop.f32.mrb[4].mxu1  ;;  %2685 = vmatpush1.bf16.msra.mxu0 %v3557_v30  ;;  %2771 = vmatpush1.bf16.msra.mxu1 %v3559_v31  ;;  %v3347_v30 = vcombine.low %v1056_v16, %v1060_v17  ;;  %v3354_v31 = vcombine.high %v1063_v22, %v1067_v25  ;;  %v1112_v16 = vld [vmem:[#allocation11 + $0x258] sm:$0xff] }
 0x2d2   :  { %v1017_v45 = vadd.f32 %v1016_v40, %v610_v32  ;;  %v1018_v46 = vpop.f32.mrb[5].mxu1  ;;  %2686 = vmatprep.subr.bf16.mxu0 %v3566_v33  ;;  %2772 = vmatprep.subr.bf16.mxu1 %v3568_v34  ;;  %v1071_v33 = vld [vmem:[#allocation11 + $0x110] sm:$0xff]  ;;  %v1116_v17 = vld [vmem:[#allocation11 + $0x278] sm:$0xff] }
 0x2d3   :  { %v1019_v54 = vadd.f32 %v1018_v46, %v614_v36  ;;  %v1020_v57 = vpop.f32.mrb[6].mxu1  ;;  %v1075_v34 = vld [vmem:[#allocation11 + $0x130] sm:$0xff] }
 0x2d4   :  { %v1021_v60 = vadd.f32 %v1020_v57, %v610_v32  ;;  %v1022_v61 = vpop.f32.mrb[7].mxu1  ;;  %v1027_v1 = vmax.f32 %v1017_v45, 0.0  ;;  %v3356_v32 = vcombine.high %v1064_v27, %v1068_v28  ;;  %v3362_v38 = vcombine.high %v1071_v33, %v1075_v34  ;;  %v1079_v40 = vld [vmem:[#allocation11 + $0x150] sm:$0xff]  ;;  %v1084_v45 = vld [vmem:[#allocation11 + $0x178] sm:$0xff] }
 0x2d5   :  { %v1023_v62 = vadd.f32 %v1022_v61, %v614_v36  ;;  %2687 = vmatpush1.bf16.msra.mxu0 %v3565_v41  ;;  %2773 = vmatpush1.bf16.msra.mxu1 %v3567_v44  ;;  %v1028_v53 = vmax.f32 %v1019_v54, 0.0  ;;  %v3353_v36 = vcombine.low %v1063_v22, %v1067_v25  ;;  %v1083_v41 = vld [vmem:[#allocation11 + $0x170] sm:$0xff]  ;;  %v1080_v44 = vld [vmem:[#allocation11 + $0x158] sm:$0xff]  ;;  %v3361_v46 = vcombine.low %v1071_v33, %v1075_v34 }
 0x2d6   :  { %v1031_v49 = vmax.f32 %v1021_v60, 0.0  ;;  %2688 = vmatprep.subr.bf16.mxu0 %v3574_v47  ;;  %2774 = vmatprep.subr.bf16.mxu1 %v3576_v48  ;;  %v3370_v48 = vcombine.high %v1079_v40, %v1083_v41  ;;  %v3372_v52 = vcombine.high %v1080_v44, %v1084_v45  ;;  %v1087_v54 = vld [vmem:[#allocation11 + $0x190] sm:$0xff]  ;;  %v3369_v23 = vcombine.low %v1079_v40, %v1083_v41  ;;  %v1120_v27 = vld [vmem:[#allocation11 + $0x298] sm:$0xff] }
 0x2d7   :  { %v1032_v55 = vmax.f32 %v1023_v62, 0.0  ;;  %v1091_v57 = vld [vmem:[#allocation11 + $0x1b0] sm:$0xff]  ;;  %v3371_v60 = vcombine.low %v1080_v44, %v1084_v45  ;;  %v3380_v62 = vcombine.high %v1088_v58, %v1092_v59  ;;  %v1124_v28 = vld [vmem:[#allocation11 + $0x2b8] sm:$0xff] }
 0x2d8   :  { %v4200_v2 = vpack.c.bf16 %v1031_v49, %v1027_v1  ;;  %v3378_v61 = vcombine.high %v1087_v54, %v1091_v57  ;;  %v1096_v1 = vld [vmem:[#allocation11 + $0x1d8] sm:$0xff]  ;;  %v1119_v22 = vld [vmem:[#allocation11 + $0x290] sm:$0xff] }
 0x2d9   :  { %v4202_v7 = vpack.c.bf16 %v1032_v55, %v1028_v53  ;;  %2689 = vmatpush1.bf16.msra.mxu0 %v3573_v63  ;;  %2775 = vmatpush1.bf16.msra.mxu1 %v3575_v0  ;;  %v1095_v63 = vld [vmem:[#allocation11 + $0x1d0] sm:$0xff]  ;;  %v1100_v49 = vld [vmem:[#allocation11 + $0x1f8] sm:$0xff] }
 0x2da   :  { %2787 = vmatprep.subr.bf16.mxu0 %v3330_v50  ;;  %2873 = vmatprep.subr.bf16.mxu1 %v3332_v51  ;;  %v1099_v0 = vld [vmem:[#allocation11 + $0x1f0] sm:$0xff]  ;;  %v3377_v50 = vcombine.low %v1087_v54, %v1091_v57  ;;  %v3379_v51 = vcombine.low %v1088_v58, %v1092_v59  ;;  %v3388_v55 = vcombine.high %v1096_v1, %v1100_v49  ;;  %v1136_v44 = vld [vmem:[#allocation11 + $0x318] sm:$0xff] }
 0x2db   :  { %2690 = vmatprep.mubr.bf16.mxu0 %v4202_v7  ;;  %2776 = vmatprep.mubr.bf16.mxu1 %v4202_v7  ;;  %v3386_v53 = vcombine.high %v1095_v63, %v1099_v0  ;;  %v1123_v25 = vld [vmem:[#allocation11 + $0x2b0] sm:$0xff]  ;;  %v1140_v45 = vld [vmem:[#allocation11 + $0x338] sm:$0xff] }
 0x2dc   :  { %2691 = vmatmul.mubr.bf16.vlgmr.msra.gmra.mrb[4].mxu0 %v4200_v2  ;;  %2777 = vmatmul.mubr.bf16.vlgmr.msra.gmra.mrb[8].mxu1 %v4200_v2  ;;  %v1127_v33 = vld [vmem:[#allocation11 + $0x2d0] sm:$0xff]  ;;  %v1144_v58 = vld [vmem:[#allocation11 + $0x358] sm:$0xff] }
 0x2dd   :  { %2788 = vmatpush1.bf16.msra.mxu0 %v3329_v8  ;;  %2819 = vmatprep.mubr.bf16.mxu0 %v4180_v43  ;;  %v3385_v8 = vcombine.low %v1095_v63, %v1099_v0  ;;  %v1131_v34 = vld [vmem:[#allocation11 + $0x2f0] sm:$0xff]  ;;  %v1148_v59 = vld [vmem:[#allocation11 + $0x378] sm:$0xff] }
 0x2de   :  { %2874 = vmatpush1.bf16.msra.mxu1 %v3331_v10  ;;  %2905 = vmatprep.mubr.bf16.mxu1 %v4180_v43  ;;  %v1072_v43 = vld [vmem:[#allocation11 + $0x118] sm:$0xff]  ;;  %v3387_v10 = vcombine.low %v1096_v1, %v1100_v49  ;;  %v1135_v40 = vld [vmem:[#allocation11 + $0x310] sm:$0xff] }
 0x2df   :  { %2789 = vmatprep.subr.bf16.mxu0 %v3338_v11  ;;  %2875 = vmatprep.subr.bf16.mxu1 %v3340_v13  ;;  %v3364_v39 = vcombine.high %v1072_v43, %v1076_v35  ;;  %v3363_v47 = vcombine.low %v1072_v43, %v1076_v35  ;;  %v3394_v11 = vcombine.high %v1103_v56, %v1107_v3  ;;  %v1128_v43 = vld [vmem:[#allocation11 + $0x2d8] sm:$0xff]  ;;  %v1139_v41 = vld [vmem:[#allocation11 + $0x330] sm:$0xff] }
 0x2e0   :  { %v3396_v13 = vcombine.high %v1104_v5, %v1108_v6  ;;  %v1132_v35 = vld [vmem:[#allocation11 + $0x2f8] sm:$0xff]  ;;  %v1143_v54 = vld [vmem:[#allocation11 + $0x350] sm:$0xff] }
 0x2e1   :  { %2790 = vmatpush1.bf16.msra.mxu0 %v3337_v18  ;;  %v3393_v18 = vcombine.low %v1103_v56, %v1107_v3  ;;  %v1147_v57 = vld [vmem:[#allocation11 + $0x370] sm:$0xff]  ;;  %v1152_v1 = vld [vmem:[#allocation11 + $0x398] sm:$0xff] }
 0x2e2   :  { %2876 = vmatpush1.bf16.msra.mxu1 %v3339_v19  ;;  %2791 = vmatprep.subr.bf16.mxu0 %v3346_v20  ;;  %v3395_v19 = vcombine.low %v1104_v5, %v1108_v6  ;;  %v3402_v20 = vcombine.high %v1111_v14, %v1115_v15  ;;  %v1151_v63 = vld [vmem:[#allocation11 + $0x390] sm:$0xff]  ;;  %v1156_v49 = vld [vmem:[#allocation11 + $0x3b8] sm:$0xff] }
 0x2e3   :  { %2877 = vmatprep.subr.bf16.mxu1 %v3348_v21  ;;  %v3404_v21 = vcombine.high %v1112_v16, %v1116_v17  ;;  %v1155_v0 = vld [vmem:[#allocation11 + $0x3b0] sm:$0xff]  ;;  %v1160_v5 = vld [vmem:[#allocation11 + $0x3d8] sm:$0xff] }
 0x2e4   :  { %v1159_v56 = vld [vmem:[#allocation11 + $0x3d0] sm:$0xff]  ;;  %v1164_v6 = vld [vmem:[#allocation11 + $0x3f8] sm:$0xff] }
 0x2e5   :  { %2792 = vmatpush1.bf16.msra.mxu0 %v3345_v29  ;;  %v3401_v29 = vcombine.low %v1111_v14, %v1115_v15  ;;  %v1163_v3 = vld [vmem:[#allocation11 + $0x3f0] sm:$0xff] }
 0x2e6   :  { %2878 = vmatpush1.bf16.msra.mxu1 %v3347_v30  ;;  %2793 = vmatprep.subr.bf16.mxu0 %v3354_v31  ;;  %v3403_v30 = vcombine.low %v1112_v16, %v1116_v17  ;;  %v3410_v31 = vcombine.high %v1119_v22, %v1123_v25  ;;  %v1167_v14 = vld [vmem:[#allocation11 + $0x410] sm:$0xff]  ;;  %v1168_v16 = vld [vmem:[#allocation11 + $0x418] sm:$0xff] }
 0x2e7   :  { %2879 = vmatprep.subr.bf16.mxu1 %v3356_v32  ;;  %v3412_v32 = vcombine.high %v1120_v27, %v1124_v28  ;;  %v1171_v15 = vld [vmem:[#allocation11 + $0x430] sm:$0xff]  ;;  %v1172_v17 = vld [vmem:[#allocation11 + $0x438] sm:$0xff] }
 0x2e9   :  { %2794 = vmatpush1.bf16.msra.mxu0 %v3353_v36  ;;  %v3409_v36 = vcombine.low %v1119_v22, %v1123_v25  ;;  %v1175_v22 = vld [vmem:[#allocation11 + $0x450] sm:$0xff] }
 0x2ea   :  { %2880 = vmatpush1.bf16.msra.mxu1 %v3355_v37  ;;  %2795 = vmatprep.subr.bf16.mxu0 %v3362_v38  ;;  %v3411_v37 = vcombine.low %v1120_v27, %v1124_v28  ;;  %v3418_v38 = vcombine.high %v1127_v33, %v1131_v34  ;;  %v1179_v25 = vld [vmem:[#allocation11 + $0x470] sm:$0xff]  ;;  %v3457_v27 = vcombine.low %v1167_v14, %v1171_v15  ;;  %v1176_v28 = vld [vmem:[#allocation11 + $0x458] sm:$0xff] }
 0x2eb   :  { %2881 = vmatprep.subr.bf16.mxu1 %v3364_v39  ;;  %v3420_v39 = vcombine.high %v1128_v43, %v1132_v35 }
 0x2ed   :  { %2796 = vmatpush1.bf16.msra.mxu0 %v3361_v46  ;;  %v3417_v46 = vcombine.low %v1127_v33, %v1131_v34  ;;  %v1187_v33 = vld [vmem:[#allocation11 + $0x4b0] sm:$0xff] }
 0x2ee   :  { %2882 = vmatpush1.bf16.msra.mxu1 %v3363_v47  ;;  %2797 = vmatprep.subr.bf16.mxu0 %v3370_v48  ;;  %v3419_v47 = vcombine.low %v1128_v43, %v1132_v35  ;;  %v3426_v48 = vcombine.high %v1135_v40, %v1139_v41  ;;  %v1184_v43 = vld [vmem:[#allocation11 + $0x498] sm:$0xff] }
 0x2ef   :  { %2883 = vmatprep.subr.bf16.mxu1 %v3372_v52  ;;  %v3428_v52 = vcombine.high %v1136_v44, %v1140_v45  ;;  %v1188_v35 = vld [vmem:[#allocation11 + $0x4b8] sm:$0xff] }
 0x2f1   :  { %2798 = vmatpush1.bf16.msra.mxu0 %v3369_v23  ;;  %v3425_v23 = vcombine.low %v1135_v40, %v1139_v41  ;;  %v1191_v40 = vld [vmem:[#allocation11 + $0x4d0] sm:$0xff] }
 0x2f2   :  { %2884 = vmatpush1.bf16.msra.mxu1 %v3371_v60  ;;  %2799 = vmatprep.subr.bf16.mxu0 %v3378_v61  ;;  %v3427_v60 = vcombine.low %v1136_v44, %v1140_v45  ;;  %v3434_v61 = vcombine.high %v1143_v54, %v1147_v57  ;;  %v1195_v41 = vld [vmem:[#allocation11 + $0x4f0] sm:$0xff]  ;;  %v1192_v44 = vld [vmem:[#allocation11 + $0x4d8] sm:$0xff] }
 0x2f3   :  { %2885 = vmatprep.subr.bf16.mxu1 %v3380_v62  ;;  %v3436_v62 = vcombine.high %v1144_v58, %v1148_v59  ;;  %v1196_v45 = vld [vmem:[#allocation11 + $0x4f8] sm:$0xff] }
 0x2f5   :  { %2800 = vmatpush1.bf16.msra.mxu0 %v3377_v50  ;;  %v3433_v50 = vcombine.low %v1143_v54, %v1147_v57  ;;  %v1203_v54 = vld [vmem:[#allocation11 + $0x530] sm:$0xff]  ;;  %v1200_v57 = vld [vmem:[#allocation11 + $0x518] sm:$0xff] }
 0x2f6   :  { %2886 = vmatpush1.bf16.msra.mxu1 %v3379_v51  ;;  %2801 = vmatprep.subr.bf16.mxu0 %v3386_v53  ;;  %v3435_v51 = vcombine.low %v1144_v58, %v1148_v59  ;;  %v3442_v53 = vcombine.high %v1151_v63, %v1155_v0  ;;  %v1204_v58 = vld [vmem:[#allocation11 + $0x538] sm:$0xff]  ;;  %v3483_v59 = vcombine.low %v1192_v44, %v1196_v45 }
 0x2f7   :  { %2887 = vmatprep.subr.bf16.mxu1 %v3388_v55  ;;  %v3444_v55 = vcombine.high %v1152_v1, %v1156_v49 }
 0x2f9   :  { %2802 = vmatpush1.bf16.msra.mxu0 %v3385_v8  ;;  %v3441_v8 = vcombine.low %v1151_v63, %v1155_v0  ;;  %v1208_v63 = vld [vmem:[#allocation11 + $0x558] sm:$0xff] }
 0x2fa   :  { %2888 = vmatpush1.bf16.msra.mxu1 %v3387_v10  ;;  %2803 = vmatprep.subr.bf16.mxu0 %v3394_v11  ;;  %v3443_v10 = vcombine.low %v1152_v1, %v1156_v49  ;;  %v3450_v11 = vcombine.high %v1159_v56, %v1163_v3  ;;  %v1212_v0 = vld [vmem:[#allocation11 + $0x578] sm:$0xff]  ;;  %v3491_v49 = vcombine.low %v1200_v57, %v1204_v58 }
 0x2fb   :  { %2889 = vmatprep.subr.bf16.mxu1 %v3396_v13  ;;  %v3452_v13 = vcombine.high %v1160_v5, %v1164_v6 }
 0x2fd   :  { %2804 = vmatpush1.bf16.msra.mxu0 %v3393_v18  ;;  %v3449_v18 = vcombine.low %v1159_v56, %v1163_v3  ;;  %v1216_v56 = vld [vmem:[#allocation11 + $0x598] sm:$0xff] }
 0x2fe   :  { %2890 = vmatpush1.bf16.msra.mxu1 %v3395_v19  ;;  %2805 = vmatprep.subr.bf16.mxu0 %v3402_v20  ;;  %v3451_v19 = vcombine.low %v1160_v5, %v1164_v6  ;;  %v3458_v20 = vcombine.high %v1167_v14, %v1171_v15  ;;  %v1220_v3 = vld [vmem:[#allocation11 + $0x5b8] sm:$0xff]  ;;  %v3499_v6 = vcombine.low %v1208_v63, %v1212_v0 }
 0x2ff   :  { %2891 = vmatprep.subr.bf16.mxu1 %v3404_v21  ;;  %v3460_v21 = vcombine.high %v1168_v16, %v1172_v17  ;;  %v1224_v14 = vld [vmem:[#allocation11 + $0x5d8] sm:$0xff] }
 0x300   :  { %v1228_v15 = vld [vmem:[#allocation11 + $0x5f8] sm:$0xff] }
 0x301   :  { %2806 = vmatpush1.bf16.msra.mxu0 %v3401_v29  ;;  %v1180_v29 = vld [vmem:[#allocation11 + $0x478] sm:$0xff] }
 0x302   :  { %2892 = vmatpush1.bf16.msra.mxu1 %v3403_v30  ;;  %2807 = vmatprep.subr.bf16.mxu0 %v3410_v31  ;;  %v3459_v30 = vcombine.low %v1168_v16, %v1172_v17  ;;  %v3466_v31 = vcombine.high %v1175_v22, %v1179_v25  ;;  %v3468_v34 = vcombine.high %v1176_v28, %v1180_v29 }
 0x303   :  { %2893 = vmatprep.subr.bf16.mxu1 %v3412_v32  ;;  %v1183_v32 = vld [vmem:[#allocation11 + $0x490] sm:$0xff]  ;;  %v3507_v17 = vcombine.low %v1216_v56, %v1220_v3 }
 0x305   :  { %2808 = vmatpush1.bf16.msra.mxu0 %v3409_v36  ;;  %v3465_v36 = vcombine.low %v1175_v22, %v1179_v25  ;;  %v1232_v22 = vld [vmem:[#allocation11 + $0x618] sm:$0xff] }
 0x306   :  { %2894 = vmatpush1.bf16.msra.mxu1 %v3411_v37  ;;  %2809 = vmatprep.subr.bf16.mxu0 %v3418_v38  ;;  %v3467_v37 = vcombine.low %v1176_v28, %v1180_v29  ;;  %v3474_v38 = vcombine.high %v1183_v32, %v1187_v33  ;;  %v1236_v25 = vld [vmem:[#allocation11 + $0x638] sm:$0xff]  ;;  %v3515_v28 = vcombine.low %v1224_v14, %v1228_v15 }
 0x307   :  { %2895 = vmatprep.subr.bf16.mxu1 %v3420_v39  ;;  %v3476_v39 = vcombine.high %v1184_v43, %v1188_v35 }
 0x309   :  { %2810 = vmatpush1.bf16.msra.mxu0 %v3417_v46  ;;  %v3473_v46 = vcombine.low %v1183_v32, %v1187_v33  ;;  %v1243_v32 = vld [vmem:[#allocation11 + $0x670] sm:$0xff]  ;;  %v1240_v33 = vld [vmem:[#allocation11 + $0x658] sm:$0xff] }
 0x30a   :  { %2896 = vmatpush1.bf16.msra.mxu1 %v3419_v47  ;;  %2811 = vmatprep.subr.bf16.mxu0 %v3426_v48  ;;  %v3482_v47 = vcombine.high %v1191_v40, %v1195_v41  ;;  %v3484_v48 = vcombine.high %v1192_v44, %v1196_v45 }
 0x30b   :  { %2897 = vmatprep.subr.bf16.mxu1 %v3428_v52  ;;  %v1199_v52 = vld [vmem:[#allocation11 + $0x510] sm:$0xff] }
 0x30c   :  { %v3489_v1 = vcombine.low %v1199_v52, %v1203_v54 }
 0x30d   :  { %2812 = vmatpush1.bf16.msra.mxu0 %v3425_v23  ;;  %v3490_v23 = vcombine.high %v1199_v52, %v1203_v54  ;;  %v1256_v52 = vld [vmem:[#allocation11 + $0x6d8] sm:$0xff] }
 0x30e   :  { %2898 = vmatpush1.bf16.msra.mxu1 %v3427_v60  ;;  %2813 = vmatprep.subr.bf16.mxu0 %v3434_v61  ;;  %v3492_v60 = vcombine.high %v1200_v57, %v1204_v58  ;;  %v1207_v61 = vld [vmem:[#allocation11 + $0x550] sm:$0xff]  ;;  %v1260_v54 = vld [vmem:[#allocation11 + $0x6f8] sm:$0xff] }
 0x30f   :  { %2899 = vmatprep.subr.bf16.mxu1 %v3436_v62  ;;  %v1211_v62 = vld [vmem:[#allocation11 + $0x570] sm:$0xff] }
 0x310   :  { %v3497_v5 = vcombine.low %v1207_v61, %v1211_v62 }
 0x311   :  { %2814 = vmatpush1.bf16.msra.mxu0 %v3433_v50  ;;  %v3498_v50 = vcombine.high %v1207_v61, %v1211_v62  ;;  %v1264_v61 = vld [vmem:[#allocation11 + $0x718] sm:$0xff] }
 0x312   :  { %2900 = vmatpush1.bf16.msra.mxu1 %v3435_v51  ;;  %2815 = vmatprep.subr.bf16.mxu0 %v3442_v53  ;;  %v3500_v51 = vcombine.high %v1208_v63, %v1212_v0  ;;  %v1215_v53 = vld [vmem:[#allocation11 + $0x590] sm:$0xff]  ;;  %v1268_v62 = vld [vmem:[#allocation11 + $0x738] sm:$0xff]  ;;  %v3547_v0 = vcombine.low %v1256_v52, %v1260_v54 }
 0x313   :  { %2901 = vmatprep.subr.bf16.mxu1 %v3444_v55  ;;  %v1219_v55 = vld [vmem:[#allocation11 + $0x5b0] sm:$0xff] }
 0x314   :  { %v3505_v16 = vcombine.low %v1215_v53, %v1219_v55 }
 0x315   :  { %2816 = vmatpush1.bf16.msra.mxu0 %v3441_v8  ;;  %v3506_v8 = vcombine.high %v1215_v53, %v1219_v55  ;;  %v1272_v53 = vld [vmem:[#allocation11 + $0x758] sm:$0xff] }
 0x316   :  { %2902 = vmatpush1.bf16.msra.mxu1 %v3443_v10  ;;  %2817 = vmatprep.subr.bf16.mxu0 %v3450_v11  ;;  %v3508_v10 = vcombine.high %v1216_v56, %v1220_v3  ;;  %v1223_v11 = vld [vmem:[#allocation11 + $0x5d0] sm:$0xff]  ;;  %v1276_v55 = vld [vmem:[#allocation11 + $0x778] sm:$0xff]  ;;  %v3555_v3 = vcombine.low %v1264_v61, %v1268_v62 }
 0x317   :  { %2903 = vmatprep.subr.bf16.mxu1 %v3452_v13  ;;  %v1227_v13 = vld [vmem:[#allocation11 + $0x5f0] sm:$0xff] }
 0x319   :  { %2818 = vmatpush1.bf16.msra.mxu0 %v3449_v18  ;;  %v3514_v18 = vcombine.high %v1223_v11, %v1227_v13 }
 0x31a   :  { %2904 = vmatpush1.bf16.msra.mxu1 %v3451_v19  ;;  %2830 = vmatprep.subr.bf16.mxu0 %v3458_v20  ;;  %v3516_v19 = vcombine.high %v1224_v14, %v1228_v15  ;;  %v1231_v20 = vld [vmem:[#allocation11 + $0x610] sm:$0xff]  ;;  %v3563_v15 = vcombine.low %v1272_v53, %v1276_v55 }
 0x31b   :  { %2916 = vmatprep.subr.bf16.mxu1 %v3460_v21  ;;  %v1235_v21 = vld [vmem:[#allocation11 + $0x630] sm:$0xff] }
 0x31c   :  { %2820 = vmatmul.mubr.bf16.vlgmr.msra.gmra.mrb[8].mxu0 %v4178_v42  ;;  %v3522_v29 = vcombine.high %v1231_v20, %v1235_v21 }
 0x31d   :  { %2906 = vmatmul.mubr.bf16.vlgmr.msra.gmra.mrb[12].mxu1 %v4178_v42  ;;  %2831 = vmatpush1.bf16.msra.mxu0 %v3457_v27  ;;  %v3475_v42 = vcombine.low %v1184_v43, %v1188_v35  ;;  %v3513_v27 = vcombine.low %v1223_v11, %v1227_v13  ;;  %v3521_v43 = vcombine.low %v1231_v20, %v1235_v21  ;;  %v1280_v11 = vld [vmem:[#allocation11 + $0x798] sm:$0xff] }
 0x31e   :  { %2862 = vmatprep.mubr.bf16.mxu0 %v4202_v7  ;;  %2917 = vmatpush1.bf16.msra.mxu1 %v3459_v30  ;;  %v3524_v30 = vcombine.high %v1232_v22, %v1236_v25  ;;  %v3523_v35 = vcombine.low %v1232_v22, %v1236_v25  ;;  %v1284_v13 = vld [vmem:[#allocation11 + $0x7b8] sm:$0xff] }
 0x31f   :  { %2948 = vmatprep.mubr.bf16.mxu1 %v4202_v7  ;;  %2832 = vmatprep.subr.bf16.mxu0 %v3466_v31  ;;  %v3481_v7 = vcombine.low %v1191_v40, %v1195_v41  ;;  %v1239_v31 = vld [vmem:[#allocation11 + $0x650] sm:$0xff]  ;;  %v1248_v40 = vld [vmem:[#allocation11 + $0x698] sm:$0xff]  ;;  %v3571_v25 = vcombine.low %v1280_v11, %v1284_v13 }
 0x320   :  { %2918 = vmatprep.subr.bf16.mxu1 %v3468_v34  ;;  %v1244_v34 = vld [vmem:[#allocation11 + $0x678] sm:$0xff]  ;;  %v3529_v44 = vcombine.low %v1239_v31, %v1243_v32 }
 0x321   :  { %2833 = vmatpush1.bf16.msra.mxu0 %v3465_v36  ;;  %v3530_v36 = vcombine.high %v1239_v31, %v1243_v32  ;;  %v1252_v41 = vld [vmem:[#allocation11 + $0x6b8] sm:$0xff]  ;;  %v3531_v45 = vcombine.low %v1240_v33, %v1244_v34  ;;  %v4216_v31 = vld [vmem:[#allocation13] sm:$0xff]  ;;  %v4013_v32 = vmov 1966171168  }
 0x322   :  { %2919 = vmatpush1.bf16.msra.mxu1 %v3467_v37  ;;  %2834 = vmatprep.subr.bf16.mxu0 %v3474_v38  ;;  %v3532_v37 = vcombine.high %v1240_v33, %v1244_v34  ;;  %v1247_v38 = vld [vmem:[#allocation11 + $0x690] sm:$0xff]  ;;  %v3539_v58 = vcombine.low %v1248_v40, %v1252_v41  ;;  %v1288_v20 = vld [vmem:[#allocation11 + $0x7d8] sm:$0xff]  ;;  %v3092_v33 = vunpack.c.l.s4 %v4013_v32  ;;  %v1298_v34 = vrot.slane %v4216_v31, %v4145_v9 }
 0x323   :  { %2920 = vmatprep.subr.bf16.mxu1 %v3476_v39  ;;  %v1251_v39 = vld [vmem:[#allocation11 + $0x6b0] sm:$0xff]  ;;  %v1292_v21 = vld [vmem:[#allocation11 + $0x7f8] sm:$0xff] }
 0x324   :  { %v3537_v57 = vcombine.low %v1247_v38, %v1251_v39 }
 0x325   :  { %2835 = vmatpush1.bf16.msra.mxu0 %v3473_v46  ;;  %v3538_v46 = vcombine.high %v1247_v38, %v1251_v39 }
 0x326   :  { %2921 = vmatpush1.bf16.msra.mxu1 %v3475_v42  ;;  %2836 = vmatprep.subr.bf16.mxu0 %v3482_v47  ;;  %v3540_v42 = vcombine.high %v1248_v40, %v1252_v41  ;;  %v1255_v47 = vld [vmem:[#allocation11 + $0x6d0] sm:$0xff] }
 0x327   :  { %2922 = vmatprep.subr.bf16.mxu1 %v3484_v48  ;;  %v1259_v48 = vld [vmem:[#allocation11 + $0x6f0] sm:$0xff] }
 0x328   :  { %v3545_v63 = vcombine.low %v1255_v47, %v1259_v48 }
 0x329   :  { %2837 = vmatpush1.bf16.msra.mxu0 %v3481_v7  ;;  %v3546_v7 = vcombine.high %v1255_v47, %v1259_v48 }
 0x32a   :  { %2923 = vmatpush1.bf16.msra.mxu1 %v3483_v59  ;;  %2838 = vmatprep.subr.bf16.mxu0 %v3490_v23  ;;  %v3548_v59 = vcombine.high %v1256_v52, %v1260_v54  ;;  %v1263_v23 = vld [vmem:[#allocation11 + $0x710] sm:$0xff] }
 0x32b   :  { %2924 = vmatprep.subr.bf16.mxu1 %v3492_v60  ;;  %v1267_v60 = vld [vmem:[#allocation11 + $0x730] sm:$0xff] }
 0x32c   :  { %v3553_v56 = vcombine.low %v1263_v23, %v1267_v60 }
 0x32d   :  { %2839 = vmatpush1.bf16.msra.mxu0 %v3489_v1  ;;  %v3554_v1 = vcombine.high %v1263_v23, %v1267_v60 }
 0x32e   :  { %2925 = vmatpush1.bf16.msra.mxu1 %v3491_v49  ;;  %2840 = vmatprep.subr.bf16.mxu0 %v3498_v50  ;;  %v3556_v49 = vcombine.high %v1264_v61, %v1268_v62  ;;  %v1271_v50 = vld [vmem:[#allocation11 + $0x750] sm:$0xff] }
 0x32f   :  { %2926 = vmatprep.subr.bf16.mxu1 %v3500_v51  ;;  %v1275_v51 = vld [vmem:[#allocation11 + $0x770] sm:$0xff] }
 0x330   :  { %v3561_v14 = vcombine.low %v1271_v50, %v1275_v51 }
 0x331   :  { %2841 = vmatpush1.bf16.msra.mxu0 %v3497_v5  ;;  %v3562_v5 = vcombine.high %v1271_v50, %v1275_v51 }
 0x332   :  { %2927 = vmatpush1.bf16.msra.mxu1 %v3499_v6  ;;  %2842 = vmatprep.subr.bf16.mxu0 %v3506_v8  ;;  %v3564_v6 = vcombine.high %v1272_v53, %v1276_v55  ;;  %v1279_v8 = vld [vmem:[#allocation11 + $0x790] sm:$0xff] }
 0x333   :  { %2928 = vmatprep.subr.bf16.mxu1 %v3508_v10  ;;  %v1283_v10 = vld [vmem:[#allocation11 + $0x7b0] sm:$0xff] }
 0x334   :  { %v3569_v22 = vcombine.low %v1279_v8, %v1283_v10 }
 0x335   :  { %2843 = vmatpush1.bf16.msra.mxu0 %v3505_v16  ;;  %v3570_v16 = vcombine.high %v1279_v8, %v1283_v10 }
 0x336   :  { %2929 = vmatpush1.bf16.msra.mxu1 %v3507_v17  ;;  %2844 = vmatprep.subr.bf16.mxu0 %v3514_v18  ;;  %v3572_v17 = vcombine.high %v1280_v11, %v1284_v13  ;;  %v1287_v18 = vld [vmem:[#allocation11 + $0x7d0] sm:$0xff] }
 0x337   :  { %2930 = vmatprep.subr.bf16.mxu1 %v3516_v19  ;;  %v1291_v19 = vld [vmem:[#allocation11 + $0x7f0] sm:$0xff] }
 0x339   :  { %2845 = vmatpush1.bf16.msra.mxu0 %v3513_v27  ;;  %v3578_v27 = vcombine.high %v1287_v18, %v1291_v19 }
 0x33a   :  { %2931 = vmatpush1.bf16.msra.mxu1 %v3515_v28  ;;  %2846 = vmatprep.subr.bf16.mxu0 %v3522_v29  ;;  %v3580_v28 = vcombine.high %v1288_v20, %v1292_v21  ;;  %v3577_v29 = vcombine.low %v1287_v18, %v1291_v19 }
 0x33b   :  { %2932 = vmatprep.subr.bf16.mxu1 %v3524_v30  ;;  %v3579_v30 = vcombine.low %v1288_v20, %v1292_v21 }
 0x33d   :  { %2847 = vmatpush1.bf16.msra.mxu0 %v3521_v43  ;;  %v1306_v43 = vrot.slane %v4216_v31, %v609_v24 }
 0x33e   :  { %2933 = vmatpush1.bf16.msra.mxu1 %v3523_v35  ;;  %2848 = vmatprep.subr.bf16.mxu0 %v3530_v36  ;;  %v1302_v35 = vrot.slane %v4216_v31, %v4148_v12  ;;  %v3093_v36 = vunpack.c.0.s8 %v3092_v33 }
 0x33f   :  { %2934 = vmatprep.subr.bf16.mxu1 %v3532_v37  ;;  %v1310_v37 = vrot.slane %v4216_v31, %v613_v26 }
 0x340   :  { %v4229_v9 = vsub.s32 %v3093_v36, %v4142_v4 }
 0x341   :  { %2849 = vmatpush1.bf16.msra.mxu0 %v3529_v44 }
 0x342   :  { %2935 = vmatpush1.bf16.msra.mxu1 %v3531_v45  ;;  %2850 = vmatprep.subr.bf16.mxu0 %v3538_v46 }
 0x343   :  { %2936 = vmatprep.subr.bf16.mxu1 %v3540_v42 }
 0x345   :  { %2851 = vmatpush1.bf16.msra.mxu0 %v3537_v57 }
 0x346   :  { %2937 = vmatpush1.bf16.msra.mxu1 %v3539_v58  ;;  %2852 = vmatprep.subr.bf16.mxu0 %v3546_v7 }
 0x347   :  { %2938 = vmatprep.subr.bf16.mxu1 %v3548_v59 }
 0x349   :  { %2853 = vmatpush1.bf16.msra.mxu0 %v3545_v63 }
 0x34a   :  { %2939 = vmatpush1.bf16.msra.mxu1 %v3547_v0  ;;  %2854 = vmatprep.subr.bf16.mxu0 %v3554_v1 }
 0x34b   :  { %2940 = vmatprep.subr.bf16.mxu1 %v3556_v49 }
 0x34d   :  { %2855 = vmatpush1.bf16.msra.mxu0 %v3553_v56 }
 0x34e   :  { %2941 = vmatpush1.bf16.msra.mxu1 %v3555_v3  ;;  %2856 = vmatprep.subr.bf16.mxu0 %v3562_v5 }
 0x34f   :  { %2942 = vmatprep.subr.bf16.mxu1 %v3564_v6 }
 0x351   :  { %2857 = vmatpush1.bf16.msra.mxu0 %v3561_v14 }
 0x352   :  { %2943 = vmatpush1.bf16.msra.mxu1 %v3563_v15  ;;  %2858 = vmatprep.subr.bf16.mxu0 %v3570_v16 }
 0x353   :  { %2944 = vmatprep.subr.bf16.mxu1 %v3572_v17 }
 0x355   :  { %2859 = vmatpush1.bf16.msra.mxu0 %v3569_v22 }
 0x356   :  { %2945 = vmatpush1.bf16.msra.mxu1 %v3571_v25  ;;  %2860 = vmatprep.subr.bf16.mxu0 %v3578_v27 }
 0x357   :  { %2946 = vmatprep.subr.bf16.mxu1 %v3580_v28 }
 0x359   :  { %2861 = vmatpush1.bf16.msra.mxu0 %v3577_v29 }
 0x35a   :  { %2947 = vmatpush1.bf16.msra.mxu1 %v3579_v30 }
 0x35c   :  { %2863 = vmatmul.mubr.bf16.vlgmr.msra.gmra.mrb[8].mxu0 %v4200_v2 }
 0x35d   :  { %2949 = vmatmul.mubr.bf16.vlgmr.msra.gmra.mrb[12].mxu1 %v4200_v2 }
 0x3af   :  { %v2692_v2 = vpop.f32.mrb[4].mxu0  ;;  %v2778_v38 = vpop.f32.mrb[8].mxu1 }
 0x3b0   :  { %v3585_v39 = vadd.f32 %v2692_v2, %v1298_v34  ;;  %v3589_v40 = vadd.f32 %v2778_v38, %v1306_v43  ;;  %v2694_v41 = vpop.f32.mrb[5].mxu0  ;;  %v2780_v44 = vpop.f32.mrb[9].mxu1 }
 0x3b1   :  { %v3586_v45 = vadd.f32 %v2694_v41, %v1302_v35  ;;  %v3590_v46 = vadd.f32 %v2780_v44, %v1310_v37  ;;  %v2696_v24 = vpop.f32.mrb[6].mxu0  ;;  %v2782_v42 = vpop.f32.mrb[10].mxu1 }
 0x3b2   :  { %v2959_v47 = vmax.f32 %v3585_v39, 0.0  ;;  %v2961_v12 = vmax.f32 %v3589_v40, 0.0  ;;  %v3587_v48 = vadd.f32 %v2696_v24, %v1298_v34  ;;  %v3591_v52 = vadd.f32 %v2782_v42, %v1306_v43  ;;  %v2698_v54 = vpop.f32.mrb[7].mxu0  ;;  %v2784_v57 = vpop.f32.mrb[11].mxu1 }
 0x3b3   :  { %v2960_v26 = vmax.f32 %v3586_v45, 0.0  ;;  %v2962_v58 = vmax.f32 %v3590_v46, 0.0  ;;  %v3588_v7 = vadd.f32 %v2698_v54, %v1302_v35  ;;  %v3592_v59 = vadd.f32 %v2784_v57, %v1310_v37 }
 0x3b4   :  { %v2975_v23 = vrot.slane %v2959_v47, 4  ;;  %v2987_v60 = vrot.slane %v2961_v12, 4  ;;  %v2967_v61 = vmax.f32 %v3587_v48, 0.0  ;;  %v2969_v62 = vmax.f32 %v3591_v52, 0.0 }
 0x3b5   :  { %v2981_v63 = vrot.slane %v2960_v26, 4  ;;  %v2993_v0 = vrot.slane %v2962_v58, 4  ;;  %v2968_v1 = vmax.f32 %v3588_v7, 0.0  ;;  %v2970_v49 = vmax.f32 %v3592_v59, 0.0 }
 0x3b6   :  { %v2976_v50 = vmax.f32 %v2959_v47, %v2975_v23  ;;  %v2988_v51 = vmax.f32 %v2961_v12, %v2987_v60  ;;  %v3023_v53 = vrot.slane %v2967_v61, 4  ;;  %v3035_v55 = vrot.slane %v2969_v62, 4 }
 0x3b7   :  { %v2982_v56 = vmax.f32 %v2960_v26, %v2981_v63  ;;  %v2994_v3 = vmax.f32 %v2962_v58, %v2993_v0  ;;  %v3029_v5 = vrot.slane %v2968_v1, 4  ;;  %v3041_v6 = vrot.slane %v2970_v49, 4 }
 0x3b8   :  { %v2977_v8 = vrot.slane %v2976_v50, 2  ;;  %v2989_v10 = vrot.slane %v2988_v51, 2  ;;  %v3024_v11 = vmax.f32 %v2967_v61, %v3023_v53  ;;  %v3036_v13 = vmax.f32 %v2969_v62, %v3035_v55 }
 0x3b9   :  { %v2983_v14 = vrot.slane %v2982_v56, 2  ;;  %v2995_v15 = vrot.slane %v2994_v3, 2  ;;  %v3030_v16 = vmax.f32 %v2968_v1, %v3029_v5  ;;  %v3042_v17 = vmax.f32 %v2970_v49, %v3041_v6 }
 0x3ba   :  { %v2978_v18 = vmax.f32 %v2976_v50, %v2977_v8  ;;  %v2990_v19 = vmax.f32 %v2988_v51, %v2989_v10  ;;  %v3025_v20 = vrot.slane %v3024_v11, 2  ;;  %v3037_v21 = vrot.slane %v3036_v13, 2 }
 0x3bb   :  { %v2984_v22 = vmax.f32 %v2982_v56, %v2983_v14  ;;  %v2996_v25 = vmax.f32 %v2994_v3, %v2995_v15  ;;  %v3031_v27 = vrot.slane %v3030_v16, 2  ;;  %v3043_v28 = vrot.slane %v3042_v17, 2 }
 0x3bc   :  { %v2979_v29 = vrot.slane %v2978_v18, 1  ;;  %v2991_v30 = vrot.slane %v2990_v19, 1  ;;  %v3026_v32 = vmax.f32 %v3024_v11, %v3025_v20  ;;  %v3038_v33 = vmax.f32 %v3036_v13, %v3037_v21 }
 0x3bd   :  { %v2985_v34 = vrot.slane %v2984_v22, 1  ;;  %v2997_v43 = vrot.slane %v2996_v25, 1  ;;  %v3032_v35 = vmax.f32 %v3030_v16, %v3031_v27  ;;  %v3044_v36 = vmax.f32 %v3042_v17, %v3043_v28 }
 0x3be   :  { %v2980_v37 = vmax.f32 %v2978_v18, %v2979_v29  ;;  %v2992_v2 = vmax.f32 %v2990_v19, %v2991_v30  ;;  %v3027_v38 = vrot.slane %v3026_v32, 1  ;;  %v3039_v39 = vrot.slane %v3038_v33, 1 }
 0x3bf   :  { %v2986_v40 = vmax.f32 %v2984_v22, %v2985_v34  ;;  %v2998_v41 = vmax.f32 %v2996_v25, %v2997_v43  ;;  %v3033_v44 = vrot.slane %v3032_v35, 1  ;;  %v3045_v45 = vrot.slane %v3044_v36, 1 }
 0x3c0   :  { %v3028_v46 = vmax.f32 %v3026_v32, %v3027_v38  ;;  %v3040_v24 = vmax.f32 %v3038_v33, %v3039_v39  ;;  %v1313_v60 = vsub.s32 4, %v4142_v4  ;;  %v1321_v61 = vsub.s32 6, %v4142_v4 }
 0x3c1   :  { %v3087_v42 = vcombine.low %v2980_v37, %v2986_v40  ;;  %v3088_v47 = vcombine.low %v2992_v2, %v2998_v41  ;;  %v3034_v12 = vmax.f32 %v3032_v35, %v3033_v44  ;;  %v3046_v48 = vmax.f32 %v3044_v36, %v3045_v45 }
 0x3c2   :  { %v1317_v62 = vsub.s32 5, %v4142_v4  ;;  %v1325_v63 = vsub.s32 7, %v4142_v4  ;;  %v1314_v0 = vrot.slane %v4216_v31, %v1313_v60  ;;  %v1322_v1 = vrot.slane %v4216_v31, %v1321_v61 }
 0x3c3   :  { %v4232_v52 = vrot.slane %v3087_v42, %v4229_v9  ;;  %v4235_v54 = vrot.slane %v3088_v47, %v4229_v9  ;;  %v3136_v57 = vcombine.low %v3028_v46, %v3034_v12  ;;  %v3137_v26 = vcombine.low %v3040_v24, %v3046_v48 }
 0x3c4   :  { %v1318_v49 = vrot.slane %v4216_v31, %v1317_v62  ;;  %v1326_v50 = vrot.slane %v4216_v31, %v1325_v63 }
 0x3c5   :  { %v4238_v58 = vrot.slane %v3136_v57, %v4229_v9  ;;  %v4241_v7 = vrot.slane %v3137_v26, %v4229_v9  ;;  %v3119_v59 = vcombine.low %v4232_v52, %v4235_v54 }
 0x3c7   :  { %v3168_v23 = vcombine.low %v4238_v58, %v4241_v7 }
 0x42f   :  { %v2864_v51 = vpop.f32.mrb[8].mxu0 }
 0x430   :  { %v3593_v53 = vadd.f32 %v2864_v51, %v1314_v0  ;;  %v2950_v55 = vpop.f32.mrb[12].mxu1  ;;  %v2866_v56 = vpop.f32.mrb[9].mxu0 }
 0x431   :  { %v3597_v3 = vadd.f32 %v2950_v55, %v1322_v1  ;;  %v3594_v5 = vadd.f32 %v2866_v56, %v1318_v49  ;;  %v2952_v6 = vpop.f32.mrb[13].mxu1  ;;  %v2868_v8 = vpop.f32.mrb[10].mxu0 }
 0x432   :  { %v2963_v10 = vmax.f32 %v3593_v53, 0.0  ;;  %v3598_v11 = vadd.f32 %v2952_v6, %v1326_v50  ;;  %v3595_v13 = vadd.f32 %v2868_v8, %v1314_v0  ;;  %v2954_v4 = vpop.f32.mrb[14].mxu1  ;;  %v2870_v14 = vpop.f32.mrb[11].mxu0 }
 0x433   :  { %v2965_v15 = vmax.f32 %v3597_v3, 0.0  ;;  %v2964_v16 = vmax.f32 %v3594_v5, 0.0  ;;  %v3599_v17 = vadd.f32 %v2954_v4, %v1322_v1  ;;  %v3596_v18 = vadd.f32 %v2870_v14, %v1318_v49  ;;  %v2956_v19 = vpop.f32.mrb[15].mxu1 }
 0x434   :  { %v2999_v20 = vrot.slane %v2963_v10, 4  ;;  %v2966_v31 = vmax.f32 %v3598_v11, 0.0  ;;  %v2971_v21 = vmax.f32 %v3595_v13, 0.0  ;;  %v3600_v22 = vadd.f32 %v2956_v19, %v1326_v50 }
 0x435   :  { %v3011_v25 = vrot.slane %v2965_v15, 4  ;;  %v3005_v27 = vrot.slane %v2964_v16, 4  ;;  %v2973_v28 = vmax.f32 %v3599_v17, 0.0  ;;  %v2972_v29 = vmax.f32 %v3596_v18, 0.0 }
 0x436   :  { %v3000_v30 = vmax.f32 %v2963_v10, %v2999_v20  ;;  %v3017_v32 = vrot.slane %v2966_v31, 4  ;;  %v3047_v33 = vrot.slane %v2971_v21, 4  ;;  %v2974_v34 = vmax.f32 %v3600_v22, 0.0 }
 0x437   :  { %v3012_v43 = vmax.f32 %v2965_v15, %v3011_v25  ;;  %v3006_v35 = vmax.f32 %v2964_v16, %v3005_v27  ;;  %v3059_v36 = vrot.slane %v2973_v28, 4  ;;  %v3053_v37 = vrot.slane %v2972_v29, 4 }
 0x438   :  { %v3001_v2 = vrot.slane %v3000_v30, 2  ;;  %v3018_v38 = vmax.f32 %v2966_v31, %v3017_v32  ;;  %v3048_v39 = vmax.f32 %v2971_v21, %v3047_v33  ;;  %v3065_v40 = vrot.slane %v2974_v34, 4 }
 0x439   :  { %v3013_v41 = vrot.slane %v3012_v43, 2  ;;  %v3007_v44 = vrot.slane %v3006_v35, 2  ;;  %v3060_v45 = vmax.f32 %v2973_v28, %v3059_v36  ;;  %v3054_v46 = vmax.f32 %v2972_v29, %v3053_v37 }
 0x43a   :  { %v3002_v24 = vmax.f32 %v3000_v30, %v3001_v2  ;;  %v3019_v42 = vrot.slane %v3018_v38, 2  ;;  %v3049_v47 = vrot.slane %v3048_v39, 2  ;;  %v3066_v12 = vmax.f32 %v2974_v34, %v3065_v40 }
 0x43b   :  { %v3014_v48 = vmax.f32 %v3012_v43, %v3013_v41  ;;  %v3008_v57 = vmax.f32 %v3006_v35, %v3007_v44  ;;  %v3061_v26 = vrot.slane %v3060_v45, 2  ;;  %v3055_v60 = vrot.slane %v3054_v46, 2 }
 0x43c   :  { %v3003_v61 = vrot.slane %v3002_v24, 1  ;;  %v3020_v62 = vmax.f32 %v3018_v38, %v3019_v42  ;;  %v3050_v63 = vmax.f32 %v3048_v39, %v3049_v47  ;;  %v3067_v0 = vrot.slane %v3066_v12, 2 }
 0x43d   :  { %v3015_v1 = vrot.slane %v3014_v48, 1  ;;  %v3009_v49 = vrot.slane %v3008_v57, 1  ;;  %v3062_v50 = vmax.f32 %v3060_v45, %v3061_v26  ;;  %v3056_v51 = vmax.f32 %v3054_v46, %v3055_v60 }
 0x43e   :  { %v3004_v53 = vmax.f32 %v3002_v24, %v3003_v61  ;;  %v3021_v55 = vrot.slane %v3020_v62, 1  ;;  %v3051_v56 = vrot.slane %v3050_v63, 1  ;;  %v3068_v3 = vmax.f32 %v3066_v12, %v3067_v0 }
 0x43f   :  { %v3016_v5 = vmax.f32 %v3014_v48, %v3015_v1  ;;  %v3010_v6 = vmax.f32 %v3008_v57, %v3009_v49  ;;  %v3063_v8 = vrot.slane %v3062_v50, 1  ;;  %v3057_v10 = vrot.slane %v3056_v51, 1 }
 0x440   :  { %v3022_v11 = vmax.f32 %v3020_v62, %v3021_v55  ;;  %v3052_v13 = vmax.f32 %v3050_v63, %v3051_v56  ;;  %v3069_v4 = vrot.slane %v3068_v3, 1  ;;  %v3127_v28 = vrot.slane %v3119_v59, %v4229_v9 }
 0x441   :  { %v3089_v14 = vcombine.low %v3004_v53, %v3010_v6  ;;  %v3064_v15 = vmax.f32 %v3062_v50, %v3063_v8  ;;  %v3058_v16 = vmax.f32 %v3056_v51, %v3057_v10  ;;  %v3176_v33 = vrot.slane %v3168_v23, %v4229_v9 }
 0x442   :  { %v3090_v17 = vcombine.low %v3016_v5, %v3022_v11  ;;  %v3070_v18 = vmax.f32 %v3068_v3, %v3069_v4 }
 0x443   :  { %v3111_v19 = vrot.slane %v3089_v14, %v4229_v9  ;;  %v3138_v20 = vcombine.low %v3052_v13, %v3058_v16 }
 0x444   :  { %v3118_v31 = vrot.slane %v3090_v17, %v4229_v9  ;;  %v3139_v21 = vcombine.low %v3064_v15, %v3070_v18 }
 0x445   :  { %v3160_v22 = vrot.slane %v3138_v20, %v4229_v9 }
 0x446   :  { %v3167_v25 = vrot.slane %v3139_v21, %v4229_v9  ;;  %v3120_v27 = vcombine.low %v3111_v19, %v3118_v31 }
 0x448   :  { %v3134_v29 = vrot.slane %v3120_v27, %v4229_v9  ;;  %v3169_v30 = vcombine.low %v3160_v22, %v3167_v25 }
 0x44a   :  { %v3135_v32 = vcombine.low %v3127_v28, %v3134_v29  ;;  %v3183_v34 = vrot.slane %v3169_v30, %v4229_v9 }
 0x44c   :  { %v3184_v43 = vcombine.low %v3176_v33, %v3183_v34  ;;  %3187 = vst [vmem:[#allocation14] sm:$0xff] %v3135_v32 }
 0x44e   :  { %3188 = vst [vmem:[#allocation14 + $0x8] sm:$0xff] %v3184_v43 }
 0x44f   :  { %3976 = shalt.err (!%p3973_p4)
}
 0x450   :  { %s3977_s22 = scalar_lea.hbm %s4291_s7, 256 }
 0x451   :  { %p3978_p5 = scmp.ne.s32.totalorder %s4291_s7, %s3977_s22  ;;  %p3981_p6 = scmp.lt.u32.totalorder %s3977_s22, %s4291_s7 }
 0x453   :  { %p3983_p7 = pnand %p3981_p6, %p3978_p5 }
 0x455   :  { %3986 = shalt.err (!%p3983_p7)
}
 0x456   :  { %3200 = dma.vmem_to_hbm [thread:$0]  %s3195_s19, 256, %s4291_s7, [#allocation4], %s3998_s11, %s3998_s11, %s3999_s12  }
 0x457   :  { %3995 = dma.done.wait [#allocation4], 256  }
 0x458   :  { %3996 = vsyncadd [#allocation4], 4294967040 }
 0x459   :  { %3204 = vsyncpa [#allocation3], 1 }
 0x45a   :  { %3205 = vsyncpa [#allocation6], 1 }
 0x45b   :  { %3206 = vsyncpa [#allocation9], 1 }
 0x45c   :  { %3207 = vsyncpa [#allocation12], 1 }
 0x45d   :  { %3208 = vsyncpa [#allocation4], 1 }

</bundles_post_ra>
